<compile_context>
chip_gen: v5e
topology: v5e:2x2
jax: 0.10.0
libtpu: 0.0.40
codegen_flags: <defaults>
</compile_context>

<pallas_src>
import functools

import jax
import jax.numpy as jnp
from jax.experimental import pallas as pl
from jax.experimental.pallas import tpu as pltpu


# ----------------------------------------------------------------------------
# helpers
# ----------------------------------------------------------------------------
def _round_up(x, m):
    return (x + m - 1) // m * m


def _largest_divisor(x, candidates):
    for c in candidates:
        if x % c == 0:
            return c
    return candidates[-1]


def _pad2d(a, rows, cols):
    pr, pc = rows - a.shape[0], cols - a.shape[1]
    if pr or pc:
        a = jnp.pad(a, ((0, pr), (0, pc)))
    return a


# ----------------------------------------------------------------------------
# Tiled fused matmul:  out = x @ w + bias  (+ ReLU), bf16 in / f32 accumulate
# ----------------------------------------------------------------------------
def _matmul_bias_kernel(x_ref, w_ref, b_ref, o_ref, acc_ref, *, relu):
    k = pl.program_id(2)

    @pl.when(k == 0)
    def _():
        acc_ref[...] = jnp.zeros_like(acc_ref)

    acc_ref[...] += jnp.dot(x_ref[...], w_ref[...],
                            preferred_element_type=jnp.float32)

    @pl.when(k == pl.num_programs(2) - 1)
    def _():
        r = acc_ref[...] + b_ref[...]
        if relu:
            r = jnp.maximum(r, 0.0)
        o_ref[...] = r.astype(o_ref.dtype)


def fused_matmul_bias(x, w, bias, *, relu):
    """(M,K) @ (K,N) + bias[N], optional ReLU.

    M is padded to a multiple of 8, K and N to multiples of 128 (zero padding,
    mathematically inert).  Returns the PADDED (Mp, Np) f32 result so callers
    can keep lane-dense slabs flowing; slice if the true extent is needed.
    """
    M, K = x.shape
    K2, N = w.shape
    assert K == K2

    Mp = _round_up(M, 8)
    Kp = _round_up(K, 128)
    Np = _round_up(N, 128)

    # Tile choice: keep weights fully resident (single K/N block) when small,
    # otherwise 128-aligned tiles that divide the padded dims.
    tm = Mp if Mp <= 256 else _largest_divisor(Mp, (256, 128, 64, 32, 16, 8))
    tk = Kp if Kp <= 1024 else _largest_divisor(Kp, (512, 256, 128))
    tn = Np if Np <= 512 else _largest_divisor(Np, (256, 128))

    xp = _pad2d(x.astype(jnp.bfloat16), Mp, Kp)
    wp = _pad2d(w.astype(jnp.bfloat16), Kp, Np)
    bp = _pad2d(bias.reshape(1, N).astype(jnp.float32), 1, Np)

    grid = (Mp // tm, Np // tn, Kp // tk)

    out = pl.pallas_call(
        functools.partial(_matmul_bias_kernel, relu=relu),
        out_shape=jax.ShapeDtypeStruct((Mp, Np), jnp.float32),
        grid=grid,
        in_specs=[
            pl.BlockSpec((tm, tk), lambda i, j, k: (i, k)),
            pl.BlockSpec((tk, tn), lambda i, j, k: (k, j)),   # no M dependence
            pl.BlockSpec((1, tn), lambda i, j, k: (0, j)),
        ],
        out_specs=pl.BlockSpec((tm, tn), lambda i, j, k: (i, j)),
        scratch_shapes=[pltpu.VMEM((tm, tn), jnp.float32)],
        compiler_params=pltpu.CompilerParams(
            dimension_semantics=("parallel", "parallel", "arbitrary"),
            vmem_limit_bytes=32 * 1024 * 1024,
        ),
        cost_estimate=pl.CostEstimate(
            flops=2 * Mp * Np * Kp,
            transcendentals=0,
            bytes_accessed=2 * (Mp * Kp + Kp * Np) + 4 * (Mp * Np + Np),
        ),
    )(xp, wp, bp)
    return out


# ----------------------------------------------------------------------------
# MaxPool2d(2,2): one streamed kernel, no XLA gathers, 128-aligned lane slices
# ----------------------------------------------------------------------------
def _maxpool_kernel(x_ref, o_ref, *, w, c):
    # x block: (tm, 2*w*c) = two consecutive image rows per output row.
    x = x_ref[...]
    half = w * c
    v = jnp.maximum(x[:, :half], x[:, half:])          # vertical 2->1 max
    for i in range(w // 2):                             # horizontal 2->1 max
        o_ref[:, i * c:(i + 1) * c] = jnp.maximum(
            v[:, (2 * i) * c:(2 * i + 1) * c],
            v[:, (2 * i + 1) * c:(2 * i + 2) * c])


def _pick_row_tile(rows, lane_elems, elem_bytes=4, cap_bytes=4 * 1024 * 1024):
    for t in (512, 256, 128, 64, 32, 16, 8):
        if rows % t == 0 and t <= max(rows // 2, 1) \
                and t * lane_elems * elem_bytes <= cap_bytes:
            return t
    return rows


def maxpool2x2(x_nhwc):
    """nn.MaxPool2d(kernel_size=2, stride=2) on an NHWC tensor (C % 128 == 0)."""
    n, h, w, c = x_nhwc.shape
    assert h % 2 == 0 and w % 2 == 0, "MaxPool2d(2,2) needs even H and W"
    assert c % 128 == 0, "channels must be lane-dense (padded to 128)"
    ho, wo = h // 2, w // 2
    rows = n * ho
    lane_in = 2 * w * c
    lane_out = wo * c

    x2 = x_nhwc.reshape(rows, lane_in)                  # free reshape (NHWC)
    tm = _pick_row_tile(rows, lane_in)

    out = pl.pallas_call(
        functools.partial(_maxpool_kernel, w=w, c=c),
        out_shape=jax.ShapeDtypeStruct((rows, lane_out), jnp.float32),
        grid=(rows // tm,),
        in_specs=[pl.BlockSpec((tm, lane_in), lambda i: (i, 0))],
        out_specs=pl.BlockSpec((tm, lane_out), lambda i: (i, 0)),
        compiler_params=pltpu.CompilerParams(
            dimension_semantics=("parallel",),
            vmem_limit_bytes=32 * 1024 * 1024,
        ),
    )(x2)
    return out.reshape(n, ho, wo, c)


# ----------------------------------------------------------------------------
# Glue: im2col + conv/BN/ReLU layer
# ----------------------------------------------------------------------------
def im2col(x_nhwc, K, stride, pad):
    x = jnp.pad(x_nhwc, ((0, 0), (pad, pad), (pad, pad), (0, 0)))
    N, H, W, C = x.shape
    Ho = (H - K) // stride + 1
    Wo = (W - K) // stride + 1
    taps = []
    for i in range(K):
        for j in range(K):
            taps.append(x[:, i:i + stride * Ho:stride, j:j + stride * Wo:stride, :])
    cols = jnp.stack(taps, axis=3)        # (N, Ho, Wo, K*K, C): tap-major, then Cin
    return cols.reshape(N * Ho * Wo, K * K * C), (N, Ho, Wo)


def conv_bn_relu(x_nhwc, w_hwio, bias, gamma, beta, mean, var, *,
                 stride, pad, cin, eps=1e-5):
    # Previous layer may carry zero-padded channels: slice to the true Cin
    # (this slice fuses into the im2col gather).
    x_nhwc = x_nhwc[..., :cin]
    K = w_hwio.shape[0]
    Cout = w_hwio.shape[-1]

    # Fold eval-mode BN (and conv bias) into the weights / shift.
    s = gamma / jnp.sqrt(var + eps)
    w_folded = (w_hwio * s).reshape(-1, Cout)      # matches im2col tap ordering
    shift = (bias - mean) * s + beta

    cols, (n, ho, wo) = im2col(x_nhwc, K, stride, pad)
    y = fused_matmul_bias(cols, w_folded, shift, relu=True)   # (Mp, Np)
    M = n * ho * wo
    if y.shape[0] != M:
        y = y[:M]
    # Keep padded (zero) output channels: lane-dense for the pool / next layer.
    return y.reshape(n, ho, wo, y.shape[-1])


# ----------------------------------------------------------------------------
# Parameters (deterministic, PyTorch-default-like shapes)
# ----------------------------------------------------------------------------
def init_params(image_size, key):
    assert image_size % 16 == 0, "IMAGE_SIZE must be a multiple of 16"
    keys = jax.random.split(key, 8)

    def conv_p(k, ksz, cin, cout):
        w = jax.random.normal(k, (ksz, ksz, cin, cout), jnp.float32) * 0.05
        b = jnp.zeros((cout,), jnp.float32)
        gamma = jnp.ones((cout,), jnp.float32)
        beta = jnp.zeros((cout,), jnp.float32)
        mean = jnp.zeros((cout,), jnp.float32)   # BN running_mean init
        var = jnp.ones((cout,), jnp.float32)     # BN running_var init
        return (w, b, gamma, beta, mean, var)

    def fc_p(k, din, dout):
        w = jax.random.normal(k, (din, dout), jnp.float32) * 0.05
        b = jnp.zeros((dout,), jnp.float32)
        return (w, b)

    hw = image_size // 16
    feat = 128 * hw * hw

    w1, b1 = fc_p(keys[4], feat, 512)
    # fc1's weight is defined against PyTorch's NCHW flatten order; permute its
    # rows ONCE here so the forward pass can flatten NHWC directly (removes the
    # full-activation transpose before the FC head).
    w1 = w1.reshape(128, hw, hw, 512).transpose(1, 2, 0, 3).reshape(feat, 512)

    return {
        "conv1": conv_p(keys[0], 7, 3, 32),
        "conv2": conv_p(keys[1], 5, 32, 64),
        "conv3": conv_p(keys[2], 3, 64, 128),
        "conv4": conv_p(keys[3], 3, 128, 128),
        "fc1": (w1, b1),
        "fc2": fc_p(keys[5], 512, 128),
        "fc3": fc_p(keys[6], 128, 9),
    }


# ----------------------------------------------------------------------------
# Forward pass (matches CNNModel.forward, eval-mode)
# ----------------------------------------------------------------------------
def cnn_forward(x_nchw, params):
    n = x_nchw.shape[0]
    x = jnp.transpose(x_nchw, (0, 2, 3, 1)).astype(jnp.float32)  # NCHW -> NHWC

    x = conv_bn_relu(x, *params["conv1"], stride=2, pad=3, cin=3)
    x = maxpool2x2(x)
    x = conv_bn_relu(x, *params["conv2"], stride=1, pad=2, cin=32)
    x = maxpool2x2(x)
    x = conv_bn_relu(x, *params["conv3"], stride=1, pad=1, cin=64)
    x = conv_bn_relu(x, *params["conv4"], stride=1, pad=1, cin=128)
    x = maxpool2x2(x)

    # NHWC flatten (fc1 weight rows were permuted at init to match nn.Flatten
    # on NCHW exactly) -- no activation transpose needed.
    x = x.reshape(n, -1)

    w1, b1 = params["fc1"]
    w2, b2 = params["fc2"]
    w3, b3 = params["fc3"]

    x = fused_matmul_bias(x, w1, b1, relu=True)    # (Mp, 512)
    # TODO(synk): nn.Dropout(0.5) treated as identity (eval-mode semantics).
    x = fused_matmul_bias(x, w2, b2, relu=True)    # (Mp, 128)
    x = fused_matmul_bias(x, w3, b3, relu=False)   # (Mp, 128) -- N padded from 9

    return x[:n, :9].reshape(-1, 3, 3)


# ----------------------------------------------------------------------------
if __name__ == "__main__":
    IMAGE_SIZE = 32   # must be a multiple of 16 (hparams.IMAGE_SIZE)
    BATCH = 2

    key = jax.random.PRNGKey(0)
    k_x, k_p = jax.random.split(key)
    x = jax.random.normal(k_x, (BATCH, 3, IMAGE_SIZE, IMAGE_SIZE), jnp.float32)
    params = init_params(IMAGE_SIZE, k_p)

    fwd = jax.jit(cnn_forward)
    out = jax.block_until_ready(fwd(x, params))
    assert out.shape == (BATCH, 3, 3), out.shape
    print("KERNEL_OK")
</pallas_src>

<mosaic_0001>
module attributes {stable_mosaic.version = 11 : i64} {
  func.func @_matmul_bias_kernel(%arg0: i32, %arg1: i32, %arg2: i32, %arg3: memref<256x256xbf16, #tpu.memory_space<vmem>>, %arg4: memref<256x128xbf16, #tpu.memory_space<vmem>>, %arg5: memref<1x128xf32, #tpu.memory_space<vmem>>, %arg6: memref<256x128xf32, #tpu.memory_space<vmem>>, %arg7: memref<256x128xf32, #tpu.memory_space<vmem>>) attributes {dimension_semantics = [#tpu.dimension_semantics<parallel>, #tpu.dimension_semantics<parallel>, #tpu.dimension_semantics<arbitrary>], iteration_bounds = array<i64: 2, 1, 1>, scalar_prefetch = 0 : i64, scratch_operands = 1 : i64, tpu.core_type = #tpu.core_type<tc>, window_params = [{transform_indices = @transform_0, window_bounds = array<i64: 256, 256>}, {transform_indices = @transform_1, window_bounds = array<i64: 256, 128>}, {transform_indices = @transform_2, window_bounds = array<i64: 1, 128>}, {transform_indices = @transform_3, window_bounds = array<i64: 256, 128>}]} {
    %c0_i32 = arith.constant 0 : i32
    %0 = arith.cmpi eq, %arg2, %c0_i32 : i32
    %1 = arith.extui %0 : i1 to i32
    %c0_i32_0 = arith.constant 0 : i32
    %2 = arith.cmpi ne, %1, %c0_i32_0 : i32
    scf.if %2 {
      %cst_10 = arith.constant 0.000000e+00 : f32
      %12 = vector.broadcast %cst_10 : f32 to vector<256x128xf32>
      %c0_11 = arith.constant 0 : index
      %c0_12 = arith.constant 0 : index
      %13 = vector.load %arg7[%c0_11, %c0_12] : memref<256x128xf32, #tpu.memory_space<vmem>>, vector<256x128xf32>
      tpu.vector_store %arg7[%c0_11, %c0_12], %12 {strides = array<i32>} : memref<256x128xf32, #tpu.memory_space<vmem>>, vector<256x128xf32>,
    } else {
    }
    %c0 = arith.constant 0 : index
    %c0_1 = arith.constant 0 : index
    %3 = vector.load %arg7[%c0, %c0_1] : memref<256x128xf32, #tpu.memory_space<vmem>>, vector<256x128xf32>
    %c0_2 = arith.constant 0 : index
    %c0_3 = arith.constant 0 : index
    %4 = vector.load %arg3[%c0_2, %c0_3] : memref<256x256xbf16, #tpu.memory_space<vmem>>, vector<256x256xbf16>
    %c0_4 = arith.constant 0 : index
    %c0_5 = arith.constant 0 : index
    %5 = vector.load %arg4[%c0_4, %c0_5] : memref<256x128xbf16, #tpu.memory_space<vmem>>, vector<256x128xbf16>
    %cst = arith.constant dense<0.000000e+00> : vector<256x128xf32>
    %6 = tpu.matmul %4, %5, %cst {dimension_numbers = #tpu.dot_dimension_numbers<[1], [0], [0], [1], [0, 0, 1, 1], [], []>} : vector<256x256xbf16>, vector<256x128xbf16>, vector<256x128xf32> -> vector<256x128xf32>
    %7 = arith.addf %3, %6 : vector<256x128xf32>
    %c0_6 = arith.constant 0 : index
    %c0_7 = arith.constant 0 : index
    %8 = vector.load %arg7[%c0_6, %c0_7] : memref<256x128xf32, #tpu.memory_space<vmem>>, vector<256x128xf32>
    tpu.vector_store %arg7[%c0_6, %c0_7], %7 {strides = array<i32>} : memref<256x128xf32, #tpu.memory_space<vmem>>, vector<256x128xf32>,
    %c0_i32_8 = arith.constant 0 : i32
    %9 = arith.cmpi eq, %arg2, %c0_i32_8 : i32
    %10 = arith.extui %9 : i1 to i32
    %c0_i32_9 = arith.constant 0 : i32
    %11 = arith.cmpi ne, %10, %c0_i32_9 : i32
    scf.if %11 {
      %c0_10 = arith.constant 0 : index
      %c0_11 = arith.constant 0 : index
      %12 = vector.load %arg7[%c0_10, %c0_11] : memref<256x128xf32, #tpu.memory_space<vmem>>, vector<256x128xf32>
      %c0_12 = arith.constant 0 : index
      %c0_13 = arith.constant 0 : index
      %13 = vector.load %arg5[%c0_12, %c0_13] : memref<1x128xf32, #tpu.memory_space<vmem>>, vector<1x128xf32>
      %14 = vector.broadcast %13 : vector<1x128xf32> to vector<256x128xf32>
      %15 = arith.addf %12, %14 : vector<256x128xf32>
      %cst_14 = arith.constant 0.000000e+00 : f32
      %16 = vector.broadcast %cst_14 : f32 to vector<256x128xf32>
      %17 = arith.maximumf %15, %16 : vector<256x128xf32>
      %c0_15 = arith.constant 0 : index
      %c0_16 = arith.constant 0 : index
      %18 = vector.load %arg6[%c0_15, %c0_16] : memref<256x128xf32, #tpu.memory_space<vmem>>, vector<256x128xf32>
      tpu.vector_store %arg6[%c0_15, %c0_16], %17 {strides = array<i32>} : memref<256x128xf32, #tpu.memory_space<vmem>>, vector<256x128xf32>,
    } else {
    }
    return
  }
  func.func @transform_0(%arg0: i32, %arg1: i32, %arg2: i32) -> (i32, i32) {
    %c0_i32 = arith.constant 0 : i32
    return %arg0, %arg2 : i32, i32
  }
  func.func @transform_1(%arg0: i32, %arg1: i32, %arg2: i32) -> (i32, i32) {
    %c0_i32 = arith.constant 0 : i32
    return %arg2, %arg1 : i32, i32
  }
  func.func @transform_2(%arg0: i32, %arg1: i32, %arg2: i32) -> (i32, i32) {
    %c0_i32 = arith.constant 0 : i32
    %c0_i32_0 = arith.constant 0 : i32
    return %c0_i32, %arg1 : i32, i32
  }
  func.func @transform_3(%arg0: i32, %arg1: i32, %arg2: i32) -> (i32, i32) {
    %c0_i32 = arith.constant 0 : i32
    return %arg0, %arg1 : i32, i32
  }
}

module attributes {stable_mosaic.version = 11 : i64} {
  func.func @_maxpool_kernel(%arg0: i32, %arg1: memref<8x4096xf32, #tpu.memory_space<vmem>>, %arg2: memref<8x1024xf32, #tpu.memory_space<vmem>>) attributes {dimension_semantics = [#tpu.dimension_semantics<parallel>], iteration_bounds = array<i64: 2>, scalar_prefetch = 0 : i64, scratch_operands = 0 : i64, tpu.core_type = #tpu.core_type<tc>, window_params = [{transform_indices = @transform_0, window_bounds = array<i64: 8, 4096>}, {transform_indices = @transform_1, window_bounds = array<i64: 8, 1024>}]} {
    %c0 = arith.constant 0 : index
    %c0_0 = arith.constant 0 : index
    %0 = vector.load %arg1[%c0, %c0_0] : memref<8x4096xf32, #tpu.memory_space<vmem>>, vector<8x4096xf32>
    %1 = vector.extract_strided_slice %0 {offsets = [0, 0], sizes = [8, 2048], strides = [1, 1]} : vector<8x4096xf32> to vector<8x2048xf32>
    %2 = vector.extract_strided_slice %0 {offsets = [0, 2048], sizes = [8, 2048], strides = [1, 1]} : vector<8x4096xf32> to vector<8x2048xf32>
    %3 = arith.maximumf %1, %2 : vector<8x2048xf32>
    %4 = vector.extract_strided_slice %3 {offsets = [0, 0], sizes = [8, 128], strides = [1, 1]} : vector<8x2048xf32> to vector<8x128xf32>
    %5 = vector.extract_strided_slice %3 {offsets = [0, 128], sizes = [8, 128], strides = [1, 1]} : vector<8x2048xf32> to vector<8x128xf32>
    %6 = arith.maximumf %4, %5 : vector<8x128xf32>
    %c0_1 = arith.constant 0 : index
    %c0_2 = arith.constant 0 : index
    %7 = vector.load %arg2[%c0_1, %c0_2] : memref<8x1024xf32, #tpu.memory_space<vmem>>, vector<8x128xf32>
    tpu.vector_store %arg2[%c0_1, %c0_2], %6 {strides = array<i32>} : memref<8x1024xf32, #tpu.memory_space<vmem>>, vector<8x128xf32>,
    %8 = vector.extract_strided_slice %3 {offsets = [0, 256], sizes = [8, 128], strides = [1, 1]} : vector<8x2048xf32> to vector<8x128xf32>
    %9 = vector.extract_strided_slice %3 {offsets = [0, 384], sizes = [8, 128], strides = [1, 1]} : vector<8x2048xf32> to vector<8x128xf32>
    %10 = arith.maximumf %8, %9 : vector<8x128xf32>
    %c0_3 = arith.constant 0 : index
    %c128 = arith.constant 128 : index
    %11 = vector.load %arg2[%c0_3, %c128] : memref<8x1024xf32, #tpu.memory_space<vmem>>, vector<8x128xf32>
    tpu.vector_store %arg2[%c0_3, %c128], %10 {strides = array<i32>} : memref<8x1024xf32, #tpu.memory_space<vmem>>, vector<8x128xf32>,
    %12 = vector.extract_strided_slice %3 {offsets = [0, 512], sizes = [8, 128], strides = [1, 1]} : vector<8x2048xf32> to vector<8x128xf32>
    %13 = vector.extract_strided_slice %3 {offsets = [0, 640], sizes = [8, 128], strides = [1, 1]} : vector<8x2048xf32> to vector<8x128xf32>
    %14 = arith.maximumf %12, %13 : vector<8x128xf32>
    %c0_4 = arith.constant 0 : index
    %c256 = arith.constant 256 : index
    %15 = vector.load %arg2[%c0_4, %c256] : memref<8x1024xf32, #tpu.memory_space<vmem>>, vector<8x128xf32>
    tpu.vector_store %arg2[%c0_4, %c256], %14 {strides = array<i32>} : memref<8x1024xf32, #tpu.memory_space<vmem>>, vector<8x128xf32>,
    %16 = vector.extract_strided_slice %3 {offsets = [0, 768], sizes = [8, 128], strides = [1, 1]} : vector<8x2048xf32> to vector<8x128xf32>
    %17 = vector.extract_strided_slice %3 {offsets = [0, 896], sizes = [8, 128], strides = [1, 1]} : vector<8x2048xf32> to vector<8x128xf32>
    %18 = arith.maximumf %16, %17 : vector<8x128xf32>
    %c0_5 = arith.constant 0 : index
    %c384 = arith.constant 384 : index
    %19 = vector.load %arg2[%c0_5, %c384] : memref<8x1024xf32, #tpu.memory_space<vmem>>, vector<8x128xf32>
    tpu.vector_store %arg2[%c0_5, %c384], %18 {strides = array<i32>} : memref<8x1024xf32, #tpu.memory_space<vmem>>, vector<8x128xf32>,
    %20 = vector.extract_strided_slice %3 {offsets = [0, 1024], sizes = [8, 128], strides = [1, 1]} : vector<8x2048xf32> to vector<8x128xf32>
    %21 = vector.extract_strided_slice %3 {offsets = [0, 1152], sizes = [8, 128], strides = [1, 1]} : vector<8x2048xf32> to vector<8x128xf32>
    %22 = arith.maximumf %20, %21 : vector<8x128xf32>
    %c0_6 = arith.constant 0 : index
    %c512 = arith.constant 512 : index
    %23 = vector.load %arg2[%c0_6, %c512] : memref<8x1024xf32, #tpu.memory_space<vmem>>, vector<8x128xf32>
    tpu.vector_store %arg2[%c0_6, %c512], %22 {strides = array<i32>} : memref<8x1024xf32, #tpu.memory_space<vmem>>, vector<8x128xf32>,
    %24 = vector.extract_strided_slice %3 {offsets = [0, 1280], sizes = [8, 128], strides = [1, 1]} : vector<8x2048xf32> to vector<8x128xf32>
    %25 = vector.extract_strided_slice %3 {offsets = [0, 1408], sizes = [8, 128], strides = [1, 1]} : vector<8x2048xf32> to vector<8x128xf32>
    %26 = arith.maximumf %24, %25 : vector<8x128xf32>
    %c0_7 = arith.constant 0 : index
    %c640 = arith.constant 640 : index
    %27 = vector.load %arg2[%c0_7, %c640] : memref<8x1024xf32, #tpu.memory_space<vmem>>, vector<8x128xf32>
    tpu.vector_store %arg2[%c0_7, %c640], %26 {strides = array<i32>} : memref<8x1024xf32, #tpu.memory_space<vmem>>, vector<8x128xf32>,
    %28 = vector.extract_strided_slice %3 {offsets = [0, 1536], sizes = [8, 128], strides = [1, 1]} : vector<8x2048xf32> to vector<8x128xf32>
    %29 = vector.extract_strided_slice %3 {offsets = [0, 1664], sizes = [8, 128], strides = [1, 1]} : vector<8x2048xf32> to vector<8x128xf32>
    %30 = arith.maximumf %28, %29 : vector<8x128xf32>
    %c0_8 = arith.constant 0 : index
    %c768 = arith.constant 768 : index
    %31 = vector.load %arg2[%c0_8, %c768] : memref<8x1024xf32, #tpu.memory_space<vmem>>, vector<8x128xf32>
    tpu.vector_store %arg2[%c0_8, %c768], %30 {strides = array<i32>} : memref<8x1024xf32, #tpu.memory_space<vmem>>, vector<8x128xf32>,
    %32 = vector.extract_strided_slice %3 {offsets = [0, 1792], sizes = [8, 128], strides = [1, 1]} : vector<8x2048xf32> to vector<8x128xf32>
    %33 = vector.extract_strided_slice %3 {offsets = [0, 1920], sizes = [8, 128], strides = [1, 1]} : vector<8x2048xf32> to vector<8x128xf32>
    %34 = arith.maximumf %32, %33 : vector<8x128xf32>
    %c0_9 = arith.constant 0 : index
    %c896 = arith.constant 896 : index
    %35 = vector.load %arg2[%c0_9, %c896] : memref<8x1024xf32, #tpu.memory_space<vmem>>, vector<8x128xf32>
    tpu.vector_store %arg2[%c0_9, %c896], %34 {strides = array<i32>} : memref<8x1024xf32, #tpu.memory_space<vmem>>, vector<8x128xf32>,
    return
  }
  func.func @transform_0(%arg0: i32) -> (i32, i32) {
    %c0_i32 = arith.constant 0 : i32
    %c0_i32_0 = arith.constant 0 : i32
    return %arg0, %c0_i32 : i32, i32
  }
  func.func @transform_1(%arg0: i32) -> (i32, i32) {
    %c0_i32 = arith.constant 0 : i32
    %c0_i32_0 = arith.constant 0 : i32
    return %arg0, %c0_i32 : i32, i32
  }
}

module attributes {stable_mosaic.version = 11 : i64} {
  func.func @_matmul_bias_kernel(%arg0: i32, %arg1: i32, %arg2: i32, %arg3: memref<128x896xbf16, #tpu.memory_space<vmem>>, %arg4: memref<896x128xbf16, #tpu.memory_space<vmem>>, %arg5: memref<1x128xf32, #tpu.memory_space<vmem>>, %arg6: memref<128x128xf32, #tpu.memory_space<vmem>>, %arg7: memref<128x128xf32, #tpu.memory_space<vmem>>) attributes {dimension_semantics = [#tpu.dimension_semantics<parallel>, #tpu.dimension_semantics<parallel>, #tpu.dimension_semantics<arbitrary>], iteration_bounds = array<i64: 1, 1, 1>, scalar_prefetch = 0 : i64, scratch_operands = 1 : i64, tpu.core_type = #tpu.core_type<tc>, window_params = [{transform_indices = @transform_0, window_bounds = array<i64: 128, 896>}, {transform_indices = @transform_1, window_bounds = array<i64: 896, 128>}, {transform_indices = @transform_2, window_bounds = array<i64: 1, 128>}, {transform_indices = @transform_3, window_bounds = array<i64: 128, 128>}]} {
    %c0_i32 = arith.constant 0 : i32
    %0 = arith.cmpi eq, %arg2, %c0_i32 : i32
    %1 = arith.extui %0 : i1 to i32
    %c0_i32_0 = arith.constant 0 : i32
    %2 = arith.cmpi ne, %1, %c0_i32_0 : i32
    scf.if %2 {
      %cst_10 = arith.constant 0.000000e+00 : f32
      %12 = vector.broadcast %cst_10 : f32 to vector<128x128xf32>
      %c0_11 = arith.constant 0 : index
      %c0_12 = arith.constant 0 : index
      %13 = vector.load %arg7[%c0_11, %c0_12] : memref<128x128xf32, #tpu.memory_space<vmem>>, vector<128x128xf32>
      tpu.vector_store %arg7[%c0_11, %c0_12], %12 {strides = array<i32>} : memref<128x128xf32, #tpu.memory_space<vmem>>, vector<128x128xf32>,
    } else {
    }
    %c0 = arith.constant 0 : index
    %c0_1 = arith.constant 0 : index
    %3 = vector.load %arg7[%c0, %c0_1] : memref<128x128xf32, #tpu.memory_space<vmem>>, vector<128x128xf32>
    %c0_2 = arith.constant 0 : index
    %c0_3 = arith.constant 0 : index
    %4 = vector.load %arg3[%c0_2, %c0_3] : memref<128x896xbf16, #tpu.memory_space<vmem>>, vector<128x896xbf16>
    %c0_4 = arith.constant 0 : index
    %c0_5 = arith.constant 0 : index
    %5 = vector.load %arg4[%c0_4, %c0_5] : memref<896x128xbf16, #tpu.memory_space<vmem>>, vector<896x128xbf16>
    %cst = arith.constant dense<0.000000e+00> : vector<128x128xf32>
    %6 = tpu.matmul %4, %5, %cst {dimension_numbers = #tpu.dot_dimension_numbers<[1], [0], [0], [1], [0, 0, 1, 1], [], []>} : vector<128x896xbf16>, vector<896x128xbf16>, vector<128x128xf32> -> vector<128x128xf32>
    %7 = arith.addf %3, %6 : vector<128x128xf32>
    %c0_6 = arith.constant 0 : index
    %c0_7 = arith.constant 0 : index
    %8 = vector.load %arg7[%c0_6, %c0_7] : memref<128x128xf32, #tpu.memory_space<vmem>>, vector<128x128xf32>
    tpu.vector_store %arg7[%c0_6, %c0_7], %7 {strides = array<i32>} : memref<128x128xf32, #tpu.memory_space<vmem>>, vector<128x128xf32>,
    %c0_i32_8 = arith.constant 0 : i32
    %9 = arith.cmpi eq, %arg2, %c0_i32_8 : i32
    %10 = arith.extui %9 : i1 to i32
    %c0_i32_9 = arith.constant 0 : i32
    %11 = arith.cmpi ne, %10, %c0_i32_9 : i32
    scf.if %11 {
      %c0_10 = arith.constant 0 : index
      %c0_11 = arith.constant 0 : index
      %12 = vector.load %arg7[%c0_10, %c0_11] : memref<128x128xf32, #tpu.memory_space<vmem>>, vector<128x128xf32>
      %c0_12 = arith.constant 0 : index
      %c0_13 = arith.constant 0 : index
      %13 = vector.load %arg5[%c0_12, %c0_13] : memref<1x128xf32, #tpu.memory_space<vmem>>, vector<1x128xf32>
      %14 = vector.broadcast %13 : vector<1x128xf32> to vector<128x128xf32>
      %15 = arith.addf %12, %14 : vector<128x128xf32>
      %cst_14 = arith.constant 0.000000e+00 : f32
      %16 = vector.broadcast %cst_14 : f32 to vector<128x128xf32>
      %17 = arith.maximumf %15, %16 : vector<128x128xf32>
      %c0_15 = arith.constant 0 : index
      %c0_16 = arith.constant 0 : index
      %18 = vector.load %arg6[%c0_15, %c0_16] : memref<128x128xf32, #tpu.memory_space<vmem>>, vector<128x128xf32>
      tpu.vector_store %arg6[%c0_15, %c0_16], %17 {strides = array<i32>} : memref<128x128xf32, #tpu.memory_space<vmem>>, vector<128x128xf32>,
    } else {
    }
    return
  }
  func.func @transform_0(%arg0: i32, %arg1: i32, %arg2: i32) -> (i32, i32) {
    %c0_i32 = arith.constant 0 : i32
    return %arg0, %arg2 : i32, i32
  }
  func.func @transform_1(%arg0: i32, %arg1: i32, %arg2: i32) -> (i32, i32) {
    %c0_i32 = arith.constant 0 : i32
    return %arg2, %arg1 : i32, i32
  }
  func.func @transform_2(%arg0: i32, %arg1: i32, %arg2: i32) -> (i32, i32) {
    %c0_i32 = arith.constant 0 : i32
    %c0_i32_0 = arith.constant 0 : i32
    return %c0_i32, %arg1 : i32, i32
  }
  func.func @transform_3(%arg0: i32, %arg1: i32, %arg2: i32) -> (i32, i32) {
    %c0_i32 = arith.constant 0 : i32
    return %arg0, %arg1 : i32, i32
  }
}

module attributes {stable_mosaic.version = 11 : i64} {
  func.func @_maxpool_kernel(%arg0: i32, %arg1: memref<8x2048xf32, #tpu.memory_space<vmem>>, %arg2: memref<8x512xf32, #tpu.memory_space<vmem>>) attributes {dimension_semantics = [#tpu.dimension_semantics<parallel>], iteration_bounds = array<i64: 1>, scalar_prefetch = 0 : i64, scratch_operands = 0 : i64, tpu.core_type = #tpu.core_type<tc>, window_params = [{transform_indices = @transform_0, window_bounds = array<i64: 8, 2048>}, {transform_indices = @transform_1, window_bounds = array<i64: 8, 512>}]} {
    %c0 = arith.constant 0 : index
    %c0_0 = arith.constant 0 : index
    %0 = vector.load %arg1[%c0, %c0_0] : memref<8x2048xf32, #tpu.memory_space<vmem>>, vector<8x2048xf32>
    %1 = vector.extract_strided_slice %0 {offsets = [0, 0], sizes = [8, 1024], strides = [1, 1]} : vector<8x2048xf32> to vector<8x1024xf32>
    %2 = vector.extract_strided_slice %0 {offsets = [0, 1024], sizes = [8, 1024], strides = [1, 1]} : vector<8x2048xf32> to vector<8x1024xf32>
    %3 = arith.maximumf %1, %2 : vector<8x1024xf32>
    %4 = vector.extract_strided_slice %3 {offsets = [0, 0], sizes = [8, 128], strides = [1, 1]} : vector<8x1024xf32> to vector<8x128xf32>
    %5 = vector.extract_strided_slice %3 {offsets = [0, 128], sizes = [8, 128], strides = [1, 1]} : vector<8x1024xf32> to vector<8x128xf32>
    %6 = arith.maximumf %4, %5 : vector<8x128xf32>
    %c0_1 = arith.constant 0 : index
    %c0_2 = arith.constant 0 : index
    %7 = vector.load %arg2[%c0_1, %c0_2] : memref<8x512xf32, #tpu.memory_space<vmem>>, vector<8x128xf32>
    tpu.vector_store %arg2[%c0_1, %c0_2], %6 {strides = array<i32>} : memref<8x512xf32, #tpu.memory_space<vmem>>, vector<8x128xf32>,
    %8 = vector.extract_strided_slice %3 {offsets = [0, 256], sizes = [8, 128], strides = [1, 1]} : vector<8x1024xf32> to vector<8x128xf32>
    %9 = vector.extract_strided_slice %3 {offsets = [0, 384], sizes = [8, 128], strides = [1, 1]} : vector<8x1024xf32> to vector<8x128xf32>
    %10 = arith.maximumf %8, %9 : vector<8x128xf32>
    %c0_3 = arith.constant 0 : index
    %c128 = arith.constant 128 : index
    %11 = vector.load %arg2[%c0_3, %c128] : memref<8x512xf32, #tpu.memory_space<vmem>>, vector<8x128xf32>
    tpu.vector_store %arg2[%c0_3, %c128], %10 {strides = array<i32>} : memref<8x512xf32, #tpu.memory_space<vmem>>, vector<8x128xf32>,
    %12 = vector.extract_strided_slice %3 {offsets = [0, 512], sizes = [8, 128], strides = [1, 1]} : vector<8x1024xf32> to vector<8x128xf32>
    %13 = vector.extract_strided_slice %3 {offsets = [0, 640], sizes = [8, 128], strides = [1, 1]} : vector<8x1024xf32> to vector<8x128xf32>
    %14 = arith.maximumf %12, %13 : vector<8x128xf32>
    %c0_4 = arith.constant 0 : index
    %c256 = arith.constant 256 : index
    %15 = vector.load %arg2[%c0_4, %c256] : memref<8x512xf32, #tpu.memory_space<vmem>>, vector<8x128xf32>
    tpu.vector_store %arg2[%c0_4, %c256], %14 {strides = array<i32>} : memref<8x512xf32, #tpu.memory_space<vmem>>, vector<8x128xf32>,
    %16 = vector.extract_strided_slice %3 {offsets = [0, 768], sizes = [8, 128], strides = [1, 1]} : vector<8x1024xf32> to vector<8x128xf32>
    %17 = vector.extract_strided_slice %3 {offsets = [0, 896], sizes = [8, 128], strides = [1, 1]} : vector<8x1024xf32> to vector<8x128xf32>
    %18 = arith.maximumf %16, %17 : vector<8x128xf32>
    %c0_5 = arith.constant 0 : index
    %c384 = arith.constant 384 : index
    %19 = vector.load %arg2[%c0_5, %c384] : memref<8x512xf32, #tpu.memory_space<vmem>>, vector<8x128xf32>
    tpu.vector_store %arg2[%c0_5, %c384], %18 {strides = array<i32>} : memref<8x512xf32, #tpu.memory_space<vmem>>, vector<8x128xf32>,
    return
  }
  func.func @transform_0(%arg0: i32) -> (i32, i32) {
    %c0_i32 = arith.constant 0 : i32
    %c0_i32_0 = arith.constant 0 : i32
    return %arg0, %c0_i32 : i32, i32
  }
  func.func @transform_1(%arg0: i32) -> (i32, i32) {
    %c0_i32 = arith.constant 0 : i32
    %c0_i32_0 = arith.constant 0 : i32
    return %arg0, %c0_i32 : i32, i32
  }
}

module attributes {stable_mosaic.version = 11 : i64} {
  func.func @_matmul_bias_kernel(%arg0: i32, %arg1: i32, %arg2: i32, %arg3: memref<32x640xbf16, #tpu.memory_space<vmem>>, %arg4: memref<640x128xbf16, #tpu.memory_space<vmem>>, %arg5: memref<1x128xf32, #tpu.memory_space<vmem>>, %arg6: memref<32x128xf32, #tpu.memory_space<vmem>>, %arg7: memref<32x128xf32, #tpu.memory_space<vmem>>) attributes {dimension_semantics = [#tpu.dimension_semantics<parallel>, #tpu.dimension_semantics<parallel>, #tpu.dimension_semantics<arbitrary>], iteration_bounds = array<i64: 1, 1, 1>, scalar_prefetch = 0 : i64, scratch_operands = 1 : i64, tpu.core_type = #tpu.core_type<tc>, window_params = [{transform_indices = @transform_0, window_bounds = array<i64: 32, 640>}, {transform_indices = @transform_1, window_bounds = array<i64: 640, 128>}, {transform_indices = @transform_2, window_bounds = array<i64: 1, 128>}, {transform_indices = @transform_3, window_bounds = array<i64: 32, 128>}]} {
    %c0_i32 = arith.constant 0 : i32
    %0 = arith.cmpi eq, %arg2, %c0_i32 : i32
    %1 = arith.extui %0 : i1 to i32
    %c0_i32_0 = arith.constant 0 : i32
    %2 = arith.cmpi ne, %1, %c0_i32_0 : i32
    scf.if %2 {
      %cst_10 = arith.constant 0.000000e+00 : f32
      %12 = vector.broadcast %cst_10 : f32 to vector<32x128xf32>
      %c0_11 = arith.constant 0 : index
      %c0_12 = arith.constant 0 : index
      %13 = vector.load %arg7[%c0_11, %c0_12] : memref<32x128xf32, #tpu.memory_space<vmem>>, vector<32x128xf32>
      tpu.vector_store %arg7[%c0_11, %c0_12], %12 {strides = array<i32>} : memref<32x128xf32, #tpu.memory_space<vmem>>, vector<32x128xf32>,
    } else {
    }
    %c0 = arith.constant 0 : index
    %c0_1 = arith.constant 0 : index
    %3 = vector.load %arg7[%c0, %c0_1] : memref<32x128xf32, #tpu.memory_space<vmem>>, vector<32x128xf32>
    %c0_2 = arith.constant 0 : index
    %c0_3 = arith.constant 0 : index
    %4 = vector.load %arg3[%c0_2, %c0_3] : memref<32x640xbf16, #tpu.memory_space<vmem>>, vector<32x640xbf16>
    %c0_4 = arith.constant 0 : index
    %c0_5 = arith.constant 0 : index
    %5 = vector.load %arg4[%c0_4, %c0_5] : memref<640x128xbf16, #tpu.memory_space<vmem>>, vector<640x128xbf16>
    %cst = arith.constant dense<0.000000e+00> : vector<32x128xf32>
    %6 = tpu.matmul %4, %5, %cst {dimension_numbers = #tpu.dot_dimension_numbers<[1], [0], [0], [1], [0, 0, 1, 1], [], []>} : vector<32x640xbf16>, vector<640x128xbf16>, vector<32x128xf32> -> vector<32x128xf32>
    %7 = arith.addf %3, %6 : vector<32x128xf32>
    %c0_6 = arith.constant 0 : index
    %c0_7 = arith.constant 0 : index
    %8 = vector.load %arg7[%c0_6, %c0_7] : memref<32x128xf32, #tpu.memory_space<vmem>>, vector<32x128xf32>
    tpu.vector_store %arg7[%c0_6, %c0_7], %7 {strides = array<i32>} : memref<32x128xf32, #tpu.memory_space<vmem>>, vector<32x128xf32>,
    %c0_i32_8 = arith.constant 0 : i32
    %9 = arith.cmpi eq, %arg2, %c0_i32_8 : i32
    %10 = arith.extui %9 : i1 to i32
    %c0_i32_9 = arith.constant 0 : i32
    %11 = arith.cmpi ne, %10, %c0_i32_9 : i32
    scf.if %11 {
      %c0_10 = arith.constant 0 : index
      %c0_11 = arith.constant 0 : index
      %12 = vector.load %arg7[%c0_10, %c0_11] : memref<32x128xf32, #tpu.memory_space<vmem>>, vector<32x128xf32>
      %c0_12 = arith.constant 0 : index
      %c0_13 = arith.constant 0 : index
      %13 = vector.load %arg5[%c0_12, %c0_13] : memref<1x128xf32, #tpu.memory_space<vmem>>, vector<1x128xf32>
      %14 = vector.broadcast %13 : vector<1x128xf32> to vector<32x128xf32>
      %15 = arith.addf %12, %14 : vector<32x128xf32>
      %cst_14 = arith.constant 0.000000e+00 : f32
      %16 = vector.broadcast %cst_14 : f32 to vector<32x128xf32>
      %17 = arith.maximumf %15, %16 : vector<32x128xf32>
      %c0_15 = arith.constant 0 : index
      %c0_16 = arith.constant 0 : index
      %18 = vector.load %arg6[%c0_15, %c0_16] : memref<32x128xf32, #tpu.memory_space<vmem>>, vector<32x128xf32>
      tpu.vector_store %arg6[%c0_15, %c0_16], %17 {strides = array<i32>} : memref<32x128xf32, #tpu.memory_space<vmem>>, vector<32x128xf32>,
    } else {
    }
    return
  }
  func.func @transform_0(%arg0: i32, %arg1: i32, %arg2: i32) -> (i32, i32) {
    %c0_i32 = arith.constant 0 : i32
    return %arg0, %arg2 : i32, i32
  }
  func.func @transform_1(%arg0: i32, %arg1: i32, %arg2: i32) -> (i32, i32) {
    %c0_i32 = arith.constant 0 : i32
    return %arg2, %arg1 : i32, i32
  }
  func.func @transform_2(%arg0: i32, %arg1: i32, %arg2: i32) -> (i32, i32) {
    %c0_i32 = arith.constant 0 : i32
    %c0_i32_0 = arith.constant 0 : i32
    return %c0_i32, %arg1 : i32, i32
  }
  func.func @transform_3(%arg0: i32, %arg1: i32, %arg2: i32) -> (i32, i32) {
    %c0_i32 = arith.constant 0 : i32
    return %arg0, %arg1 : i32, i32
  }
}

module attributes {stable_mosaic.version = 11 : i64} {
  func.func @_maxpool_kernel(%arg0: i32, %arg1: memref<4x1024xf32, #tpu.memory_space<vmem>>, %arg2: memref<4x256xf32, #tpu.memory_space<vmem>>) attributes {dimension_semantics = [#tpu.dimension_semantics<parallel>], iteration_bounds = array<i64: 1>, scalar_prefetch = 0 : i64, scratch_operands = 0 : i64, tpu.core_type = #tpu.core_type<tc>, window_params = [{transform_indices = @transform_0, window_bounds = array<i64: 4, 1024>}, {transform_indices = @transform_1, window_bounds = array<i64: 4, 256>}]} {
    %c0 = arith.constant 0 : index
    %c0_0 = arith.constant 0 : index
    %0 = vector.load %arg1[%c0, %c0_0] : memref<4x1024xf32, #tpu.memory_space<vmem>>, vector<4x1024xf32>
    %1 = vector.extract_strided_slice %0 {offsets = [0, 0], sizes = [4, 512], strides = [1, 1]} : vector<4x1024xf32> to vector<4x512xf32>
    %2 = vector.extract_strided_slice %0 {offsets = [0, 512], sizes = [4, 512], strides = [1, 1]} : vector<4x1024xf32> to vector<4x512xf32>
    %3 = arith.maximumf %1, %2 : vector<4x512xf32>
    %4 = vector.extract_strided_slice %3 {offsets = [0, 0], sizes = [4, 128], strides = [1, 1]} : vector<4x512xf32> to vector<4x128xf32>
    %5 = vector.extract_strided_slice %3 {offsets = [0, 128], sizes = [4, 128], strides = [1, 1]} : vector<4x512xf32> to vector<4x128xf32>
    %6 = arith.maximumf %4, %5 : vector<4x128xf32>
    %c0_1 = arith.constant 0 : index
    %c0_2 = arith.constant 0 : index
    %7 = vector.load %arg2[%c0_1, %c0_2] : memref<4x256xf32, #tpu.memory_space<vmem>>, vector<4x128xf32>
    tpu.vector_store %arg2[%c0_1, %c0_2], %6 {strides = array<i32>} : memref<4x256xf32, #tpu.memory_space<vmem>>, vector<4x128xf32>,
    %8 = vector.extract_strided_slice %3 {offsets = [0, 256], sizes = [4, 128], strides = [1, 1]} : vector<4x512xf32> to vector<4x128xf32>
    %9 = vector.extract_strided_slice %3 {offsets = [0, 384], sizes = [4, 128], strides = [1, 1]} : vector<4x512xf32> to vector<4x128xf32>
    %10 = arith.maximumf %8, %9 : vector<4x128xf32>
    %c0_3 = arith.constant 0 : index
    %c128 = arith.constant 128 : index
    %11 = vector.load %arg2[%c0_3, %c128] : memref<4x256xf32, #tpu.memory_space<vmem>>, vector<4x128xf32>
    tpu.vector_store %arg2[%c0_3, %c128], %10 {strides = array<i32>} : memref<4x256xf32, #tpu.memory_space<vmem>>, vector<4x128xf32>,
    return
  }
  func.func @transform_0(%arg0: i32) -> (i32, i32) {
    %c0_i32 = arith.constant 0 : i32
    %c0_i32_0 = arith.constant 0 : i32
    return %arg0, %c0_i32 : i32, i32
  }
  func.func @transform_1(%arg0: i32) -> (i32, i32) {
    %c0_i32 = arith.constant 0 : i32
    %c0_i32_0 = arith.constant 0 : i32
    return %arg0, %c0_i32 : i32, i32
  }
}

module attributes {stable_mosaic.version = 11 : i64} {
  func.func @_matmul_bias_kernel(%arg0: i32, %arg1: i32, %arg2: i32, %arg3: memref<32x128xbf16, #tpu.memory_space<vmem>>, %arg4: memref<128x128xbf16, #tpu.memory_space<vmem>>, %arg5: memref<1x128xf32, #tpu.memory_space<vmem>>, %arg6: memref<32x128xf32, #tpu.memory_space<vmem>>, %arg7: memref<32x128xf32, #tpu.memory_space<vmem>>) attributes {dimension_semantics = [#tpu.dimension_semantics<parallel>, #tpu.dimension_semantics<parallel>, #tpu.dimension_semantics<arbitrary>], iteration_bounds = array<i64: 1, 1, 9>, scalar_prefetch = 0 : i64, scratch_operands = 1 : i64, tpu.core_type = #tpu.core_type<tc>, window_params = [{transform_indices = @transform_0, window_bounds = array<i64: 32, 128>}, {transform_indices = @transform_1, window_bounds = array<i64: 128, 128>}, {transform_indices = @transform_2, window_bounds = array<i64: 1, 128>}, {transform_indices = @transform_3, window_bounds = array<i64: 32, 128>}]} {
    %c0_i32 = arith.constant 0 : i32
    %0 = arith.cmpi eq, %arg2, %c0_i32 : i32
    %1 = arith.extui %0 : i1 to i32
    %c0_i32_0 = arith.constant 0 : i32
    %2 = arith.cmpi ne, %1, %c0_i32_0 : i32
    scf.if %2 {
      %cst_9 = arith.constant 0.000000e+00 : f32
      %12 = vector.broadcast %cst_9 : f32 to vector<32x128xf32>
      %c0_10 = arith.constant 0 : index
      %c0_11 = arith.constant 0 : index
      %13 = vector.load %arg7[%c0_10, %c0_11] : memref<32x128xf32, #tpu.memory_space<vmem>>, vector<32x128xf32>
      tpu.vector_store %arg7[%c0_10, %c0_11], %12 {strides = array<i32>} : memref<32x128xf32, #tpu.memory_space<vmem>>, vector<32x128xf32>,
    } else {
    }
    %c0 = arith.constant 0 : index
    %c0_1 = arith.constant 0 : index
    %3 = vector.load %arg7[%c0, %c0_1] : memref<32x128xf32, #tpu.memory_space<vmem>>, vector<32x128xf32>
    %c0_2 = arith.constant 0 : index
    %c0_3 = arith.constant 0 : index
    %4 = vector.load %arg3[%c0_2, %c0_3] : memref<32x128xbf16, #tpu.memory_space<vmem>>, vector<32x128xbf16>
    %c0_4 = arith.constant 0 : index
    %c0_5 = arith.constant 0 : index
    %5 = vector.load %arg4[%c0_4, %c0_5] : memref<128x128xbf16, #tpu.memory_space<vmem>>, vector<128x128xbf16>
    %cst = arith.constant dense<0.000000e+00> : vector<32x128xf32>
    %6 = tpu.matmul %4, %5, %cst {dimension_numbers = #tpu.dot_dimension_numbers<[1], [0], [0], [1], [0, 0, 1, 1], [], []>} : vector<32x128xbf16>, vector<128x128xbf16>, vector<32x128xf32> -> vector<32x128xf32>
    %7 = arith.addf %3, %6 : vector<32x128xf32>
    %c0_6 = arith.constant 0 : index
    %c0_7 = arith.constant 0 : index
    %8 = vector.load %arg7[%c0_6, %c0_7] : memref<32x128xf32, #tpu.memory_space<vmem>>, vector<32x128xf32>
    tpu.vector_store %arg7[%c0_6, %c0_7], %7 {strides = array<i32>} : memref<32x128xf32, #tpu.memory_space<vmem>>, vector<32x128xf32>,
    %c8_i32 = arith.constant 8 : i32
    %9 = arith.cmpi eq, %arg2, %c8_i32 : i32
    %10 = arith.extui %9 : i1 to i32
    %c0_i32_8 = arith.constant 0 : i32
    %11 = arith.cmpi ne, %10, %c0_i32_8 : i32
    scf.if %11 {
      %c0_9 = arith.constant 0 : index
      %c0_10 = arith.constant 0 : index
      %12 = vector.load %arg7[%c0_9, %c0_10] : memref<32x128xf32, #tpu.memory_space<vmem>>, vector<32x128xf32>
      %c0_11 = arith.constant 0 : index
      %c0_12 = arith.constant 0 : index
      %13 = vector.load %arg5[%c0_11, %c0_12] : memref<1x128xf32, #tpu.memory_space<vmem>>, vector<1x128xf32>
      %14 = vector.broadcast %13 : vector<1x128xf32> to vector<32x128xf32>
      %15 = arith.addf %12, %14 : vector<32x128xf32>
      %cst_13 = arith.constant 0.000000e+00 : f32
      %16 = vector.broadcast %cst_13 : f32 to vector<32x128xf32>
      %17 = arith.maximumf %15, %16 : vector<32x128xf32>
      %c0_14 = arith.constant 0 : index
      %c0_15 = arith.constant 0 : index
      %18 = vector.load %arg6[%c0_14, %c0_15] : memref<32x128xf32, #tpu.memory_space<vmem>>, vector<32x128xf32>
      tpu.vector_store %arg6[%c0_14, %c0_15], %17 {strides = array<i32>} : memref<32x128xf32, #tpu.memory_space<vmem>>, vector<32x128xf32>,
    } else {
    }
    return
  }
  func.func @transform_0(%arg0: i32, %arg1: i32, %arg2: i32) -> (i32, i32) {
    %c0_i32 = arith.constant 0 : i32
    return %arg0, %arg2 : i32, i32
  }
  func.func @transform_1(%arg0: i32, %arg1: i32, %arg2: i32) -> (i32, i32) {
    %c0_i32 = arith.constant 0 : i32
    return %arg2, %arg1 : i32, i32
  }
  func.func @transform_2(%arg0: i32, %arg1: i32, %arg2: i32) -> (i32, i32) {
    %c0_i32 = arith.constant 0 : i32
    %c0_i32_0 = arith.constant 0 : i32
    return %c0_i32, %arg1 : i32, i32
  }
  func.func @transform_3(%arg0: i32, %arg1: i32, %arg2: i32) -> (i32, i32) {
    %c0_i32 = arith.constant 0 : i32
    return %arg0, %arg1 : i32, i32
  }
}

module attributes {stable_mosaic.version = 11 : i64} {
  func.func @_matmul_bias_kernel(%arg0: i32, %arg1: i32, %arg2: i32, %arg3: memref<8x512xbf16, #tpu.memory_space<vmem>>, %arg4: memref<512x512xbf16, #tpu.memory_space<vmem>>, %arg5: memref<1x512xf32, #tpu.memory_space<vmem>>, %arg6: memref<8x512xf32, #tpu.memory_space<vmem>>, %arg7: memref<8x512xf32, #tpu.memory_space<vmem>>) attributes {dimension_semantics = [#tpu.dimension_semantics<parallel>, #tpu.dimension_semantics<parallel>, #tpu.dimension_semantics<arbitrary>], iteration_bounds = array<i64: 1, 1, 1>, scalar_prefetch = 0 : i64, scratch_operands = 1 : i64, tpu.core_type = #tpu.core_type<tc>, window_params = [{transform_indices = @transform_0, window_bounds = array<i64: 8, 512>}, {transform_indices = @transform_1, window_bounds = array<i64: 512, 512>}, {transform_indices = @transform_2, window_bounds = array<i64: 1, 512>}, {transform_indices = @transform_3, window_bounds = array<i64: 8, 512>}]} {
    %c0_i32 = arith.constant 0 : i32
    %0 = arith.cmpi eq, %arg2, %c0_i32 : i32
    %1 = arith.extui %0 : i1 to i32
    %c0_i32_0 = arith.constant 0 : i32
    %2 = arith.cmpi ne, %1, %c0_i32_0 : i32
    scf.if %2 {
      %cst_10 = arith.constant 0.000000e+00 : f32
      %12 = vector.broadcast %cst_10 : f32 to vector<8x512xf32>
      %c0_11 = arith.constant 0 : index
      %c0_12 = arith.constant 0 : index
      %13 = vector.load %arg7[%c0_11, %c0_12] : memref<8x512xf32, #tpu.memory_space<vmem>>, vector<8x512xf32>
      tpu.vector_store %arg7[%c0_11, %c0_12], %12 {strides = array<i32>} : memref<8x512xf32, #tpu.memory_space<vmem>>, vector<8x512xf32>,
    } else {
    }
    %c0 = arith.constant 0 : index
    %c0_1 = arith.constant 0 : index
    %3 = vector.load %arg7[%c0, %c0_1] : memref<8x512xf32, #tpu.memory_space<vmem>>, vector<8x512xf32>
    %c0_2 = arith.constant 0 : index
    %c0_3 = arith.constant 0 : index
    %4 = vector.load %arg3[%c0_2, %c0_3] : memref<8x512xbf16, #tpu.memory_space<vmem>>, vector<8x512xbf16>
    %c0_4 = arith.constant 0 : index
    %c0_5 = arith.constant 0 : index
    %5 = vector.load %arg4[%c0_4, %c0_5] : memref<512x512xbf16, #tpu.memory_space<vmem>>, vector<512x512xbf16>
    %cst = arith.constant dense<0.000000e+00> : vector<8x512xf32>
    %6 = tpu.matmul %4, %5, %cst {dimension_numbers = #tpu.dot_dimension_numbers<[1], [0], [0], [1], [0, 0, 1, 1], [], []>} : vector<8x512xbf16>, vector<512x512xbf16>, vector<8x512xf32> -> vector<8x512xf32>
    %7 = arith.addf %3, %6 : vector<8x512xf32>
    %c0_6 = arith.constant 0 : index
    %c0_7 = arith.constant 0 : index
    %8 = vector.load %arg7[%c0_6, %c0_7] : memref<8x512xf32, #tpu.memory_space<vmem>>, vector<8x512xf32>
    tpu.vector_store %arg7[%c0_6, %c0_7], %7 {strides = array<i32>} : memref<8x512xf32, #tpu.memory_space<vmem>>, vector<8x512xf32>,
    %c0_i32_8 = arith.constant 0 : i32
    %9 = arith.cmpi eq, %arg2, %c0_i32_8 : i32
    %10 = arith.extui %9 : i1 to i32
    %c0_i32_9 = arith.constant 0 : i32
    %11 = arith.cmpi ne, %10, %c0_i32_9 : i32
    scf.if %11 {
      %c0_10 = arith.constant 0 : index
      %c0_11 = arith.constant 0 : index
      %12 = vector.load %arg7[%c0_10, %c0_11] : memref<8x512xf32, #tpu.memory_space<vmem>>, vector<8x512xf32>
      %c0_12 = arith.constant 0 : index
      %c0_13 = arith.constant 0 : index
      %13 = vector.load %arg5[%c0_12, %c0_13] : memref<1x512xf32, #tpu.memory_space<vmem>>, vector<1x512xf32>
      %14 = vector.broadcast %13 : vector<1x512xf32> to vector<8x512xf32>
      %15 = arith.addf %12, %14 : vector<8x512xf32>
      %cst_14 = arith.constant 0.000000e+00 : f32
      %16 = vector.broadcast %cst_14 : f32 to vector<8x512xf32>
      %17 = arith.maximumf %15, %16 : vector<8x512xf32>
      %c0_15 = arith.constant 0 : index
      %c0_16 = arith.constant 0 : index
      %18 = vector.load %arg6[%c0_15, %c0_16] : memref<8x512xf32, #tpu.memory_space<vmem>>, vector<8x512xf32>
      tpu.vector_store %arg6[%c0_15, %c0_16], %17 {strides = array<i32>} : memref<8x512xf32, #tpu.memory_space<vmem>>, vector<8x512xf32>,
    } else {
    }
    return
  }
  func.func @transform_0(%arg0: i32, %arg1: i32, %arg2: i32) -> (i32, i32) {
    %c0_i32 = arith.constant 0 : i32
    return %arg0, %arg2 : i32, i32
  }
  func.func @transform_1(%arg0: i32, %arg1: i32, %arg2: i32) -> (i32, i32) {
    %c0_i32 = arith.constant 0 : i32
    return %arg2, %arg1 : i32, i32
  }
  func.func @transform_2(%arg0: i32, %arg1: i32, %arg2: i32) -> (i32, i32) {
    %c0_i32 = arith.constant 0 : i32
    %c0_i32_0 = arith.constant 0 : i32
    return %c0_i32, %arg1 : i32, i32
  }
  func.func @transform_3(%arg0: i32, %arg1: i32, %arg2: i32) -> (i32, i32) {
    %c0_i32 = arith.constant 0 : i32
    return %arg0, %arg1 : i32, i32
  }
}

module attributes {stable_mosaic.version = 11 : i64} {
  func.func @_matmul_bias_kernel(%arg0: i32, %arg1: i32, %arg2: i32, %arg3: memref<8x512xbf16, #tpu.memory_space<vmem>>, %arg4: memref<512x128xbf16, #tpu.memory_space<vmem>>, %arg5: memref<1x128xf32, #tpu.memory_space<vmem>>, %arg6: memref<8x128xf32, #tpu.memory_space<vmem>>, %arg7: memref<8x128xf32, #tpu.memory_space<vmem>>) attributes {dimension_semantics = [#tpu.dimension_semantics<parallel>, #tpu.dimension_semantics<parallel>, #tpu.dimension_semantics<arbitrary>], iteration_bounds = array<i64: 1, 1, 1>, scalar_prefetch = 0 : i64, scratch_operands = 1 : i64, tpu.core_type = #tpu.core_type<tc>, window_params = [{transform_indices = @transform_0, window_bounds = array<i64: 8, 512>}, {transform_indices = @transform_1, window_bounds = array<i64: 512, 128>}, {transform_indices = @transform_2, window_bounds = array<i64: 1, 128>}, {transform_indices = @transform_3, window_bounds = array<i64: 8, 128>}]} {
    %c0_i32 = arith.constant 0 : i32
    %0 = arith.cmpi eq, %arg2, %c0_i32 : i32
    %1 = arith.extui %0 : i1 to i32
    %c0_i32_0 = arith.constant 0 : i32
    %2 = arith.cmpi ne, %1, %c0_i32_0 : i32
    scf.if %2 {
      %cst_10 = arith.constant 0.000000e+00 : f32
      %12 = vector.broadcast %cst_10 : f32 to vector<8x128xf32>
      %c0_11 = arith.constant 0 : index
      %c0_12 = arith.constant 0 : index
      %13 = vector.load %arg7[%c0_11, %c0_12] : memref<8x128xf32, #tpu.memory_space<vmem>>, vector<8x128xf32>
      tpu.vector_store %arg7[%c0_11, %c0_12], %12 {strides = array<i32>} : memref<8x128xf32, #tpu.memory_space<vmem>>, vector<8x128xf32>,
    } else {
    }
    %c0 = arith.constant 0 : index
    %c0_1 = arith.constant 0 : index
    %3 = vector.load %arg7[%c0, %c0_1] : memref<8x128xf32, #tpu.memory_space<vmem>>, vector<8x128xf32>
    %c0_2 = arith.constant 0 : index
    %c0_3 = arith.constant 0 : index
    %4 = vector.load %arg3[%c0_2, %c0_3] : memref<8x512xbf16, #tpu.memory_space<vmem>>, vector<8x512xbf16>
    %c0_4 = arith.constant 0 : index
    %c0_5 = arith.constant 0 : index
    %5 = vector.load %arg4[%c0_4, %c0_5] : memref<512x128xbf16, #tpu.memory_space<vmem>>, vector<512x128xbf16>
    %cst = arith.constant dense<0.000000e+00> : vector<8x128xf32>
    %6 = tpu.matmul %4, %5, %cst {dimension_numbers = #tpu.dot_dimension_numbers<[1], [0], [0], [1], [0, 0, 1, 1], [], []>} : vector<8x512xbf16>, vector<512x128xbf16>, vector<8x128xf32> -> vector<8x128xf32>
    %7 = arith.addf %3, %6 : vector<8x128xf32>
    %c0_6 = arith.constant 0 : index
    %c0_7 = arith.constant 0 : index
    %8 = vector.load %arg7[%c0_6, %c0_7] : memref<8x128xf32, #tpu.memory_space<vmem>>, vector<8x128xf32>
    tpu.vector_store %arg7[%c0_6, %c0_7], %7 {strides = array<i32>} : memref<8x128xf32, #tpu.memory_space<vmem>>, vector<8x128xf32>,
    %c0_i32_8 = arith.constant 0 : i32
    %9 = arith.cmpi eq, %arg2, %c0_i32_8 : i32
    %10 = arith.extui %9 : i1 to i32
    %c0_i32_9 = arith.constant 0 : i32
    %11 = arith.cmpi ne, %10, %c0_i32_9 : i32
    scf.if %11 {
      %c0_10 = arith.constant 0 : index
      %c0_11 = arith.constant 0 : index
      %12 = vector.load %arg7[%c0_10, %c0_11] : memref<8x128xf32, #tpu.memory_space<vmem>>, vector<8x128xf32>
      %c0_12 = arith.constant 0 : index
      %c0_13 = arith.constant 0 : index
      %13 = vector.load %arg5[%c0_12, %c0_13] : memref<1x128xf32, #tpu.memory_space<vmem>>, vector<1x128xf32>
      %14 = vector.broadcast %13 : vector<1x128xf32> to vector<8x128xf32>
      %15 = arith.addf %12, %14 : vector<8x128xf32>
      %cst_14 = arith.constant 0.000000e+00 : f32
      %16 = vector.broadcast %cst_14 : f32 to vector<8x128xf32>
      %17 = arith.maximumf %15, %16 : vector<8x128xf32>
      %c0_15 = arith.constant 0 : index
      %c0_16 = arith.constant 0 : index
      %18 = vector.load %arg6[%c0_15, %c0_16] : memref<8x128xf32, #tpu.memory_space<vmem>>, vector<8x128xf32>
      tpu.vector_store %arg6[%c0_15, %c0_16], %17 {strides = array<i32>} : memref<8x128xf32, #tpu.memory_space<vmem>>, vector<8x128xf32>,
    } else {
    }
    return
  }
  func.func @transform_0(%arg0: i32, %arg1: i32, %arg2: i32) -> (i32, i32) {
    %c0_i32 = arith.constant 0 : i32
    return %arg0, %arg2 : i32, i32
  }
  func.func @transform_1(%arg0: i32, %arg1: i32, %arg2: i32) -> (i32, i32) {
    %c0_i32 = arith.constant 0 : i32
    return %arg2, %arg1 : i32, i32
  }
  func.func @transform_2(%arg0: i32, %arg1: i32, %arg2: i32) -> (i32, i32) {
    %c0_i32 = arith.constant 0 : i32
    %c0_i32_0 = arith.constant 0 : i32
    return %c0_i32, %arg1 : i32, i32
  }
  func.func @transform_3(%arg0: i32, %arg1: i32, %arg2: i32) -> (i32, i32) {
    %c0_i32 = arith.constant 0 : i32
    return %arg0, %arg1 : i32, i32
  }
}

module attributes {stable_mosaic.version = 11 : i64} {
  func.func @_matmul_bias_kernel(%arg0: i32, %arg1: i32, %arg2: i32, %arg3: memref<8x128xbf16, #tpu.memory_space<vmem>>, %arg4: memref<128x128xbf16, #tpu.memory_space<vmem>>, %arg5: memref<1x128xf32, #tpu.memory_space<vmem>>, %arg6: memref<8x128xf32, #tpu.memory_space<vmem>>, %arg7: memref<8x128xf32, #tpu.memory_space<vmem>>) attributes {dimension_semantics = [#tpu.dimension_semantics<parallel>, #tpu.dimension_semantics<parallel>, #tpu.dimension_semantics<arbitrary>], iteration_bounds = array<i64: 1, 1, 1>, scalar_prefetch = 0 : i64, scratch_operands = 1 : i64, tpu.core_type = #tpu.core_type<tc>, window_params = [{transform_indices = @transform_0, window_bounds = array<i64: 8, 128>}, {transform_indices = @transform_1, window_bounds = array<i64: 128, 128>}, {transform_indices = @transform_2, window_bounds = array<i64: 1, 128>}, {transform_indices = @transform_3, window_bounds = array<i64: 8, 128>}]} {
    %c0_i32 = arith.constant 0 : i32
    %0 = arith.cmpi eq, %arg2, %c0_i32 : i32
    %1 = arith.extui %0 : i1 to i32
    %c0_i32_0 = arith.constant 0 : i32
    %2 = arith.cmpi ne, %1, %c0_i32_0 : i32
    scf.if %2 {
      %cst_10 = arith.constant 0.000000e+00 : f32
      %12 = vector.broadcast %cst_10 : f32 to vector<8x128xf32>
      %c0_11 = arith.constant 0 : index
      %c0_12 = arith.constant 0 : index
      %13 = vector.load %arg7[%c0_11, %c0_12] : memref<8x128xf32, #tpu.memory_space<vmem>>, vector<8x128xf32>
      tpu.vector_store %arg7[%c0_11, %c0_12], %12 {strides = array<i32>} : memref<8x128xf32, #tpu.memory_space<vmem>>, vector<8x128xf32>,
    } else {
    }
    %c0 = arith.constant 0 : index
    %c0_1 = arith.constant 0 : index
    %3 = vector.load %arg7[%c0, %c0_1] : memref<8x128xf32, #tpu.memory_space<vmem>>, vector<8x128xf32>
    %c0_2 = arith.constant 0 : index
    %c0_3 = arith.constant 0 : index
    %4 = vector.load %arg3[%c0_2, %c0_3] : memref<8x128xbf16, #tpu.memory_space<vmem>>, vector<8x128xbf16>
    %c0_4 = arith.constant 0 : index
    %c0_5 = arith.constant 0 : index
    %5 = vector.load %arg4[%c0_4, %c0_5] : memref<128x128xbf16, #tpu.memory_space<vmem>>, vector<128x128xbf16>
    %cst = arith.constant dense<0.000000e+00> : vector<8x128xf32>
    %6 = tpu.matmul %4, %5, %cst {dimension_numbers = #tpu.dot_dimension_numbers<[1], [0], [0], [1], [0, 0, 1, 1], [], []>} : vector<8x128xbf16>, vector<128x128xbf16>, vector<8x128xf32> -> vector<8x128xf32>
    %7 = arith.addf %3, %6 : vector<8x128xf32>
    %c0_6 = arith.constant 0 : index
    %c0_7 = arith.constant 0 : index
    %8 = vector.load %arg7[%c0_6, %c0_7] : memref<8x128xf32, #tpu.memory_space<vmem>>, vector<8x128xf32>
    tpu.vector_store %arg7[%c0_6, %c0_7], %7 {strides = array<i32>} : memref<8x128xf32, #tpu.memory_space<vmem>>, vector<8x128xf32>,
    %c0_i32_8 = arith.constant 0 : i32
    %9 = arith.cmpi eq, %arg2, %c0_i32_8 : i32
    %10 = arith.extui %9 : i1 to i32
    %c0_i32_9 = arith.constant 0 : i32
    %11 = arith.cmpi ne, %10, %c0_i32_9 : i32
    scf.if %11 {
      %c0_10 = arith.constant 0 : index
      %c0_11 = arith.constant 0 : index
      %12 = vector.load %arg7[%c0_10, %c0_11] : memref<8x128xf32, #tpu.memory_space<vmem>>, vector<8x128xf32>
      %c0_12 = arith.constant 0 : index
      %c0_13 = arith.constant 0 : index
      %13 = vector.load %arg5[%c0_12, %c0_13] : memref<1x128xf32, #tpu.memory_space<vmem>>, vector<1x128xf32>
      %14 = vector.broadcast %13 : vector<1x128xf32> to vector<8x128xf32>
      %15 = arith.addf %12, %14 : vector<8x128xf32>
      %c0_14 = arith.constant 0 : index
      %c0_15 = arith.constant 0 : index
      %16 = vector.load %arg6[%c0_14, %c0_15] : memref<8x128xf32, #tpu.memory_space<vmem>>, vector<8x128xf32>
      tpu.vector_store %arg6[%c0_14, %c0_15], %15 {strides = array<i32>} : memref<8x128xf32, #tpu.memory_space<vmem>>, vector<8x128xf32>,
    } else {
    }
    return
  }
  func.func @transform_0(%arg0: i32, %arg1: i32, %arg2: i32) -> (i32, i32) {
    %c0_i32 = arith.constant 0 : i32
    return %arg0, %arg2 : i32, i32
  }
  func.func @transform_1(%arg0: i32, %arg1: i32, %arg2: i32) -> (i32, i32) {
    %c0_i32 = arith.constant 0 : i32
    return %arg2, %arg1 : i32, i32
  }
  func.func @transform_2(%arg0: i32, %arg1: i32, %arg2: i32) -> (i32, i32) {
    %c0_i32 = arith.constant 0 : i32
    %c0_i32_0 = arith.constant 0 : i32
    return %c0_i32, %arg1 : i32, i32
  }
  func.func @transform_3(%arg0: i32, %arg1: i32, %arg2: i32) -> (i32, i32) {
    %c0_i32 = arith.constant 0 : i32
    return %arg0, %arg1 : i32, i32
  }
}

</mosaic_0001>

<bundles_post_ra>
// kernel: cnn_forward.11
= control target key start
LH: loop header
LB: loop body
LE: loop exit
PB: predicated region body
PF: predicated region fallthrough
CT: control target
= control target key end

     0   :  { %s275_s6 = smov 0   ;;  %s336_s0 = inlined_call_operand.vmem [shape: f32[16,4096], index: 0, kind: input, shape index: {}]   ;;  %s337_s1 = inlined_call_operand.vmem [shape: f32[16,1024], index: 1, kind: output, shape index: {}]  }
   0x1 LB: > { %s236_s7 = sadd.s32 4294967295, %s263_s6   ;;  %p240_p0 = scmp.ge.s32.totalorder %s263_s6, 1  ;;  %s263_s6 = sphi %s275_s6, %s11_s6  }
   0x2   : > { %p87_p1 = scmp.lt.s32.totalorder %s263_s6, 3 }
   0x4   : > { %p88_p2 = pnand %p240_p0, %p87_p1 }
   0x5   : > { %p107_p3 = scmp.lt.s32.totalorder (!%p88_p2), %s236_s7, 1 }
   0x6   : > { %91 = sbr.rel (%p88_p2) target bundleno = 30 (0x1e), region = 24 }
   0xb   : > { %s339_s7 = smov (!%p107_p3, %s236_s7), 1 }
   0xc   : > { %s247_s8 = sshll.u32 %s339_s7, 8  ;;  %s248_s12 = sshll.u32 %s339_s7, 6 }
   0xd   : > { %s286_s11 = scalar_lea.vmem %s336_s0, %s247_s8  ;;  %s300_s15 = scalar_lea.vmem %s337_s1, %s248_s12 }
   0xe   : > { %v117_v0 = vld [vmem:[%s286_s11] sm:$0xff]  ;;  %v118_v1 = vld [vmem:[%s286_s11 + $0x8] sm:$0xff]  ;;  %v119_v5 = vld [vmem:[%s286_s11 + $0x10] sm:$0xff] }
   0xf   : > { %v133_v2 = vld [vmem:[%s286_s11 + $0x80] sm:$0xff]  ;;  %v134_v3 = vld [vmem:[%s286_s11 + $0x88] sm:$0xff]  ;;  %v120_v6 = vld [vmem:[%s286_s11 + $0x18] sm:$0xff] }
  0x10   : > { %v149_v4 = vmax.f32 %v117_v0, %v133_v2  ;;  %v150_v7 = vmax.f32 %v118_v1, %v134_v3  ;;  %v135_v8 = vld [vmem:[%s286_s11 + $0x90] sm:$0xff]  ;;  %v136_v9 = vld [vmem:[%s286_s11 + $0x98] sm:$0xff]  ;;  %v121_v10 = vld [vmem:[%s286_s11 + $0x20] sm:$0xff] }
  0x11   : > { %v151_v11 = vmax.f32 %v119_v5, %v135_v8  ;;  %v152_v12 = vmax.f32 %v120_v6, %v136_v9  ;;  %v122_v13 = vld [vmem:[%s286_s11 + $0x28] sm:$0xff]  ;;  %v137_v14 = vld [vmem:[%s286_s11 + $0xa0] sm:$0xff]  ;;  %v123_v19 = vld [vmem:[%s286_s11 + $0x30] sm:$0xff] }
  0x12   : > { %v138_v15 = vld [vmem:[%s286_s11 + $0xa8] sm:$0xff]  ;;  %v165_v16 = vmax.f32 %v149_v4, %v150_v7  ;;  %v153_v17 = vmax.f32 %v121_v10, %v137_v14  ;;  %v124_v20 = vld [vmem:[%s286_s11 + $0x38] sm:$0xff]  ;;  %v139_v21 = vld [vmem:[%s286_s11 + $0xb0] sm:$0xff] }
  0x13   : > { %v154_v18 = vmax.f32 %v122_v13, %v138_v15  ;;  %v167_v22 = vmax.f32 %v151_v11, %v152_v12  ;;  %v140_v23 = vld [vmem:[%s286_s11 + $0xb8] sm:$0xff]  ;;  %v155_v24 = vmax.f32 %v123_v19, %v139_v21  ;;  %v125_v25 = vld [vmem:[%s286_s11 + $0x40] sm:$0xff]  ;;  %v126_v26 = vld [vmem:[%s286_s11 + $0x48] sm:$0xff] }
  0x14   : > { %166 = vst [vmem:[%s300_s15] sm:$0xff] %v165_v16  ;;  %v156_v28 = vmax.f32 %v124_v20, %v140_v23  ;;  %v141_v29 = vld [vmem:[%s286_s11 + $0xc0] sm:$0xff]  ;;  %v142_v30 = vld [vmem:[%s286_s11 + $0xc8] sm:$0xff]  ;;  %v127_v31 = vld [vmem:[%s286_s11 + $0x50] sm:$0xff] }
  0x15   : > { %v169_v27 = vmax.f32 %v153_v17, %v154_v18  ;;  %168 = vst [vmem:[%s300_s15 + $0x8] sm:$0xff] %v167_v22  ;;  %v157_v32 = vmax.f32 %v125_v25, %v141_v29  ;;  %v158_v33 = vmax.f32 %v126_v26, %v142_v30  ;;  %v128_v34 = vld [vmem:[%s286_s11 + $0x58] sm:$0xff]  ;;  %v143_v35 = vld [vmem:[%s286_s11 + $0xd0] sm:$0xff]  ;;  %v129_v40 = vld [vmem:[%s286_s11 + $0x60] sm:$0xff] }
  0x16   : > { %v144_v36 = vld [vmem:[%s286_s11 + $0xd8] sm:$0xff]  ;;  %v171_v37 = vmax.f32 %v155_v24, %v156_v28  ;;  %v159_v38 = vmax.f32 %v127_v31, %v143_v35  ;;  %v130_v41 = vld [vmem:[%s286_s11 + $0x68] sm:$0xff]  ;;  %v145_v42 = vld [vmem:[%s286_s11 + $0xe0] sm:$0xff] }
  0x17   : > { %170 = vst [vmem:[%s300_s15 + $0x10] sm:$0xff] %v169_v27  ;;  %v160_v39 = vmax.f32 %v128_v34, %v144_v36  ;;  %v173_v43 = vmax.f32 %v157_v32, %v158_v33  ;;  %v146_v44 = vld [vmem:[%s286_s11 + $0xe8] sm:$0xff]  ;;  %v161_v45 = vmax.f32 %v129_v40, %v145_v42  ;;  %v131_v46 = vld [vmem:[%s286_s11 + $0x70] sm:$0xff]  ;;  %v132_v47 = vld [vmem:[%s286_s11 + $0x78] sm:$0xff] }
  0x18   : > { %172 = vst [vmem:[%s300_s15 + $0x18] sm:$0xff] %v171_v37  ;;  %v162_v49 = vmax.f32 %v130_v41, %v146_v44  ;;  %v147_v50 = vld [vmem:[%s286_s11 + $0xf0] sm:$0xff]  ;;  %v148_v51 = vld [vmem:[%s286_s11 + $0xf8] sm:$0xff] }
  0x19   : > { %v175_v48 = vmax.f32 %v159_v38, %v160_v39  ;;  %174 = vst [vmem:[%s300_s15 + $0x20] sm:$0xff] %v173_v43  ;;  %v163_v52 = vmax.f32 %v131_v46, %v147_v50  ;;  %v164_v53 = vmax.f32 %v132_v47, %v148_v51 }
  0x1a   : > { %v177_v54 = vmax.f32 %v161_v45, %v162_v49 }
  0x1b   : > { %176 = vst [vmem:[%s300_s15 + $0x28] sm:$0xff] %v175_v48  ;;  %v179_v55 = vmax.f32 %v163_v52, %v164_v53 }
  0x1c   : > { %178 = vst [vmem:[%s300_s15 + $0x30] sm:$0xff] %v177_v54 }
  0x1d   : > { %180 = vst [vmem:[%s300_s15 + $0x38] sm:$0xff] %v179_v55 }
  0x1e PF: > { %s11_s6 = sadd.s32 1, %s263_s6  }
  0x1f   : > { %p8_p4 = scmp.ge.s32.totalorder %s11_s6, 4  }
  0x21   :  { %10 = sbr.rel (!%p8_p4) target bundleno = 1 (0x1), region = 54 }

// kernel: cnn_forward.10
= control target key start
LH: loop header
LB: loop body
LE: loop exit
PB: predicated region body
PF: predicated region fallthrough
CT: control target
= control target key end

     0   :  { %s1486_s12 = smov 0   ;;  %s1488_s13 = smov 0   ;;  %s1714_s0 = inlined_call_operand.vmem [shape: bf16[512,256], index: 0, kind: input, shape index: {}]   ;;  %s1715_s1 = inlined_call_operand.vmem [shape: bf16[256,128], index: 1, kind: input, shape index: {}]   ;;  %s1716_s2 = inlined_call_operand.vmem [shape: f32[1,128], index: 2, kind: input, shape index: {}]   ;;  %s1717_s3 = inlined_call_operand.vmem [shape: f32[512,128], index: 3, kind: output, shape index: {}]  }
   0x1   :  { %s1490_s14 = smov 0  }
   0x2 LB: > { %s32_s15 = sadd.s32 1, %s1460_s13  ;;  %p1152_p0 = scmp.ge.s32.totalorder %s1464_s14, 1  ;;  %s1464_s14 = sphi %s1490_s14, %s13_s14   ;;  %s1460_s13 = sphi %s1488_s13, %s1719_s13   ;;  %s1456_s12 = sphi %s1486_s12, %s1718_s12  }
   0x3   : > { %p34_p1 = scmp.ge.s32.totalorder %s32_s15, 2  ;;  %p191_p2 = scmp.lt.s32.totalorder %s1464_s14, 3 }
   0x5   : > { %s1721_s15 = smov (%p34_p1, %s32_s15), 0  ;;  %p192_p3 = pnand %p1152_p0, %p191_p2 }
   0x6   : > { %s1153_s28 = sshll.u32 (!%p192_p3), %s1456_s12, 5 }
   0x7   : > { %195 = sbr.rel (%p192_p3) target bundleno = 304 (0x130), region = 32  ;;  %p236_p4 = scmp.lt.s32.totalorder (!%p192_p3), %s1153_s28, 63 }
   0xc   : > { %v1392_v0 = vld [vmem:[%s1715_s1 + $0x38] sm:$0xff]  ;;  %v1391_v2 = vld [vmem:[%s1715_s1 + $0x30] sm:$0xff]  ;;  %v1390_v4 = vld [vmem:[%s1715_s1 + $0x28] sm:$0xff]  ;;  %s1723_s28 = smov (!%p236_p4, %s1153_s28), 63 }
   0xd   : > { %v1400_v1 = vld [vmem:[%s1715_s1 + $0x78] sm:$0xff]  ;;  %655 = vmatpush.bf16.msra.mxu0 %v1392_v0  ;;  %1401 = vmatpush.bf16.msra.mxu2 %v1392_v0  ;;  %v1399_v3 = vld [vmem:[%s1715_s1 + $0x70] sm:$0xff]  ;;  %v1398_v5 = vld [vmem:[%s1715_s1 + $0x68] sm:$0xff]  ;;  %s1352_s17 = sshll.u32 %s1723_s28, 3 }
   0xe   : > { %744 = vmatpush.bf16.msra.mxu1 %v1400_v1  ;;  %1409 = vmatpush.bf16.msra.mxu3 %v1400_v1  ;;  %v1389_v6 = vld [vmem:[%s1715_s1 + $0x20] sm:$0xff]  ;;  %v1388_v8 = vld [vmem:[%s1715_s1 + $0x18] sm:$0xff]  ;;  %v1387_v10 = vld [vmem:[%s1715_s1 + $0x10] sm:$0xff]  ;;  %s1554_s22 = scalar_lea.vmem %s1714_s0, %s1352_s17  ;;  %s1640_s7 = scalar_lea.vmem %s1717_s3, %s1352_s17 }
   0xf   : > { %v1397_v7 = vld [vmem:[%s1715_s1 + $0x60] sm:$0xff]  ;;  %v1396_v9 = vld [vmem:[%s1715_s1 + $0x58] sm:$0xff]  ;;  %v1395_v11 = vld [vmem:[%s1715_s1 + $0x50] sm:$0xff] }
  0x10   : > { %v1386_v12 = vld [vmem:[%s1715_s1 + $0x8] sm:$0xff]  ;;  %v1385_v14 = vld [vmem:[%s1715_s1] sm:$0xff]  ;;  %v1168_v28 = vld [vmem:[%s1554_s22 + $0x10] sm:$0xf] }
  0x11   : > { %656 = vmatpush.bf16.msra.mxu0 %v1391_v2  ;;  %1402 = vmatpush.bf16.msra.mxu2 %v1391_v2  ;;  %v1394_v13 = vld [vmem:[%s1715_s1 + $0x48] sm:$0xff]  ;;  %v1393_v15 = vld [vmem:[%s1715_s1 + $0x40] sm:$0xff]  ;;  %v1356_v29 = vld [vmem:[%s1554_s22 + $0x14] sm:$0xf0] }
  0x12   : > { %745 = vmatpush.bf16.msra.mxu1 %v1399_v3  ;;  %1410 = vmatpush.bf16.msra.mxu3 %v1399_v3  ;;  %v1160_v16 = vld [vmem:[%s1554_s22] sm:$0xf]  ;;  %v1354_v17 = vld [vmem:[%s1554_s22 + $0x4] sm:$0xf0]  ;;  %v1353_v20 = vld [vmem:[%s1554_s22 + $0x4] sm:$0xf]  ;;  %v1169_v36 = vor.u32 %v1356_v29, %v1168_v28 }
  0x13   : > { %v1224_v18 = vld [vmem:[%s1554_s22 + $0x80] sm:$0xf]  ;;  %v1370_v19 = vld [vmem:[%s1554_s22 + $0x84] sm:$0xf0]  ;;  %v1162_v21 = vld [vmem:[%s1554_s22 + $0x8] sm:$0xf0]  ;;  %v1161_v24 = vor.u32 %v1354_v17, %v1160_v16 }
  0x14   : > { %v1369_v22 = vld [vmem:[%s1554_s22 + $0x84] sm:$0xf]  ;;  %v1226_v23 = vld [vmem:[%s1554_s22 + $0x88] sm:$0xf0]  ;;  %v1225_v25 = vor.u32 %v1370_v19, %v1224_v18  ;;  %v1165_v26 = vor.u32 %v1353_v20, %v1162_v21  ;;  %v1232_v30 = vld [vmem:[%s1554_s22 + $0x90] sm:$0xf] }
  0x15   : > { %657 = vmatpush.bf16.msra.mxu0 %v1390_v4  ;;  %1403 = vmatpush.bf16.msra.mxu2 %v1390_v4  ;;  %v1229_v27 = vor.u32 %v1369_v22, %v1226_v23  ;;  %v1372_v31 = vld [vmem:[%s1554_s22 + $0x94] sm:$0xf0]  ;;  %v1355_v32 = vld [vmem:[%s1554_s22 + $0x14] sm:$0xf]  ;;  %v1170_v33 = vld [vmem:[%s1554_s22 + $0x18] sm:$0xf0] }
  0x16   : > { %746 = vmatpush.bf16.msra.mxu1 %v1398_v5  ;;  %1411 = vmatpush.bf16.msra.mxu3 %v1398_v5  ;;  %v1371_v34 = vld [vmem:[%s1554_s22 + $0x94] sm:$0xf]  ;;  %v1234_v35 = vld [vmem:[%s1554_s22 + $0x98] sm:$0xf0]  ;;  %v1233_v37 = vor.u32 %v1372_v31, %v1232_v30  ;;  %v1173_v38 = vor.u32 %v1355_v32, %v1170_v33  ;;  %v1176_v40 = vld [vmem:[%s1554_s22 + $0x20] sm:$0xf] }
  0x17   : > { %v1237_v39 = vor.u32 %v1371_v34, %v1234_v35  ;;  %v1358_v41 = vld [vmem:[%s1554_s22 + $0x24] sm:$0xf0]  ;;  %v1240_v42 = vld [vmem:[%s1554_s22 + $0xa0] sm:$0xf]  ;;  %v1357_v44 = vld [vmem:[%s1554_s22 + $0x24] sm:$0xf] }
  0x18   : > { %v1374_v43 = vld [vmem:[%s1554_s22 + $0xa4] sm:$0xf0]  ;;  %v1178_v45 = vld [vmem:[%s1554_s22 + $0x28] sm:$0xf0]  ;;  %v1373_v46 = vld [vmem:[%s1554_s22 + $0xa4] sm:$0xf]  ;;  %v1177_v48 = vor.u32 %v1358_v41, %v1176_v40 }
  0x19   : > { %658 = vmatpush.bf16.msra.mxu0 %v1389_v6  ;;  %1404 = vmatpush.bf16.msra.mxu2 %v1389_v6  ;;  %v1242_v47 = vld [vmem:[%s1554_s22 + $0xa8] sm:$0xf0]  ;;  %v1241_v49 = vor.u32 %v1374_v43, %v1240_v42  ;;  %v1181_v50 = vor.u32 %v1357_v44, %v1178_v45  ;;  %v1184_v52 = vld [vmem:[%s1554_s22 + $0x30] sm:$0xf]  ;;  %v1360_v53 = vld [vmem:[%s1554_s22 + $0x34] sm:$0xf0] }
  0x1a   : > { %747 = vmatpush.bf16.msra.mxu1 %v1397_v7  ;;  %1412 = vmatpush.bf16.msra.mxu3 %v1397_v7  ;;  %v1245_v51 = vor.u32 %v1373_v46, %v1242_v47  ;;  %v1248_v54 = vld [vmem:[%s1554_s22 + $0xb0] sm:$0xf]  ;;  %v1376_v55 = vld [vmem:[%s1554_s22 + $0xb4] sm:$0xf0]  ;;  %v1359_v56 = vld [vmem:[%s1554_s22 + $0x34] sm:$0xf]  ;;  %v1185_v60 = vor.u32 %v1360_v53, %v1184_v52 }
  0x1b   : > { %v1186_v57 = vld [vmem:[%s1554_s22 + $0x38] sm:$0xf0]  ;;  %v1375_v58 = vld [vmem:[%s1554_s22 + $0xb4] sm:$0xf]  ;;  %v1249_v61 = vor.u32 %v1376_v55, %v1248_v54  ;;  %v1192_v0 = vld [vmem:[%s1554_s22 + $0x40] sm:$0xf] }
  0x1c   : > { %v1250_v59 = vld [vmem:[%s1554_s22 + $0xb8] sm:$0xf0]  ;;  %v1189_v62 = vor.u32 %v1359_v56, %v1186_v57  ;;  %v1362_v1 = vld [vmem:[%s1554_s22 + $0x44] sm:$0xf0]  ;;  %v1256_v2 = vld [vmem:[%s1554_s22 + $0xc0] sm:$0xf] }
  0x1d   : > { %659 = vmatpush.bf16.msra.mxu0 %v1388_v8  ;;  %1405 = vmatpush.bf16.msra.mxu2 %v1388_v8  ;;  %v1253_v63 = vor.u32 %v1375_v58, %v1250_v59  ;;  %v1378_v3 = vld [vmem:[%s1554_s22 + $0xc4] sm:$0xf0]  ;;  %v1361_v4 = vld [vmem:[%s1554_s22 + $0x44] sm:$0xf]  ;;  %v1194_v5 = vld [vmem:[%s1554_s22 + $0x48] sm:$0xf0]  ;;  %v1193_v8 = vor.u32 %v1362_v1, %v1192_v0 }
  0x1e   : > { %748 = vmatpush.bf16.msra.mxu1 %v1396_v9  ;;  %1413 = vmatpush.bf16.msra.mxu3 %v1396_v9  ;;  %v1377_v6 = vld [vmem:[%s1554_s22 + $0xc4] sm:$0xf]  ;;  %v1258_v7 = vld [vmem:[%s1554_s22 + $0xc8] sm:$0xf0]  ;;  %v1257_v9 = vor.u32 %v1378_v3, %v1256_v2  ;;  %v1363_v16 = vld [vmem:[%s1554_s22 + $0x54] sm:$0xf] }
  0x1f   : > { %v1202_v17 = vld [vmem:[%s1554_s22 + $0x58] sm:$0xf0]  ;;  %v1379_v18 = vld [vmem:[%s1554_s22 + $0xd4] sm:$0xf]  ;;  %v1365_v28 = vld [vmem:[%s1554_s22 + $0x64] sm:$0xf] }
  0x20   : > { %v1266_v19 = vld [vmem:[%s1554_s22 + $0xd8] sm:$0xf0]  ;;  %v1205_v22 = vor.u32 %v1363_v16, %v1202_v17  ;;  %v1210_v29 = vld [vmem:[%s1554_s22 + $0x68] sm:$0xf0]  ;;  %v1381_v30 = vld [vmem:[%s1554_s22 + $0xe4] sm:$0xf] }
  0x21   : > { %660 = vmatpush.bf16.msra.mxu0 %v1387_v10  ;;  %1406 = vmatpush.bf16.msra.mxu2 %v1387_v10  ;;  %v1197_v10 = vor.u32 %v1361_v4, %v1194_v5  ;;  %v1269_v23 = vor.u32 %v1379_v18, %v1266_v19  ;;  %v1274_v31 = vld [vmem:[%s1554_s22 + $0xe8] sm:$0xf0]  ;;  %v1213_v34 = vor.u32 %v1365_v28, %v1210_v29  ;;  %v1367_v40 = vld [vmem:[%s1554_s22 + $0x74] sm:$0xf]  ;;  %v1218_v41 = vld [vmem:[%s1554_s22 + $0x78] sm:$0xf0] }
  0x22   : > { %749 = vmatpush.bf16.msra.mxu1 %v1395_v11  ;;  %1414 = vmatpush.bf16.msra.mxu3 %v1395_v11  ;;  %v1261_v11 = vor.u32 %v1377_v6, %v1258_v7  ;;  %v1277_v35 = vor.u32 %v1381_v30, %v1274_v31  ;;  %v1383_v42 = vld [vmem:[%s1554_s22 + $0xf4] sm:$0xf]  ;;  %v1282_v43 = vld [vmem:[%s1554_s22 + $0xf8] sm:$0xf0]  ;;  %v1221_v46 = vor.u32 %v1367_v40, %v1218_v41 }
  0x23   : > { %v1285_v47 = vor.u32 %v1383_v42, %v1282_v43 }
  0x25   : > { %661 = vmatpush.bf16.msra.mxu0 %v1386_v12  ;;  %1407 = vmatpush.bf16.msra.mxu2 %v1386_v12  ;;  %v1200_v12 = vld [vmem:[%s1554_s22 + $0x50] sm:$0xf] }
  0x26   : > { %750 = vmatpush.bf16.msra.mxu1 %v1394_v13  ;;  %1415 = vmatpush.bf16.msra.mxu3 %v1394_v13  ;;  %v1364_v13 = vld [vmem:[%s1554_s22 + $0x54] sm:$0xf0] }
  0x27   : > { %v1201_v20 = vor.u32 %v1364_v13, %v1200_v12 }
  0x29   : > { %662 = vmatpush.bf16.msra.mxu0 %v1385_v14  ;;  %1408 = vmatpush.bf16.msra.mxu2 %v1385_v14  ;;  %v1264_v14 = vld [vmem:[%s1554_s22 + $0xd0] sm:$0xf] }
  0x2a   : > { %751 = vmatpush.bf16.msra.mxu1 %v1393_v15  ;;  %1416 = vmatpush.bf16.msra.mxu3 %v1393_v15  ;;  %v1380_v15 = vld [vmem:[%s1554_s22 + $0xd4] sm:$0xf0] }
  0x2b   : > { %v1265_v21 = vor.u32 %v1380_v15, %v1264_v14 }
  0x2c   : > { %663 = vmatmul.bf16.vlgmr.msra.gmra.mxu0 %v1161_v24  ;;  %703 = vmatmul.bf16.vlgmr.msra.gmra.mxu2 %v1225_v25  ;;  %v1208_v24 = vld [vmem:[%s1554_s22 + $0x60] sm:$0xf]  ;;  %v1366_v25 = vld [vmem:[%s1554_s22 + $0x64] sm:$0xf0] }
  0x2d   : > { %752 = vmatmul.bf16.vlgmr.msra.gmra.mxu1 %v1165_v26  ;;  %792 = vmatmul.bf16.vlgmr.msra.gmra.mxu3 %v1229_v27  ;;  %v1272_v26 = vld [vmem:[%s1554_s22 + $0xe0] sm:$0xf]  ;;  %v1382_v27 = vld [vmem:[%s1554_s22 + $0xe4] sm:$0xf0]  ;;  %v1209_v32 = vor.u32 %v1366_v25, %v1208_v24 }
  0x2e   : > { %v1273_v33 = vor.u32 %v1382_v27, %v1272_v26 }
  0x3c   : > { %668 = vmatmul.bf16.gmra.mxu0 %v1169_v36  ;;  %708 = vmatmul.bf16.gmra.mxu2 %v1233_v37  ;;  %v1216_v36 = vld [vmem:[%s1554_s22 + $0x70] sm:$0xf]  ;;  %v1368_v37 = vld [vmem:[%s1554_s22 + $0x74] sm:$0xf0] }
  0x3d   : > { %757 = vmatmul.bf16.gmra.mxu1 %v1173_v38  ;;  %797 = vmatmul.bf16.gmra.mxu3 %v1237_v39  ;;  %v1280_v38 = vld [vmem:[%s1554_s22 + $0xf0] sm:$0xf]  ;;  %v1384_v39 = vld [vmem:[%s1554_s22 + $0xf4] sm:$0xf0]  ;;  %v1217_v44 = vor.u32 %v1368_v37, %v1216_v36 }
  0x3e   : > { %v1281_v45 = vor.u32 %v1384_v39, %v1280_v38 }
  0x4c   : > { %673 = vmatmul.bf16.gmra.mxu0 %v1177_v48  ;;  %713 = vmatmul.bf16.gmra.mxu2 %v1241_v49  ;;  %v1632_v49 = vld [vmem:[%s1716_s2] ss:$0 sm:$0xff] }
  0x4d   : > { %762 = vmatmul.bf16.gmra.mxu1 %v1181_v50  ;;  %802 = vmatmul.bf16.gmra.mxu3 %v1245_v51 }
  0x5c   : > { %678 = vmatmul.bf16.gmra.mxu0 %v1185_v60  ;;  %718 = vmatmul.bf16.gmra.mxu2 %v1249_v61 }
  0x5d   : > { %767 = vmatmul.bf16.gmra.mxu1 %v1189_v62  ;;  %807 = vmatmul.bf16.gmra.mxu3 %v1253_v63 }
  0x6c   : > { %683 = vmatmul.bf16.gmra.mxu0 %v1193_v8  ;;  %723 = vmatmul.bf16.gmra.mxu2 %v1257_v9 }
  0x6d   : > { %772 = vmatmul.bf16.gmra.mxu1 %v1197_v10  ;;  %812 = vmatmul.bf16.gmra.mxu3 %v1261_v11 }
  0x7c   : > { %688 = vmatmul.bf16.gmra.mxu0 %v1201_v20  ;;  %728 = vmatmul.bf16.gmra.mxu2 %v1265_v21 }
  0x7d   : > { %777 = vmatmul.bf16.gmra.mxu1 %v1205_v22  ;;  %817 = vmatmul.bf16.gmra.mxu3 %v1269_v23 }
  0x8c   : > { %693 = vmatmul.bf16.gmra.mxu0 %v1209_v32  ;;  %733 = vmatmul.bf16.gmra.mxu2 %v1273_v33 }
  0x8d   : > { %782 = vmatmul.bf16.gmra.mxu1 %v1213_v34  ;;  %822 = vmatmul.bf16.gmra.mxu3 %v1277_v35 }
  0x9c   : > { %698 = vmatmul.bf16.gmra.mxu0 %v1217_v44  ;;  %738 = vmatmul.bf16.gmra.mxu2 %v1281_v45 }
  0x9d   : > { %787 = vmatmul.bf16.gmra.mxu1 %v1221_v46  ;;  %827 = vmatmul.bf16.gmra.mxu3 %v1285_v47 }
  0xa9   : > { %v664_v48 = vpop.f32.mrf.mxu0 }
  0xaa   : > { %v753_v50 = vpop.f32.mrf.mxu1 }
  0xab   : > { %v754_v51 = vadd.f32 %v753_v50, %v664_v48 }
  0xad   : > { %v936_v52 = vadd.f32 %v1632_v49, %v754_v51 }
  0xaf   : > { %v968_v53 = vmax.f32 %v936_v52, 0.0  ;;  %v704_v54 = vpop.f32.mrf.mxu2 }
  0xb0   : > { %v793_v55 = vpop.f32.mrf.mxu3 }
  0xb1   : > { %1000 = vst [vmem:[%s1640_s7] sm:$0xff] %v968_v53  ;;  %v794_v56 = vadd.f32 %v793_v55, %v704_v54  ;;  %v666_v57 = vpop.f32.mrf.mxu0 }
  0xb2   : > { %v755_v58 = vpop.f32.mrf.mxu1 }
  0xb3   : > { %v952_v59 = vadd.f32 %v1632_v49, %v794_v56  ;;  %v756_v60 = vadd.f32 %v755_v58, %v666_v57 }
  0xb5   : > { %v984_v61 = vmax.f32 %v952_v59, 0.0  ;;  %v937_v62 = vadd.f32 %v1632_v49, %v756_v60 }
  0xb7   : > { %1016 = vst [vmem:[%s1640_s7 + $0x80] sm:$0xff] %v984_v61  ;;  %v969_v63 = vmax.f32 %v937_v62, 0.0  ;;  %v706_v0 = vpop.f32.mrf.mxu2 }
  0xb8   : > { %v795_v1 = vpop.f32.mrf.mxu3 }
  0xb9   : > { %1001 = vst [vmem:[%s1640_s7 + $0x8] sm:$0xff] %v969_v63  ;;  %v796_v2 = vadd.f32 %v795_v1, %v706_v0  ;;  %v669_v3 = vpop.f32.mrf.mxu0 }
  0xba   : > { %v758_v4 = vpop.f32.mrf.mxu1 }
  0xbb   : > { %v953_v5 = vadd.f32 %v1632_v49, %v796_v2  ;;  %v759_v6 = vadd.f32 %v758_v4, %v669_v3 }
  0xbd   : > { %v985_v7 = vmax.f32 %v953_v5, 0.0  ;;  %v938_v8 = vadd.f32 %v1632_v49, %v759_v6 }
  0xbf   : > { %1017 = vst [vmem:[%s1640_s7 + $0x88] sm:$0xff] %v985_v7  ;;  %v970_v9 = vmax.f32 %v938_v8, 0.0  ;;  %v709_v10 = vpop.f32.mrf.mxu2 }
  0xc0   : > { %v798_v11 = vpop.f32.mrf.mxu3 }
  0xc1   : > { %1002 = vst [vmem:[%s1640_s7 + $0x10] sm:$0xff] %v970_v9  ;;  %v799_v12 = vadd.f32 %v798_v11, %v709_v10  ;;  %v671_v13 = vpop.f32.mrf.mxu0 }
  0xc2   : > { %v760_v14 = vpop.f32.mrf.mxu1 }
  0xc3   : > { %v954_v15 = vadd.f32 %v1632_v49, %v799_v12  ;;  %v761_v16 = vadd.f32 %v760_v14, %v671_v13 }
  0xc5   : > { %v986_v17 = vmax.f32 %v954_v15, 0.0  ;;  %v939_v18 = vadd.f32 %v1632_v49, %v761_v16 }
  0xc7   : > { %1018 = vst [vmem:[%s1640_s7 + $0x90] sm:$0xff] %v986_v17  ;;  %v971_v19 = vmax.f32 %v939_v18, 0.0  ;;  %v711_v20 = vpop.f32.mrf.mxu2 }
  0xc8   : > { %v800_v21 = vpop.f32.mrf.mxu3 }
  0xc9   : > { %1003 = vst [vmem:[%s1640_s7 + $0x18] sm:$0xff] %v971_v19  ;;  %v801_v22 = vadd.f32 %v800_v21, %v711_v20  ;;  %v674_v23 = vpop.f32.mrf.mxu0 }
  0xca   : > { %v763_v24 = vpop.f32.mrf.mxu1 }
  0xcb   : > { %v955_v25 = vadd.f32 %v1632_v49, %v801_v22  ;;  %v764_v26 = vadd.f32 %v763_v24, %v674_v23 }
  0xcd   : > { %v987_v27 = vmax.f32 %v955_v25, 0.0  ;;  %v940_v28 = vadd.f32 %v1632_v49, %v764_v26 }
  0xcf   : > { %1019 = vst [vmem:[%s1640_s7 + $0x98] sm:$0xff] %v987_v27  ;;  %v972_v29 = vmax.f32 %v940_v28, 0.0  ;;  %v714_v30 = vpop.f32.mrf.mxu2 }
  0xd0   : > { %v803_v31 = vpop.f32.mrf.mxu3 }
  0xd1   : > { %1004 = vst [vmem:[%s1640_s7 + $0x20] sm:$0xff] %v972_v29  ;;  %v804_v32 = vadd.f32 %v803_v31, %v714_v30  ;;  %v676_v33 = vpop.f32.mrf.mxu0 }
  0xd2   : > { %v765_v34 = vpop.f32.mrf.mxu1 }
  0xd3   : > { %v956_v35 = vadd.f32 %v1632_v49, %v804_v32  ;;  %v766_v36 = vadd.f32 %v765_v34, %v676_v33 }
  0xd5   : > { %v988_v37 = vmax.f32 %v956_v35, 0.0  ;;  %v941_v38 = vadd.f32 %v1632_v49, %v766_v36 }
  0xd7   : > { %1020 = vst [vmem:[%s1640_s7 + $0xa0] sm:$0xff] %v988_v37  ;;  %v973_v39 = vmax.f32 %v941_v38, 0.0  ;;  %v716_v40 = vpop.f32.mrf.mxu2 }
  0xd8   : > { %v805_v41 = vpop.f32.mrf.mxu3 }
  0xd9   : > { %1005 = vst [vmem:[%s1640_s7 + $0x28] sm:$0xff] %v973_v39  ;;  %v806_v42 = vadd.f32 %v805_v41, %v716_v40  ;;  %v679_v43 = vpop.f32.mrf.mxu0 }
  0xda   : > { %v768_v44 = vpop.f32.mrf.mxu1 }
  0xdb   : > { %v957_v45 = vadd.f32 %v1632_v49, %v806_v42  ;;  %v769_v46 = vadd.f32 %v768_v44, %v679_v43 }
  0xdd   : > { %v989_v47 = vmax.f32 %v957_v45, 0.0  ;;  %v942_v48 = vadd.f32 %v1632_v49, %v769_v46 }
  0xdf   : > { %1021 = vst [vmem:[%s1640_s7 + $0xa8] sm:$0xff] %v989_v47  ;;  %v974_v50 = vmax.f32 %v942_v48, 0.0  ;;  %v719_v51 = vpop.f32.mrf.mxu2 }
  0xe0   : > { %v808_v52 = vpop.f32.mrf.mxu3 }
  0xe1   : > { %1006 = vst [vmem:[%s1640_s7 + $0x30] sm:$0xff] %v974_v50  ;;  %v809_v53 = vadd.f32 %v808_v52, %v719_v51  ;;  %v681_v54 = vpop.f32.mrf.mxu0 }
  0xe2   : > { %v770_v55 = vpop.f32.mrf.mxu1 }
  0xe3   : > { %v958_v56 = vadd.f32 %v1632_v49, %v809_v53  ;;  %v771_v57 = vadd.f32 %v770_v55, %v681_v54 }
  0xe5   : > { %v990_v58 = vmax.f32 %v958_v56, 0.0  ;;  %v943_v59 = vadd.f32 %v1632_v49, %v771_v57 }
  0xe7   : > { %1022 = vst [vmem:[%s1640_s7 + $0xb0] sm:$0xff] %v990_v58  ;;  %v975_v60 = vmax.f32 %v943_v59, 0.0  ;;  %v721_v61 = vpop.f32.mrf.mxu2 }
  0xe8   : > { %v810_v62 = vpop.f32.mrf.mxu3 }
  0xe9   : > { %1007 = vst [vmem:[%s1640_s7 + $0x38] sm:$0xff] %v975_v60  ;;  %v811_v63 = vadd.f32 %v810_v62, %v721_v61  ;;  %v684_v0 = vpop.f32.mrf.mxu0 }
  0xea   : > { %v773_v1 = vpop.f32.mrf.mxu1 }
  0xeb   : > { %v959_v2 = vadd.f32 %v1632_v49, %v811_v63  ;;  %v774_v3 = vadd.f32 %v773_v1, %v684_v0 }
  0xed   : > { %v991_v4 = vmax.f32 %v959_v2, 0.0  ;;  %v944_v5 = vadd.f32 %v1632_v49, %v774_v3 }
  0xef   : > { %1023 = vst [vmem:[%s1640_s7 + $0xb8] sm:$0xff] %v991_v4  ;;  %v976_v6 = vmax.f32 %v944_v5, 0.0  ;;  %v724_v7 = vpop.f32.mrf.mxu2 }
  0xf0   : > { %v813_v8 = vpop.f32.mrf.mxu3 }
  0xf1   : > { %1008 = vst [vmem:[%s1640_s7 + $0x40] sm:$0xff] %v976_v6  ;;  %v814_v9 = vadd.f32 %v813_v8, %v724_v7  ;;  %v686_v10 = vpop.f32.mrf.mxu0 }
  0xf2   : > { %v775_v11 = vpop.f32.mrf.mxu1 }
  0xf3   : > { %v960_v12 = vadd.f32 %v1632_v49, %v814_v9  ;;  %v776_v13 = vadd.f32 %v775_v11, %v686_v10 }
  0xf5   : > { %v992_v14 = vmax.f32 %v960_v12, 0.0  ;;  %v945_v15 = vadd.f32 %v1632_v49, %v776_v13 }
  0xf7   : > { %1024 = vst [vmem:[%s1640_s7 + $0xc0] sm:$0xff] %v992_v14  ;;  %v977_v16 = vmax.f32 %v945_v15, 0.0  ;;  %v726_v17 = vpop.f32.mrf.mxu2 }
  0xf8   : > { %v815_v18 = vpop.f32.mrf.mxu3 }
  0xf9   : > { %1009 = vst [vmem:[%s1640_s7 + $0x48] sm:$0xff] %v977_v16  ;;  %v816_v19 = vadd.f32 %v815_v18, %v726_v17  ;;  %v689_v20 = vpop.f32.mrf.mxu0 }
  0xfa   : > { %v778_v21 = vpop.f32.mrf.mxu1 }
  0xfb   : > { %v961_v22 = vadd.f32 %v1632_v49, %v816_v19  ;;  %v779_v23 = vadd.f32 %v778_v21, %v689_v20 }
  0xfd   : > { %v993_v24 = vmax.f32 %v961_v22, 0.0  ;;  %v946_v25 = vadd.f32 %v1632_v49, %v779_v23 }
  0xff   : > { %1025 = vst [vmem:[%s1640_s7 + $0xc8] sm:$0xff] %v993_v24  ;;  %v978_v26 = vmax.f32 %v946_v25, 0.0  ;;  %v729_v27 = vpop.f32.mrf.mxu2 }
 0x100   : > { %v818_v28 = vpop.f32.mrf.mxu3 }
 0x101   : > { %1010 = vst [vmem:[%s1640_s7 + $0x50] sm:$0xff] %v978_v26  ;;  %v819_v29 = vadd.f32 %v818_v28, %v729_v27  ;;  %v691_v30 = vpop.f32.mrf.mxu0 }
 0x102   : > { %v780_v31 = vpop.f32.mrf.mxu1 }
 0x103   : > { %v962_v32 = vadd.f32 %v1632_v49, %v819_v29  ;;  %v781_v33 = vadd.f32 %v780_v31, %v691_v30 }
 0x105   : > { %v994_v34 = vmax.f32 %v962_v32, 0.0  ;;  %v947_v35 = vadd.f32 %v1632_v49, %v781_v33 }
 0x107   : > { %1026 = vst [vmem:[%s1640_s7 + $0xd0] sm:$0xff] %v994_v34  ;;  %v979_v36 = vmax.f32 %v947_v35, 0.0  ;;  %v731_v37 = vpop.f32.mrf.mxu2 }
 0x108   : > { %v820_v38 = vpop.f32.mrf.mxu3 }
 0x109   : > { %1011 = vst [vmem:[%s1640_s7 + $0x58] sm:$0xff] %v979_v36  ;;  %v821_v39 = vadd.f32 %v820_v38, %v731_v37  ;;  %v694_v40 = vpop.f32.mrf.mxu0 }
 0x10a   : > { %v783_v41 = vpop.f32.mrf.mxu1 }
 0x10b   : > { %v963_v42 = vadd.f32 %v1632_v49, %v821_v39  ;;  %v784_v43 = vadd.f32 %v783_v41, %v694_v40 }
 0x10d   : > { %v995_v44 = vmax.f32 %v963_v42, 0.0  ;;  %v948_v45 = vadd.f32 %v1632_v49, %v784_v43 }
 0x10f   : > { %1027 = vst [vmem:[%s1640_s7 + $0xd8] sm:$0xff] %v995_v44  ;;  %v980_v46 = vmax.f32 %v948_v45, 0.0  ;;  %v734_v47 = vpop.f32.mrf.mxu2 }
 0x110   : > { %v823_v48 = vpop.f32.mrf.mxu3 }
 0x111   : > { %1012 = vst [vmem:[%s1640_s7 + $0x60] sm:$0xff] %v980_v46  ;;  %v824_v50 = vadd.f32 %v823_v48, %v734_v47  ;;  %v696_v51 = vpop.f32.mrf.mxu0 }
 0x112   : > { %v785_v52 = vpop.f32.mrf.mxu1 }
 0x113   : > { %v964_v53 = vadd.f32 %v1632_v49, %v824_v50  ;;  %v786_v54 = vadd.f32 %v785_v52, %v696_v51 }
 0x115   : > { %v996_v55 = vmax.f32 %v964_v53, 0.0  ;;  %v949_v56 = vadd.f32 %v1632_v49, %v786_v54 }
 0x117   : > { %1028 = vst [vmem:[%s1640_s7 + $0xe0] sm:$0xff] %v996_v55  ;;  %v981_v57 = vmax.f32 %v949_v56, 0.0  ;;  %v736_v58 = vpop.f32.mrf.mxu2 }
 0x118   : > { %v825_v59 = vpop.f32.mrf.mxu3 }
 0x119   : > { %1013 = vst [vmem:[%s1640_s7 + $0x68] sm:$0xff] %v981_v57  ;;  %v826_v60 = vadd.f32 %v825_v59, %v736_v58  ;;  %v699_v61 = vpop.f32.mrf.mxu0 }
 0x11a   : > { %v788_v62 = vpop.f32.mrf.mxu1 }
 0x11b   : > { %v965_v63 = vadd.f32 %v1632_v49, %v826_v60  ;;  %v789_v0 = vadd.f32 %v788_v62, %v699_v61 }
 0x11d   : > { %v997_v1 = vmax.f32 %v965_v63, 0.0  ;;  %v950_v2 = vadd.f32 %v1632_v49, %v789_v0 }
 0x11f   : > { %1029 = vst [vmem:[%s1640_s7 + $0xe8] sm:$0xff] %v997_v1  ;;  %v982_v3 = vmax.f32 %v950_v2, 0.0  ;;  %v739_v4 = vpop.f32.mrf.mxu2 }
 0x120   : > { %v828_v5 = vpop.f32.mrf.mxu3 }
 0x121   : > { %1014 = vst [vmem:[%s1640_s7 + $0x70] sm:$0xff] %v982_v3  ;;  %v829_v6 = vadd.f32 %v828_v5, %v739_v4  ;;  %v701_v7 = vpop.f32.mrf.mxu0 }
 0x122   : > { %v790_v8 = vpop.f32.mrf.mxu1 }
 0x123   : > { %v966_v9 = vadd.f32 %v1632_v49, %v829_v6  ;;  %v791_v10 = vadd.f32 %v790_v8, %v701_v7 }
 0x125   : > { %v998_v11 = vmax.f32 %v966_v9, 0.0  ;;  %v951_v12 = vadd.f32 %v1632_v49, %v791_v10 }
 0x127   : > { %1030 = vst [vmem:[%s1640_s7 + $0xf0] sm:$0xff] %v998_v11  ;;  %v983_v13 = vmax.f32 %v951_v12, 0.0  ;;  %v741_v14 = vpop.f32.mrf.mxu2 }
 0x128   : > { %v830_v15 = vpop.f32.mrf.mxu3 }
 0x129   : > { %1015 = vst [vmem:[%s1640_s7 + $0x78] sm:$0xff] %v983_v13  ;;  %v831_v16 = vadd.f32 %v830_v15, %v741_v14 }
 0x12b   : > { %v967_v17 = vadd.f32 %v1632_v49, %v831_v16 }
 0x12d   : > { %v999_v18 = vmax.f32 %v967_v17, 0.0 }
 0x12f   : > { %1031 = vst [vmem:[%s1640_s7 + $0xf8] sm:$0xff] %v999_v18 }
 0x130 PF: > { %s13_s14 = sadd.s32 1, %s1464_s14   ;;  %s1718_s12 = smov %s1460_s13 }
 0x131   : > { %p10_p5 = scmp.ge.s32.totalorder %s13_s14, 4   ;;  %s1719_s13 = smov %s1721_s15 }
 0x133   :  { %12 = sbr.rel (!%p10_p5) target bundleno = 2 (0x2), region = 76 }

// kernel: cnn_forward.12
= control target key start
LH: loop header
LB: loop body
LE: loop exit
PB: predicated region body
PF: predicated region fallthrough
CT: control target
= control target key end

     0   :  { %s2602_s1 = inlined_call_operand.vmem [shape: bf16[896,128], index: 1, kind: input, shape index: {}]   ;;  %s2603_s0 = inlined_call_operand.vmem [shape: bf16[128,896], index: 0, kind: input, shape index: {}]   ;;  %s2604_s2 = inlined_call_operand.vmem [shape: f32[1,128], index: 2, kind: input, shape index: {}]   ;;  %s2605_s3 = inlined_call_operand.vmem [shape: f32[128,128], index: 3, kind: output, shape index: {}]  }
   0x1   :  { %v1811_v0 = vld [vmem:[%s2602_s1 + $0x38] sm:$0xff]  ;;  %v1810_v3 = vld [vmem:[%s2602_s1 + $0x30] sm:$0xff]  ;;  %v1809_v6 = vld [vmem:[%s2602_s1 + $0x28] sm:$0xff] }
   0x2   :  { %v1911_v1 = vld [vmem:[%s2602_s1 + $0xb8] sm:$0xff]  ;;  %850 = vmatpush.bf16.msra.mxu0 %v1811_v0  ;;  %1860 = vmatpush.bf16.msra.mxu3 %v1811_v0  ;;  %v1926_v4 = vld [vmem:[%s2602_s1 + $0xb0] sm:$0xff]  ;;  %v1941_v7 = vld [vmem:[%s2602_s1 + $0xa8] sm:$0xff] }
   0x3   :  { %v1916_v2 = vld [vmem:[%s2602_s1 + $0x78] sm:$0xff]  ;;  %1876 = vmatpush.bf16.msra.mxu2 %v1911_v1  ;;  %v1931_v5 = vld [vmem:[%s2602_s1 + $0x70] sm:$0xff]  ;;  %v1946_v8 = vld [vmem:[%s2602_s1 + $0x68] sm:$0xff] }
   0x4   :  { %1868 = vmatpush.bf16.msra.mxu1 %v1916_v2  ;;  %v1808_v9 = vld [vmem:[%s2602_s1 + $0x20] sm:$0xff]  ;;  %v1807_v12 = vld [vmem:[%s2602_s1 + $0x18] sm:$0xff]  ;;  %v1806_v15 = vld [vmem:[%s2602_s1 + $0x10] sm:$0xff] }
   0x5   :  { %v1956_v10 = vld [vmem:[%s2602_s1 + $0xa0] sm:$0xff]  ;;  %v1971_v13 = vld [vmem:[%s2602_s1 + $0x98] sm:$0xff]  ;;  %v1986_v16 = vld [vmem:[%s2602_s1 + $0x90] sm:$0xff] }
   0x6   :  { %851 = vmatpush.bf16.msra.mxu0 %v1810_v3  ;;  %1861 = vmatpush.bf16.msra.mxu3 %v1810_v3  ;;  %v1961_v11 = vld [vmem:[%s2602_s1 + $0x60] sm:$0xff]  ;;  %v1976_v14 = vld [vmem:[%s2602_s1 + $0x58] sm:$0xff]  ;;  %v1991_v17 = vld [vmem:[%s2602_s1 + $0x50] sm:$0xff] }
   0x7   :  { %1877 = vmatpush.bf16.msra.mxu2 %v1926_v4  ;;  %v1805_v18 = vld [vmem:[%s2602_s1 + $0x8] sm:$0xff]  ;;  %v1804_v21 = vld [vmem:[%s2602_s1] sm:$0xff]  ;;  %v1751_v25 = vld [vmem:[%s2603_s0 + $0x18] sm:$0xf0] }
   0x8   :  { %1869 = vmatpush.bf16.msra.mxu1 %v1931_v5  ;;  %v2001_v19 = vld [vmem:[%s2602_s1 + $0x88] sm:$0xff]  ;;  %v2014_v22 = vld [vmem:[%s2602_s1 + $0x80] sm:$0xff]  ;;  %v1358_v26 = vld [vmem:[%s2603_s0 + $0x70] sm:$0xf] }
   0x9   :  { %v2006_v20 = vld [vmem:[%s2602_s1 + $0x48] sm:$0xff]  ;;  %v2019_v23 = vld [vmem:[%s2602_s1 + $0x40] sm:$0xff]  ;;  %v1366_v28 = vld [vmem:[%s2603_s0 + $0x78] sm:$0xf] }
   0xa   :  { %852 = vmatpush.bf16.msra.mxu0 %v1809_v6  ;;  %1862 = vmatpush.bf16.msra.mxu3 %v1809_v6  ;;  %v1302_v24 = vld [vmem:[%s2603_s0] sm:$0xf]  ;;  %v1765_v27 = vld [vmem:[%s2603_s0 + $0x88] sm:$0xf0]  ;;  %v1766_v29 = vld [vmem:[%s2603_s0 + $0x90] sm:$0xf0] }
   0xb   :  { %1878 = vmatpush.bf16.msra.mxu2 %v1941_v7  ;;  %v1762_v30 = vld [vmem:[%s2603_s0 + $0x74] sm:$0xf]  ;;  %v1360_v31 = vld [vmem:[%s2603_s0 + $0x8c] sm:$0xf0]  ;;  %v1835_v32 = vld [vmem:[%s2602_s1 + $0xf8] sm:$0xff]  ;;  %v1303_v33 = vor.u32 %v1751_v25, %v1302_v24  ;;  %v1359_v34 = vor.u32 %v1765_v27, %v1358_v26  ;;  %v1367_v35 = vor.u32 %v1766_v29, %v1366_v28 }
   0xc   :  { %1870 = vmatpush.bf16.msra.mxu1 %v1946_v8  ;;  %v1363_v36 = vor.u32 %v1762_v30, %v1360_v31  ;;  %v1859_v37 = vld [vmem:[%s2602_s1 + $0x1b8] sm:$0xff]  ;;  %v1834_v39 = vld [vmem:[%s2602_s1 + $0xf0] sm:$0xff]  ;;  %v1833_v42 = vld [vmem:[%s2602_s1 + $0xe8] sm:$0xff] }
   0xd   :  { %v1851_v38 = vld [vmem:[%s2602_s1 + $0x178] sm:$0xff]  ;;  %v1858_v40 = vld [vmem:[%s2602_s1 + $0x1b0] sm:$0xff]  ;;  %v1857_v43 = vld [vmem:[%s2602_s1 + $0x1a8] sm:$0xff] }
   0xe   :  { %853 = vmatpush.bf16.msra.mxu0 %v1808_v9  ;;  %1863 = vmatpush.bf16.msra.mxu3 %v1808_v9  ;;  %v1850_v41 = vld [vmem:[%s2602_s1 + $0x170] sm:$0xff]  ;;  %v1849_v44 = vld [vmem:[%s2602_s1 + $0x168] sm:$0xff]  ;;  %v1330_v45 = vld [vmem:[%s2603_s0 + $0x38] sm:$0xf] }
   0xf   :  { %1879 = vmatpush.bf16.msra.mxu2 %v1956_v10  ;;  %v1832_v46 = vld [vmem:[%s2602_s1 + $0xe0] sm:$0xff]  ;;  %v1758_v47 = vld [vmem:[%s2603_s0 + $0x50] sm:$0xf0]  ;;  %v1386_v48 = vld [vmem:[%s2603_s0 + $0xa8] sm:$0xf] }
  0x10   :  { %1871 = vmatpush.bf16.msra.mxu1 %v1961_v11  ;;  %v1772_v49 = vld [vmem:[%s2603_s0 + $0xc0] sm:$0xf0]  ;;  %v1394_v50 = vld [vmem:[%s2603_s0 + $0xb0] sm:$0xf]  ;;  %v1773_v51 = vld [vmem:[%s2603_s0 + $0xc8] sm:$0xf0]  ;;  %v1331_v56 = vor.u32 %v1758_v47, %v1330_v45 }
  0x11   :  { %v1769_v52 = vld [vmem:[%s2603_s0 + $0xac] sm:$0xf]  ;;  %v1388_v53 = vld [vmem:[%s2603_s0 + $0xc4] sm:$0xf0]  ;;  %v1856_v54 = vld [vmem:[%s2602_s1 + $0x1a0] sm:$0xff]  ;;  %v1387_v57 = vor.u32 %v1772_v49, %v1386_v48  ;;  %v1395_v58 = vor.u32 %v1773_v51, %v1394_v50 }
  0x12   :  { %854 = vmatpush.bf16.msra.mxu0 %v1807_v12  ;;  %1864 = vmatpush.bf16.msra.mxu3 %v1807_v12  ;;  %v1848_v55 = vld [vmem:[%s2602_s1 + $0x160] sm:$0xff]  ;;  %v1391_v59 = vor.u32 %v1769_v52, %v1388_v53  ;;  %v1831_v60 = vld [vmem:[%s2602_s1 + $0xd8] sm:$0xff]  ;;  %v1830_v63 = vld [vmem:[%s2602_s1 + $0xd0] sm:$0xff] }
  0x13   :  { %1880 = vmatpush.bf16.msra.mxu2 %v1971_v13  ;;  %v1855_v61 = vld [vmem:[%s2602_s1 + $0x198] sm:$0xff]  ;;  %v1414_v0 = vld [vmem:[%s2603_s0 + $0xe0] sm:$0xf]  ;;  %v1748_v3 = vld [vmem:[%s2603_s0 + $0x4] sm:$0xf] }
  0x14   :  { %1872 = vmatpush.bf16.msra.mxu1 %v1976_v14  ;;  %v1847_v62 = vld [vmem:[%s2602_s1 + $0x158] sm:$0xff]  ;;  %v1422_v6 = vld [vmem:[%s2603_s0 + $0xe8] sm:$0xf]  ;;  %v1776_v9 = vld [vmem:[%s2603_s0 + $0xe4] sm:$0xf] }
  0x15   :  { %v1755_v24 = vld [vmem:[%s2603_s0 + $0x3c] sm:$0xf]  ;;  %v1450_v25 = vld [vmem:[%s2603_s0 + $0x120] sm:$0xf]  ;;  %v1444_v28 = vld [vmem:[%s2603_s0 + $0x134] sm:$0xf0] }
  0x16   :  { %855 = vmatpush.bf16.msra.mxu0 %v1806_v15  ;;  %1865 = vmatpush.bf16.msra.mxu3 %v1806_v15  ;;  %v1787_v26 = vld [vmem:[%s2603_s0 + $0x138] sm:$0xf0]  ;;  %v1840_v47 = vld [vmem:[%s2602_s1 + $0x120] sm:$0xff]  ;;  %v1498_v49 = vld [vmem:[%s2603_s0 + $0x188] sm:$0xf] }
  0x17   :  { %1881 = vmatpush.bf16.msra.mxu2 %v1986_v16  ;;  %v1783_v27 = vld [vmem:[%s2603_s0 + $0x11c] sm:$0xf]  ;;  %v1451_v31 = vor.u32 %v1787_v26, %v1450_v25  ;;  %v1800_v50 = vld [vmem:[%s2603_s0 + $0x1a0] sm:$0xf0]  ;;  %v1338_v51 = vld [vmem:[%s2603_s0 + $0x40] sm:$0xf] }
  0x18   :  { %1873 = vmatpush.bf16.msra.mxu1 %v1991_v17  ;;  %v1839_v48 = vld [vmem:[%s2602_s1 + $0x118] sm:$0xff]  ;;  %v1506_v53 = vld [vmem:[%s2603_s0 + $0x190] sm:$0xf] }
  0x19   :  { %v1759_v52 = vld [vmem:[%s2603_s0 + $0x58] sm:$0xf0] }
  0x1a   :  { %856 = vmatpush.bf16.msra.mxu0 %v1805_v18  ;;  %1866 = vmatpush.bf16.msra.mxu3 %v1805_v18  ;;  %v1854_v18 = vld [vmem:[%s2602_s1 + $0x190] sm:$0xff] }
  0x1b   :  { %1882 = vmatpush.bf16.msra.mxu2 %v2001_v19 }
  0x1c   :  { %1874 = vmatpush.bf16.msra.mxu1 %v2006_v20 }
  0x1e   :  { %857 = vmatpush.bf16.msra.mxu0 %v1804_v21  ;;  %1867 = vmatpush.bf16.msra.mxu3 %v1804_v21  ;;  %v1853_v21 = vld [vmem:[%s2602_s1 + $0x188] sm:$0xff] }
  0x1f   :  { %1883 = vmatpush.bf16.msra.mxu2 %v2014_v22 }
  0x20   :  { %1875 = vmatpush.bf16.msra.mxu1 %v2019_v23 }
  0x21   :  { %858 = vmatmul.bf16.vlgmr.msra.gmra.mxu0 %v1303_v33  ;;  %868 = vmatmul.bf16.vlgmr.msra.gmra.mxu3 %v1359_v34  ;;  %v1828_v33 = vld [vmem:[%s2602_s1 + $0xc0] sm:$0xff]  ;;  %v1843_v34 = vld [vmem:[%s2602_s1 + $0x138] sm:$0xff] }
  0x22   :  { %997 = vmatpush.bf16.msrb.mxu3 %v1835_v32  ;;  %899 = vmatpush.bf16.msrb.mxu0 %v1916_v2  ;;  %v1779_v2 = vld [vmem:[%s2603_s0 + $0xf8] sm:$0xf0]  ;;  %v1447_v32 = vor.u32 %v1783_v27, %v1444_v28 }
  0x23   :  { %966 = vmatmul.bf16.vlgmr.msra.gmra.mxu2 %v1367_v35  ;;  %917 = vmatmul.bf16.vlgmr.msra.gmra.mxu1 %v1363_v36  ;;  %v1415_v12 = vor.u32 %v1779_v2, %v1414_v0  ;;  %v1844_v35 = vld [vmem:[%s2602_s1 + $0x140] sm:$0xff]  ;;  %v1793_v36 = vld [vmem:[%s2603_s0 + $0x168] sm:$0xf0]  ;;  %v1312_v2 = vld [vmem:[%s2603_s0 + $0x24] sm:$0xf0] }
  0x24   :  { %1144 = vmatpush.bf16.msrb.mxu2 %v1859_v37  ;;  %1095 = vmatpush.bf16.msrb.mxu1 %v1851_v38  ;;  %v1752_v37 = vld [vmem:[%s2603_s0 + $0x20] sm:$0xf0]  ;;  %v1478_v38 = vld [vmem:[%s2603_s0 + $0x158] sm:$0xf]  ;;  %v1749_v0 = vld [vmem:[%s2603_s0 + $0xc] sm:$0xf] }
  0x26   :  { %900 = vmatpush.bf16.msrb.mxu0 %v1931_v5  ;;  %998 = vmatpush.bf16.msrb.mxu3 %v1834_v39  ;;  %v1304_v5 = vld [vmem:[%s2603_s0 + $0x1c] sm:$0xf0]  ;;  %v1794_v39 = vld [vmem:[%s2603_s0 + $0x170] sm:$0xf0] }
  0x28   :  { %1145 = vmatpush.bf16.msrb.mxu2 %v1858_v40  ;;  %1096 = vmatpush.bf16.msrb.mxu1 %v1850_v41  ;;  %v1790_v40 = vld [vmem:[%s2603_s0 + $0x154] sm:$0xf]  ;;  %v1472_v41 = vld [vmem:[%s2603_s0 + $0x16c] sm:$0xf0] }
  0x29   :  { %v1475_v45 = vor.u32 %v1790_v40, %v1472_v41 }
  0x2a   :  { %901 = vmatpush.bf16.msrb.mxu0 %v1946_v8  ;;  %999 = vmatpush.bf16.msrb.mxu3 %v1833_v42  ;;  %v1780_v8 = vld [vmem:[%s2603_s0 + $0x100] sm:$0xf0]  ;;  %v1842_v42 = vld [vmem:[%s2602_s1 + $0x130] sm:$0xff] }
  0x2b   :  { %v1423_v15 = vor.u32 %v1780_v8, %v1422_v6  ;;  %v1326_v6 = vld [vmem:[%s2603_s0 + $0x18] sm:$0xf]  ;;  %v1754_v8 = vld [vmem:[%s2603_s0 + $0x30] sm:$0xf0] }
  0x2c   :  { %1146 = vmatpush.bf16.msrb.mxu2 %v1857_v43  ;;  %1097 = vmatpush.bf16.msrb.mxu1 %v1849_v44 }
  0x2e   :  { %902 = vmatpush.bf16.msrb.mxu0 %v1961_v11  ;;  %1000 = vmatpush.bf16.msrb.mxu3 %v1832_v46  ;;  %v1416_v11 = vld [vmem:[%s2603_s0 + $0xfc] sm:$0xf0]  ;;  %v1841_v46 = vld [vmem:[%s2602_s1 + $0x128] sm:$0xff] }
  0x30   :  { %1147 = vmatpush.bf16.msrb.mxu2 %v1856_v54  ;;  %1098 = vmatpush.bf16.msrb.mxu1 %v1848_v55  ;;  %v1801_v54 = vld [vmem:[%s2603_s0 + $0x1a8] sm:$0xf0] }
  0x31   :  { %863 = vmatmul.bf16.gmra.mxu0 %v1331_v56  ;;  %873 = vmatmul.bf16.gmra.mxu3 %v1387_v57  ;;  %v1797_v55 = vld [vmem:[%s2603_s0 + $0x18c] sm:$0xf]  ;;  %v1500_v56 = vld [vmem:[%s2603_s0 + $0x1a4] sm:$0xf0]  ;;  %v1838_v57 = vld [vmem:[%s2602_s1 + $0x110] sm:$0xff] }
  0x32   :  { %903 = vmatpush.bf16.msrb.mxu0 %v1976_v14  ;;  %1001 = vmatpush.bf16.msrb.mxu3 %v1831_v60  ;;  %v1307_v14 = vor.u32 %v1748_v3, %v1304_v5  ;;  %v1507_v60 = vor.u32 %v1801_v54, %v1506_v53  ;;  %v1318_v3 = vld [vmem:[%s2603_s0 + $0x10] sm:$0xf]  ;;  %v1753_v5 = vld [vmem:[%s2603_s0 + $0x28] sm:$0xf0] }
  0x33   :  { %971 = vmatmul.bf16.gmra.mxu2 %v1395_v58  ;;  %922 = vmatmul.bf16.gmra.mxu1 %v1391_v59  ;;  %v1499_v58 = vor.u32 %v1800_v50, %v1498_v49  ;;  %v1339_v59 = vor.u32 %v1759_v52, %v1338_v51  ;;  %v1775_v49 = vld [vmem:[%s2603_s0 + $0xd8] sm:$0xf0]  ;;  %v1404_v51 = vld [vmem:[%s2603_s0 + $0xd4] sm:$0xf0] }
  0x34   :  { %1148 = vmatpush.bf16.msrb.mxu2 %v1855_v61  ;;  %1099 = vmatpush.bf16.msrb.mxu1 %v1847_v62  ;;  %v1503_v61 = vor.u32 %v1797_v55, %v1500_v56  ;;  %v1837_v62 = vld [vmem:[%s2602_s1 + $0x108] sm:$0xff]  ;;  %v1771_v50 = vld [vmem:[%s2603_s0 + $0xbc] sm:$0xf] }
  0x36   :  { %904 = vmatpush.bf16.msrb.mxu0 %v1991_v17  ;;  %1002 = vmatpush.bf16.msrb.mxu3 %v1830_v63  ;;  %v1419_v17 = vor.u32 %v1776_v9, %v1416_v11  ;;  %v1836_v63 = vld [vmem:[%s2602_s1 + $0x100] sm:$0xff]  ;;  %v1750_v9 = vld [vmem:[%s2603_s0 + $0x14] sm:$0xf]  ;;  %v1320_v11 = vld [vmem:[%s2603_s0 + $0x2c] sm:$0xf0] }
  0x38   :  { %1149 = vmatpush.bf16.msrb.mxu2 %v1854_v18  ;;  %v1756_v18 = vld [vmem:[%s2603_s0 + $0x44] sm:$0xf] }
  0x3a   :  { %905 = vmatpush.bf16.msrb.mxu0 %v2006_v20  ;;  %v1846_v20 = vld [vmem:[%s2602_s1 + $0x150] sm:$0xff] }
  0x3b   :  { %1100 = vmatpush.bf16.msrb.mxu1 %v1846_v20  ;;  %v1340_v20 = vld [vmem:[%s2603_s0 + $0x5c] sm:$0xf0] }
  0x3c   :  { %1150 = vmatpush.bf16.msrb.mxu2 %v1853_v21  ;;  %v1760_v21 = vld [vmem:[%s2603_s0 + $0x60] sm:$0xf0]  ;;  %v1343_v25 = vor.u32 %v1756_v18, %v1340_v20 }
  0x3e   :  { %906 = vmatpush.bf16.msrb.mxu0 %v2019_v23  ;;  %v1442_v23 = vld [vmem:[%s2603_s0 + $0x118] sm:$0xf] }
  0x41   :  { %878 = vmatmul.bf16.gmra.mxu3 %v1415_v12  ;;  %907 = vmatmul.bf16.vlgmr.msrb.gmra.mxu0 %v1307_v14  ;;  %v1315_v12 = vor.u32 %v1749_v0, %v1312_v2  ;;  %v1319_v14 = vor.u32 %v1753_v5, %v1318_v3 }
  0x42   :  { %948 = vmatpush.bf16.msra.mxu0 %v1911_v1  ;;  %v1829_v1 = vld [vmem:[%s2602_s1 + $0xc8] sm:$0xff] }
  0x43   :  { %976 = vmatmul.bf16.gmra.mxu2 %v1423_v15  ;;  %927 = vmatmul.bf16.gmra.mxu1 %v1419_v17  ;;  %v1327_v15 = vor.u32 %v1754_v8, %v1326_v6  ;;  %v1323_v17 = vor.u32 %v1750_v9, %v1320_v11  ;;  %v1777_v6 = vld [vmem:[%s2603_s0 + $0xec] sm:$0xf]  ;;  %v1424_v8 = vld [vmem:[%s2603_s0 + $0x104] sm:$0xf0]  ;;  %v1430_v9 = vld [vmem:[%s2603_s0 + $0xf0] sm:$0xf] }
  0x44   :  { %1003 = vmatpush.bf16.msrb.mxu3 %v1829_v1  ;;  %v1346_v1 = vld [vmem:[%s2603_s0 + $0x48] sm:$0xf]  ;;  %v1781_v11 = vld [vmem:[%s2603_s0 + $0x108] sm:$0xf0] }
  0x45   :  { %v1347_v26 = vor.u32 %v1760_v21, %v1346_v1  ;;  %v1427_v21 = vor.u32 %v1777_v6, %v1424_v8 }
  0x46   :  { %949 = vmatpush.bf16.msra.mxu0 %v1926_v4  ;;  %v1786_v4 = vld [vmem:[%s2603_s0 + $0x130] sm:$0xf0] }
  0x47   :  { %v1443_v29 = vor.u32 %v1786_v4, %v1442_v23  ;;  %v1354_v23 = vld [vmem:[%s2603_s0 + $0x50] sm:$0xf]  ;;  %v1761_v4 = vld [vmem:[%s2603_s0 + $0x68] sm:$0xf0] }
  0x48   :  { %1004 = vmatpush.bf16.msrb.mxu3 %v1828_v33  ;;  %v1355_v27 = vor.u32 %v1761_v4, %v1354_v23  ;;  %v1768_v33 = vld [vmem:[%s2603_s0 + $0xa0] sm:$0xf0]  ;;  %v1431_v23 = vor.u32 %v1781_v11, %v1430_v9 }
  0x4a   :  { %950 = vmatpush.bf16.msra.mxu0 %v1941_v7  ;;  %v1332_v7 = vld [vmem:[%s2603_s0 + $0x54] sm:$0xf0] }
  0x4b   :  { %v1335_v30 = vor.u32 %v1755_v24, %v1332_v7  ;;  %v1757_v24 = vld [vmem:[%s2603_s0 + $0x4c] sm:$0xf]  ;;  %v1348_v7 = vld [vmem:[%s2603_s0 + $0x64] sm:$0xf0] }
  0x4c   :  { %v1351_v28 = vor.u32 %v1757_v24, %v1348_v7 }
  0x4e   :  { %951 = vmatpush.bf16.msra.mxu0 %v1956_v10  ;;  %v1845_v10 = vld [vmem:[%s2602_s1 + $0x148] sm:$0xff] }
  0x4f   :  { %1101 = vmatpush.bf16.msrb.mxu1 %v1845_v10  ;;  %v1382_v10 = vld [vmem:[%s2603_s0 + $0x88] sm:$0xf] }
  0x51   :  { %883 = vmatmul.bf16.gmra.mxu3 %v1443_v29  ;;  %912 = vmatmul.bf16.gmra.mxu0 %v1335_v30  ;;  %v1763_v29 = vld [vmem:[%s2603_s0 + $0x7c] sm:$0xf]  ;;  %v1368_v30 = vld [vmem:[%s2603_s0 + $0x94] sm:$0xf0] }
  0x52   :  { %952 = vmatpush.bf16.msra.mxu0 %v1971_v13  ;;  %v1852_v13 = vld [vmem:[%s2602_s1 + $0x180] sm:$0xff] }
  0x53   :  { %981 = vmatmul.bf16.gmra.mxu2 %v1451_v31  ;;  %932 = vmatmul.bf16.gmra.mxu1 %v1447_v32  ;;  %v1374_v31 = vld [vmem:[%s2603_s0 + $0x80] sm:$0xf]  ;;  %v1767_v32 = vld [vmem:[%s2603_s0 + $0x98] sm:$0xf0] }
  0x54   :  { %1151 = vmatpush.bf16.msrb.mxu2 %v1852_v13  ;;  %1102 = vmatpush.bf16.msrb.mxu1 %v1844_v35  ;;  %v1764_v13 = vld [vmem:[%s2603_s0 + $0x84] sm:$0xf]  ;;  %v1371_v35 = vor.u32 %v1763_v29, %v1368_v30 }
  0x56   :  { %953 = vmatpush.bf16.msra.mxu0 %v1986_v16  ;;  %v1470_v16 = vld [vmem:[%s2603_s0 + $0x150] sm:$0xf] }
  0x57   :  { %v1471_v43 = vor.u32 %v1793_v36, %v1470_v16  ;;  %v1375_v16 = vor.u32 %v1767_v32, %v1374_v31 }
  0x5a   :  { %954 = vmatpush.bf16.msra.mxu0 %v2001_v19  ;;  %v1310_v19 = vld [vmem:[%s2603_s0 + $0x8] sm:$0xf] }
  0x5b   :  { %v1311_v44 = vor.u32 %v1752_v37, %v1310_v19  ;;  %v1383_v19 = vor.u32 %v1768_v33, %v1382_v10  ;;  %v1784_v10 = vld [vmem:[%s2603_s0 + $0x124] sm:$0xf]  ;;  %v1452_v33 = vld [vmem:[%s2603_s0 + $0x13c] sm:$0xf0] }
  0x5e   :  { %955 = vmatpush.bf16.msra.mxu0 %v2014_v22  ;;  %v1479_v22 = vor.u32 %v1794_v39, %v1478_v38 }
  0x61   :  { %888 = vmatmul.bf16.gmra.mxu3 %v1471_v43  ;;  %956 = vmatmul.bf16.vlgmr.msra.gmra.mxu0 %v1311_v44 }
  0x62   :  { %1046 = vmatpush.bf16.msrb.mxu0 %v1843_v34  ;;  %v1376_v34 = vld [vmem:[%s2603_s0 + $0x9c] sm:$0xf0] }
  0x63   :  { %986 = vmatmul.bf16.gmra.mxu2 %v1479_v22  ;;  %937 = vmatmul.bf16.gmra.mxu1 %v1475_v45  ;;  %v1379_v37 = vor.u32 %v1764_v13, %v1376_v34  ;;  %v1770_v22 = vld [vmem:[%s2603_s0 + $0xb4] sm:$0xf]  ;;  %v1396_v45 = vld [vmem:[%s2603_s0 + $0xcc] sm:$0xf0]  ;;  %v1458_v13 = vld [vmem:[%s2603_s0 + $0x128] sm:$0xf] }
  0x64   :  { %v1399_v55 = vor.u32 %v1770_v22, %v1396_v45  ;;  %v1788_v34 = vld [vmem:[%s2603_s0 + $0x140] sm:$0xf0] }
  0x66   :  { %1047 = vmatpush.bf16.msrb.mxu0 %v1842_v42 }
  0x6a   :  { %1048 = vmatpush.bf16.msrb.mxu0 %v1841_v46  ;;  %v1402_v46 = vld [vmem:[%s2603_s0 + $0xb8] sm:$0xf] }
  0x6e   :  { %1049 = vmatpush.bf16.msrb.mxu0 %v1840_v47  ;;  %v1774_v47 = vld [vmem:[%s2603_s0 + $0xd0] sm:$0xf0] }
  0x6f   :  { %v1403_v56 = vor.u32 %v1774_v47, %v1402_v46 }
  0x71   :  { %893 = vmatmul.bf16.gmra.mxu3 %v1499_v58  ;;  %961 = vmatmul.bf16.gmra.mxu0 %v1339_v59  ;;  %v1407_v59 = vor.u32 %v1771_v50, %v1404_v51 }
  0x72   :  { %1050 = vmatpush.bf16.msrb.mxu0 %v1839_v48  ;;  %v1410_v48 = vld [vmem:[%s2603_s0 + $0xc0] sm:$0xf] }
  0x73   :  { %991 = vmatmul.bf16.gmra.mxu2 %v1507_v60  ;;  %942 = vmatmul.bf16.gmra.mxu1 %v1503_v61  ;;  %v1411_v58 = vor.u32 %v1775_v49, %v1410_v48 }
  0x76   :  { %1051 = vmatpush.bf16.msrb.mxu0 %v1838_v57 }
  0x7a   :  { %1052 = vmatpush.bf16.msrb.mxu0 %v1837_v62 }
  0x7e   :  { %1053 = vmatpush.bf16.msrb.mxu0 %v1836_v63 }
  0x81   :  { %1005 = vmatmul.bf16.vlgmr.msrb.gmra.mxu3 %v1315_v12  ;;  %1054 = vmatmul.bf16.vlgmr.msrb.gmra.mxu0 %v1319_v14  ;;  %v1438_v12 = vld [vmem:[%s2603_s0 + $0xf8] sm:$0xf]  ;;  %v1782_v14 = vld [vmem:[%s2603_s0 + $0x110] sm:$0xf0] }
  0x82   :  { %v1439_v24 = vor.u32 %v1782_v14, %v1438_v12 }
  0x83   :  { %1152 = vmatmul.bf16.vlgmr.msrb.gmra.mxu2 %v1327_v15  ;;  %1103 = vmatmul.bf16.vlgmr.msrb.gmra.mxu1 %v1323_v17  ;;  %v1778_v15 = vld [vmem:[%s2603_s0 + $0xf4] sm:$0xf]  ;;  %v1432_v17 = vld [vmem:[%s2603_s0 + $0x10c] sm:$0xf0] }
  0x84   :  { %v1435_v7 = vor.u32 %v1778_v15, %v1432_v17 }
  0x91   :  { %1010 = vmatmul.bf16.gmra.mxu3 %v1343_v25  ;;  %1059 = vmatmul.bf16.gmra.mxu0 %v1347_v26 }
  0x93   :  { %1157 = vmatmul.bf16.gmra.mxu2 %v1355_v27  ;;  %1108 = vmatmul.bf16.gmra.mxu1 %v1351_v28 }
  0x9e   :  { %v2353_v36 = vpop.f32.mrf.mxu0 }
  0xa0   :  { %v918_v38 = vpop.f32.mrf.mxu1 }
  0xa1   :  { %1015 = vmatmul.bf16.gmra.mxu3 %v1371_v35  ;;  %1064 = vmatmul.bf16.gmra.mxu0 %v1375_v16  ;;  %v1466_v35 = vld [vmem:[%s2603_s0 + $0x130] sm:$0xf]  ;;  %v1789_v16 = vld [vmem:[%s2603_s0 + $0x148] sm:$0xf0] }
  0xa2   :  { %v1467_v45 = vor.u32 %v1789_v16, %v1466_v35 }
  0xa3   :  { %1162 = vmatmul.bf16.gmra.mxu2 %v1383_v19  ;;  %1113 = vmatmul.bf16.gmra.mxu1 %v1379_v37  ;;  %v1785_v19 = vld [vmem:[%s2603_s0 + $0x12c] sm:$0xf]  ;;  %v1460_v37 = vld [vmem:[%s2603_s0 + $0x144] sm:$0xf0] }
  0xa4   :  { %v869_v39 = vpop.f32.mrf.mxu3  ;;  %v1463_v46 = vor.u32 %v1785_v19, %v1460_v37 }
  0xa5   :  { %v919_v40 = vadd.f32 %v918_v38, %v869_v39 }
  0xa6   :  { %v967_v41 = vpop.f32.mrf.mxu2  ;;  %v2355_v42 = vpop.f32.mrf.mxu0 }
  0xa7   :  { %v2357_v43 = vadd.f32 %v967_v41, %v919_v40  ;;  %v1455_v41 = vor.u32 %v1784_v10, %v1452_v33  ;;  %v1803_v10 = vld [vmem:[%s2603_s0 + $0x1b8] sm:$0xf0] }
  0xa8   :  { %v920_v44 = vpop.f32.mrf.mxu1  ;;  %v1799_v33 = vld [vmem:[%s2603_s0 + $0x19c] sm:$0xf] }
  0xac   :  { %v871_v52 = vpop.f32.mrf.mxu3 }
  0xad   :  { %v921_v53 = vadd.f32 %v920_v44, %v871_v52  ;;  %v1459_v44 = vor.u32 %v1788_v34, %v1458_v13  ;;  %v1516_v13 = vld [vmem:[%s2603_s0 + $0x1b4] sm:$0xf0] }
  0xae   :  { %v969_v54 = vpop.f32.mrf.mxu2  ;;  %v2383_v57 = vpop.f32.mrf.mxu0 }
  0xaf   :  { %v2385_v60 = vadd.f32 %v969_v54, %v921_v53 }
  0xb0   :  { %v923_v61 = vpop.f32.mrf.mxu1 }
  0xb1   :  { %1020 = vmatmul.bf16.gmra.mxu3 %v1399_v55  ;;  %1069 = vmatmul.bf16.gmra.mxu0 %v1403_v56  ;;  %v1791_v55 = vld [vmem:[%s2603_s0 + $0x15c] sm:$0xf]  ;;  %v1480_v56 = vld [vmem:[%s2603_s0 + $0x174] sm:$0xf0] }
  0xb2   :  { %v1483_v9 = vor.u32 %v1791_v55, %v1480_v56 }
  0xb3   :  { %1167 = vmatmul.bf16.gmra.mxu2 %v1411_v58  ;;  %1118 = vmatmul.bf16.gmra.mxu1 %v1407_v59  ;;  %v1486_v58 = vld [vmem:[%s2603_s0 + $0x160] sm:$0xf]  ;;  %v1795_v59 = vld [vmem:[%s2603_s0 + $0x178] sm:$0xf0] }
  0xb4   :  { %v874_v62 = vpop.f32.mrf.mxu3  ;;  %v1487_v11 = vor.u32 %v1795_v59, %v1486_v58 }
  0xb5   :  { %v924_v63 = vadd.f32 %v923_v61, %v874_v62  ;;  %v1494_v61 = vld [vmem:[%s2603_s0 + $0x168] sm:$0xf]  ;;  %v1796_v62 = vld [vmem:[%s2603_s0 + $0x180] sm:$0xf0] }
  0xb6   :  { %v972_v0 = vpop.f32.mrf.mxu2  ;;  %v2387_v2 = vpop.f32.mrf.mxu0  ;;  %v1495_v14 = vor.u32 %v1796_v62, %v1494_v61 }
  0xb7   :  { %v2389_v3 = vadd.f32 %v972_v0, %v924_v63  ;;  %v1792_v63 = vld [vmem:[%s2603_s0 + $0x164] sm:$0xf]  ;;  %v1488_v0 = vld [vmem:[%s2603_s0 + $0x17c] sm:$0xf0] }
  0xb8   :  { %v925_v5 = vpop.f32.mrf.mxu1  ;;  %v1491_v15 = vor.u32 %v1792_v63, %v1488_v0 }
  0xbc   :  { %v876_v18 = vpop.f32.mrf.mxu3 }
  0xbd   :  { %v926_v20 = vadd.f32 %v925_v5, %v876_v18 }
  0xbe   :  { %v974_v1 = vpop.f32.mrf.mxu2  ;;  %v2415_v4 = vpop.f32.mrf.mxu0 }
  0xbf   :  { %v2417_v25 = vadd.f32 %v974_v1, %v926_v20  ;;  %v909_v62 = vadd.f32 %v2415_v4, %v2353_v36 }
  0xc0   :  { %v928_v26 = vpop.f32.mrf.mxu1 }
  0xc1   :  { %1025 = vmatmul.bf16.gmra.mxu3 %v1427_v21  ;;  %1074 = vmatmul.bf16.gmra.mxu0 %v1431_v23 }
  0xc3   :  { %1172 = vmatmul.bf16.gmra.mxu2 %v1439_v24  ;;  %1123 = vmatmul.bf16.gmra.mxu1 %v1435_v7 }
  0xc4   :  { %v879_v27 = vpop.f32.mrf.mxu3 }
  0xc5   :  { %v929_v28 = vadd.f32 %v928_v26, %v879_v27  ;;  %v1798_v26 = vld [vmem:[%s2603_s0 + $0x194] sm:$0xf]  ;;  %v1508_v27 = vld [vmem:[%s2603_s0 + $0x1ac] sm:$0xf0] }
  0xc6   :  { %v977_v29 = vpop.f32.mrf.mxu2  ;;  %v2419_v30 = vpop.f32.mrf.mxu0  ;;  %v1511_v19 = vor.u32 %v1798_v26, %v1508_v27 }
  0xc7   :  { %v2421_v31 = vadd.f32 %v977_v29, %v929_v28  ;;  %v1514_v28 = vld [vmem:[%s2603_s0 + $0x198] sm:$0xf]  ;;  %v1802_v29 = vld [vmem:[%s2603_s0 + $0x1b0] sm:$0xf0] }
  0xc8   :  { %v930_v32 = vpop.f32.mrf.mxu1  ;;  %v1515_v37 = vor.u32 %v1802_v29, %v1514_v28 }
  0xcc   :  { %v881_v38 = vpop.f32.mrf.mxu3 }
  0xcd   :  { %v931_v39 = vadd.f32 %v930_v32, %v881_v38  ;;  %v1522_v32 = vld [vmem:[%s2603_s0 + $0x1a0] sm:$0xf] }
  0xce   :  { %v979_v40 = vpop.f32.mrf.mxu2  ;;  %v2447_v22 = vpop.f32.mrf.mxu0 }
  0xcf   :  { %v2449_v47 = vadd.f32 %v979_v40, %v931_v39  ;;  %v1523_v39 = vor.u32 %v1803_v10, %v1522_v32  ;;  %v1519_v40 = vor.u32 %v1799_v33, %v1516_v13 }
  0xd0   :  { %v933_v48 = vpop.f32.mrf.mxu1 }
  0xd1   :  { %1030 = vmatmul.bf16.gmra.mxu3 %v1455_v41  ;;  %1079 = vmatmul.bf16.gmra.mxu0 %v1459_v44 }
  0xd3   :  { %1177 = vmatmul.bf16.gmra.mxu2 %v1467_v45  ;;  %1128 = vmatmul.bf16.gmra.mxu1 %v1463_v46 }
  0xd4   :  { %v884_v49 = vpop.f32.mrf.mxu3 }
  0xd5   :  { %v934_v50 = vadd.f32 %v933_v48, %v884_v49 }
  0xd6   :  { %v982_v51 = vpop.f32.mrf.mxu2  ;;  %v2451_v52 = vpop.f32.mrf.mxu0 }
  0xd7   :  { %v2453_v53 = vadd.f32 %v982_v51, %v934_v50 }
  0xd8   :  { %v935_v54 = vpop.f32.mrf.mxu1 }
  0xdc   :  { %v886_v5 = vpop.f32.mrf.mxu3 }
  0xdd   :  { %v936_v6 = vadd.f32 %v935_v54, %v886_v5 }
  0xde   :  { %v984_v8 = vpop.f32.mrf.mxu2  ;;  %v957_v12 = vpop.f32.mrf.mxu0 }
  0xdf   :  { %v2479_v17 = vadd.f32 %v984_v8, %v936_v6  ;;  %v958_v63 = vadd.f32 %v957_v12, %v909_v62 }
  0xe0   :  { %v938_v18 = vpop.f32.mrf.mxu1 }
  0xe1   :  { %1035 = vmatmul.bf16.gmra.mxu3 %v1483_v9  ;;  %1084 = vmatmul.bf16.gmra.mxu0 %v1487_v11 }
  0xe3   :  { %1182 = vmatmul.bf16.gmra.mxu2 %v1495_v14  ;;  %1133 = vmatmul.bf16.gmra.mxu1 %v1491_v15  ;;  %v911_v14 = vadd.f32 %v2419_v30, %v2355_v42  ;;  %v914_v42 = vadd.f32 %v2447_v22, %v2383_v57 }
  0xe4   :  { %v889_v20 = vpop.f32.mrf.mxu3 }
  0xe5   :  { %v939_v1 = vadd.f32 %v938_v18, %v889_v20  ;;  %v2520_v18 = vld [vmem:[%s2604_s2] ss:$0 sm:$0xff] }
  0xe6   :  { %v987_v21 = vpop.f32.mrf.mxu2  ;;  %v959_v23 = vpop.f32.mrf.mxu0 }
  0xe7   :  { %v2481_v24 = vadd.f32 %v987_v21, %v939_v1  ;;  %v960_v20 = vadd.f32 %v959_v23, %v911_v14 }
  0xe8   :  { %v940_v7 = vpop.f32.mrf.mxu1 }
  0xec   :  { %v891_v34 = vpop.f32.mrf.mxu3 }
  0xed   :  { %v941_v35 = vadd.f32 %v940_v7, %v891_v34 }
  0xee   :  { %v989_v16 = vpop.f32.mrf.mxu2  ;;  %v962_v38 = vpop.f32.mrf.mxu0 }
  0xef   :  { %v2507_v41 = vadd.f32 %v989_v16, %v941_v35  ;;  %v963_v29 = vadd.f32 %v962_v38, %v914_v42 }
  0xf0   :  { %v943_v44 = vpop.f32.mrf.mxu1 }
  0xf1   :  { %1040 = vmatmul.bf16.gmra.mxu3 %v1511_v19  ;;  %1089 = vmatmul.bf16.gmra.mxu0 %v1515_v37  ;;  %v916_v37 = vadd.f32 %v2451_v52, %v2387_v2 }
  0xf3   :  { %1187 = vmatmul.bf16.gmra.mxu2 %v1523_v39  ;;  %1138 = vmatmul.bf16.gmra.mxu1 %v1519_v40 }
  0xf4   :  { %v894_v45 = vpop.f32.mrf.mxu3 }
  0xf5   :  { %v944_v46 = vadd.f32 %v943_v44, %v894_v45 }
  0xf6   :  { %v992_v48 = vpop.f32.mrf.mxu2  ;;  %v964_v49 = vpop.f32.mrf.mxu0 }
  0xf7   :  { %v2509_v50 = vadd.f32 %v992_v48, %v944_v46  ;;  %v965_v22 = vadd.f32 %v964_v49, %v916_v37 }
  0xf8   :  { %v945_v51 = vpop.f32.mrf.mxu1 }
  0xfc   :  { %v896_v54 = vpop.f32.mrf.mxu3 }
  0xfd   :  { %v946_v55 = vadd.f32 %v945_v51, %v896_v54 }
  0xfe   :  { %v994_v56 = vpop.f32.mrf.mxu2  ;;  %v1055_v58 = vpop.f32.mrf.mxu0 }
  0xff   :  { %v2511_v59 = vadd.f32 %v994_v56, %v946_v55 }
 0x100   :  { %v1104_v61 = vpop.f32.mrf.mxu1 }
 0x104   :  { %v1006_v0 = vpop.f32.mrf.mxu3 }
 0x105   :  { %v1007_v5 = vadd.f32 %v1006_v0, %v958_v63 }
 0x106   :  { %v1153_v6 = vpop.f32.mrf.mxu2  ;;  %v1057_v8 = vpop.f32.mrf.mxu0 }
 0x107   :  { %v1056_v9 = vadd.f32 %v1055_v58, %v1007_v5 }
 0x108   :  { %v1106_v11 = vpop.f32.mrf.mxu1 }
 0x109   :  { %v1105_v15 = vadd.f32 %v1104_v61, %v1056_v9 }
 0x10b   :  { %v1154_v1 = vadd.f32 %v1153_v6, %v1105_v15 }
 0x10c   :  { %v1008_v21 = vpop.f32.mrf.mxu3 }
 0x10d   :  { %v1248_v36 = vadd.f32 %v2520_v18, %v1154_v1  ;;  %v1009_v4 = vadd.f32 %v1008_v21, %v960_v20 }
 0x10e   :  { %v1155_v12 = vpop.f32.mrf.mxu2  ;;  %v1060_v7 = vpop.f32.mrf.mxu0 }
 0x10f   :  { %v1264_v26 = vmax.f32 %v1248_v36, 0.0  ;;  %v1058_v27 = vadd.f32 %v1057_v8, %v1009_v4 }
 0x110   :  { %v1109_v28 = vpop.f32.mrf.mxu1 }
 0x111   :  { %1280 = vst [vmem:[%s2605_s3] sm:$0xff] %v1264_v26  ;;  %v1107_v30 = vadd.f32 %v1106_v11, %v1058_v27 }
 0x113   :  { %v1156_v23 = vadd.f32 %v1155_v12, %v1107_v30 }
 0x114   :  { %v1011_v32 = vpop.f32.mrf.mxu3 }
 0x115   :  { %v1249_v10 = vadd.f32 %v2520_v18, %v1156_v23  ;;  %v1012_v33 = vadd.f32 %v1011_v32, %v963_v29 }
 0x116   :  { %v1158_v13 = vpop.f32.mrf.mxu2  ;;  %v1062_v34 = vpop.f32.mrf.mxu0 }
 0x117   :  { %v1265_v35 = vmax.f32 %v1249_v10, 0.0  ;;  %v1061_v16 = vadd.f32 %v1060_v7, %v1012_v33 }
 0x118   :  { %v1111_v19 = vpop.f32.mrf.mxu1 }
 0x119   :  { %1281 = vst [vmem:[%s2605_s3 + $0x8] sm:$0xff] %v1265_v35  ;;  %v1110_v57 = vadd.f32 %v1109_v28, %v1061_v16 }
 0x11b   :  { %v1159_v38 = vadd.f32 %v1158_v13, %v1110_v57 }
 0x11c   :  { %v1013_v39 = vpop.f32.mrf.mxu3 }
 0x11d   :  { %v1250_v40 = vadd.f32 %v2520_v18, %v1159_v38  ;;  %v1014_v44 = vadd.f32 %v1013_v39, %v965_v22 }
 0x11e   :  { %v1160_v45 = vpop.f32.mrf.mxu2  ;;  %v1065_v46 = vpop.f32.mrf.mxu0 }
 0x11f   :  { %v1266_v48 = vmax.f32 %v1250_v40, 0.0  ;;  %v1063_v51 = vadd.f32 %v1062_v34, %v1014_v44 }
 0x120   :  { %v1114_v54 = vpop.f32.mrf.mxu1 }
 0x121   :  { %1282 = vst [vmem:[%s2605_s3 + $0x10] sm:$0xff] %v1266_v48  ;;  %v1112_v2 = vadd.f32 %v1111_v19, %v1063_v51 }
 0x123   :  { %v1161_v52 = vadd.f32 %v1160_v45, %v1112_v2 }
 0x124   :  { %v1016_v55 = vpop.f32.mrf.mxu3 }
 0x125   :  { %v1251_v56 = vadd.f32 %v2520_v18, %v1161_v52  ;;  %v1017_v49 = vadd.f32 %v1016_v55, %v2357_v43 }
 0x126   :  { %v1163_v58 = vpop.f32.mrf.mxu2  ;;  %v1067_v61 = vpop.f32.mrf.mxu0 }
 0x127   :  { %v1267_v62 = vmax.f32 %v1251_v56, 0.0  ;;  %v1066_v63 = vadd.f32 %v1065_v46, %v1017_v49 }
 0x128   :  { %v1116_v0 = vpop.f32.mrf.mxu1 }
 0x129   :  { %1283 = vst [vmem:[%s2605_s3 + $0x18] sm:$0xff] %v1267_v62  ;;  %v1115_v5 = vadd.f32 %v1114_v54, %v1066_v63 }
 0x12b   :  { %v1164_v6 = vadd.f32 %v1163_v58, %v1115_v5 }
 0x12c   :  { %v1018_v8 = vpop.f32.mrf.mxu3 }
 0x12d   :  { %v1252_v9 = vadd.f32 %v2520_v18, %v1164_v6  ;;  %v1019_v11 = vadd.f32 %v1018_v8, %v2385_v60 }
 0x12e   :  { %v1165_v14 = vpop.f32.mrf.mxu2  ;;  %v1070_v15 = vpop.f32.mrf.mxu0 }
 0x12f   :  { %v1268_v20 = vmax.f32 %v1252_v9, 0.0  ;;  %v1068_v43 = vadd.f32 %v1067_v61, %v1019_v11 }
 0x130   :  { %v1119_v1 = vpop.f32.mrf.mxu1 }
 0x131   :  { %1284 = vst [vmem:[%s2605_s3 + $0x20] sm:$0xff] %v1268_v20  ;;  %v1117_v21 = vadd.f32 %v1116_v0, %v1068_v43 }
 0x133   :  { %v1166_v36 = vadd.f32 %v1165_v14, %v1117_v21 }
 0x134   :  { %v1021_v4 = vpop.f32.mrf.mxu3 }
 0x135   :  { %v1253_v12 = vadd.f32 %v2520_v18, %v1166_v36  ;;  %v1022_v7 = vadd.f32 %v1021_v4, %v2389_v3 }
 0x136   :  { %v1168_v26 = vpop.f32.mrf.mxu2  ;;  %v1072_v27 = vpop.f32.mrf.mxu0 }
 0x137   :  { %v1269_v28 = vmax.f32 %v1253_v12, 0.0  ;;  %v1071_v60 = vadd.f32 %v1070_v15, %v1022_v7 }
 0x138   :  { %v1121_v42 = vpop.f32.mrf.mxu1 }
 0x139   :  { %1285 = vst [vmem:[%s2605_s3 + $0x28] sm:$0xff] %v1269_v28  ;;  %v1120_v30 = vadd.f32 %v1119_v1, %v1071_v60 }
 0x13b   :  { %v1169_v29 = vadd.f32 %v1168_v26, %v1120_v30 }
 0x13c   :  { %v1023_v23 = vpop.f32.mrf.mxu3 }
 0x13d   :  { %v1254_v32 = vadd.f32 %v2520_v18, %v1169_v29  ;;  %v1024_v10 = vadd.f32 %v1023_v23, %v2417_v25 }
 0x13e   :  { %v1170_v33 = vpop.f32.mrf.mxu2  ;;  %v1075_v13 = vpop.f32.mrf.mxu0 }
 0x13f   :  { %v1270_v34 = vmax.f32 %v1254_v32, 0.0  ;;  %v1073_v3 = vadd.f32 %v1072_v27, %v1024_v10 }
 0x140   :  { %v1124_v35 = vpop.f32.mrf.mxu1 }
 0x141   :  { %1286 = vst [vmem:[%s2605_s3 + $0x30] sm:$0xff] %v1270_v34  ;;  %v1122_v16 = vadd.f32 %v1121_v42, %v1073_v3 }
 0x143   :  { %v1171_v19 = vadd.f32 %v1170_v33, %v1122_v16 }
 0x144   :  { %v1026_v37 = vpop.f32.mrf.mxu3 }
 0x145   :  { %v1255_v57 = vadd.f32 %v2520_v18, %v1171_v19  ;;  %v1027_v22 = vadd.f32 %v1026_v37, %v2421_v31 }
 0x146   :  { %v1173_v38 = vpop.f32.mrf.mxu2  ;;  %v1077_v39 = vpop.f32.mrf.mxu0 }
 0x147   :  { %v1271_v40 = vmax.f32 %v1255_v57, 0.0  ;;  %v1076_v25 = vadd.f32 %v1075_v13, %v1027_v22 }
 0x148   :  { %v1126_v44 = vpop.f32.mrf.mxu1 }
 0x149   :  { %1287 = vst [vmem:[%s2605_s3 + $0x38] sm:$0xff] %v1271_v40  ;;  %v1125_v45 = vadd.f32 %v1124_v35, %v1076_v25 }
 0x14b   :  { %v1174_v46 = vadd.f32 %v1173_v38, %v1125_v45 }
 0x14c   :  { %v1028_v48 = vpop.f32.mrf.mxu3 }
 0x14d   :  { %v1256_v51 = vadd.f32 %v2520_v18, %v1174_v46  ;;  %v1029_v54 = vadd.f32 %v1028_v48, %v2449_v47 }
 0x14e   :  { %v1175_v2 = vpop.f32.mrf.mxu2  ;;  %v1080_v52 = vpop.f32.mrf.mxu0 }
 0x14f   :  { %v1272_v55 = vmax.f32 %v1256_v51, 0.0  ;;  %v1078_v31 = vadd.f32 %v1077_v39, %v1029_v54 }
 0x150   :  { %v1129_v56 = vpop.f32.mrf.mxu1 }
 0x151   :  { %1288 = vst [vmem:[%s2605_s3 + $0x40] sm:$0xff] %v1272_v55  ;;  %v1127_v49 = vadd.f32 %v1126_v44, %v1078_v31 }
 0x153   :  { %v1176_v58 = vadd.f32 %v1175_v2, %v1127_v49 }
 0x154   :  { %v1031_v61 = vpop.f32.mrf.mxu3 }
 0x155   :  { %v1257_v62 = vadd.f32 %v2520_v18, %v1176_v58  ;;  %v1032_v63 = vadd.f32 %v1031_v61, %v2453_v53 }
 0x156   :  { %v1178_v0 = vpop.f32.mrf.mxu2  ;;  %v1082_v5 = vpop.f32.mrf.mxu0 }
 0x157   :  { %v1273_v6 = vmax.f32 %v1257_v62, 0.0  ;;  %v1081_v47 = vadd.f32 %v1080_v52, %v1032_v63 }
 0x158   :  { %v1131_v8 = vpop.f32.mrf.mxu1 }
 0x159   :  { %1289 = vst [vmem:[%s2605_s3 + $0x48] sm:$0xff] %v1273_v6  ;;  %v1130_v9 = vadd.f32 %v1129_v56, %v1081_v47 }
 0x15b   :  { %v1179_v11 = vadd.f32 %v1178_v0, %v1130_v9 }
 0x15c   :  { %v1033_v14 = vpop.f32.mrf.mxu3 }
 0x15d   :  { %v1258_v15 = vadd.f32 %v2520_v18, %v1179_v11  ;;  %v1034_v20 = vadd.f32 %v1033_v14, %v2479_v17 }
 0x15e   :  { %v1180_v43 = vpop.f32.mrf.mxu2  ;;  %v1085_v53 = vpop.f32.mrf.mxu0 }
 0x15f   :  { %v1274_v1 = vmax.f32 %v1258_v15, 0.0  ;;  %v1083_v21 = vadd.f32 %v1082_v5, %v1034_v20 }
 0x160   :  { %v1134_v4 = vpop.f32.mrf.mxu1 }
 0x161   :  { %1290 = vst [vmem:[%s2605_s3 + $0x50] sm:$0xff] %v1274_v1  ;;  %v1132_v36 = vadd.f32 %v1131_v8, %v1083_v21 }
 0x163   :  { %v1181_v12 = vadd.f32 %v1180_v43, %v1132_v36 }
 0x164   :  { %v1036_v7 = vpop.f32.mrf.mxu3 }
 0x165   :  { %v1259_v26 = vadd.f32 %v2520_v18, %v1181_v12  ;;  %v1037_v27 = vadd.f32 %v1036_v7, %v2481_v24 }
 0x166   :  { %v1183_v28 = vpop.f32.mrf.mxu2  ;;  %v1087_v30 = vpop.f32.mrf.mxu0 }
 0x167   :  { %v1275_v60 = vmax.f32 %v1259_v26, 0.0  ;;  %v1086_v42 = vadd.f32 %v1085_v53, %v1037_v27 }
 0x168   :  { %v1136_v23 = vpop.f32.mrf.mxu1 }
 0x169   :  { %1291 = vst [vmem:[%s2605_s3 + $0x58] sm:$0xff] %v1275_v60  ;;  %v1135_v17 = vadd.f32 %v1134_v4, %v1086_v42 }
 0x16b   :  { %v1184_v29 = vadd.f32 %v1183_v28, %v1135_v17 }
 0x16c   :  { %v1038_v32 = vpop.f32.mrf.mxu3 }
 0x16d   :  { %v1260_v10 = vadd.f32 %v2520_v18, %v1184_v29  ;;  %v1039_v33 = vadd.f32 %v1038_v32, %v2507_v41 }
 0x16e   :  { %v1185_v13 = vpop.f32.mrf.mxu2  ;;  %v1090_v16 = vpop.f32.mrf.mxu0 }
 0x16f   :  { %v1276_v34 = vmax.f32 %v1260_v10, 0.0  ;;  %v1088_v3 = vadd.f32 %v1087_v30, %v1039_v33 }
 0x170   :  { %v1139_v22 = vpop.f32.mrf.mxu1 }
 0x171   :  { %1292 = vst [vmem:[%s2605_s3 + $0x60] sm:$0xff] %v1276_v34  ;;  %v1137_v24 = vadd.f32 %v1136_v23, %v1088_v3 }
 0x173   :  { %v1186_v35 = vadd.f32 %v1185_v13, %v1137_v24 }
 0x174   :  { %v1041_v19 = vpop.f32.mrf.mxu3 }
 0x175   :  { %v1261_v37 = vadd.f32 %v2520_v18, %v1186_v35  ;;  %v1042_v57 = vadd.f32 %v1041_v19, %v2509_v50 }
 0x176   :  { %v1188_v40 = vpop.f32.mrf.mxu2  ;;  %v1092_v48 = vpop.f32.mrf.mxu0 }
 0x177   :  { %v1277_v38 = vmax.f32 %v1261_v37, 0.0  ;;  %v1091_v39 = vadd.f32 %v1090_v16, %v1042_v57 }
 0x178   :  { %v1141_v2 = vpop.f32.mrf.mxu1 }
 0x179   :  { %1293 = vst [vmem:[%s2605_s3 + $0x68] sm:$0xff] %v1277_v38  ;;  %v1140_v41 = vadd.f32 %v1139_v22, %v1091_v39 }
 0x17b   :  { %v1189_v25 = vadd.f32 %v1188_v40, %v1140_v41 }
 0x17c   :  { %v1043_v44 = vpop.f32.mrf.mxu3 }
 0x17d   :  { %v1262_v45 = vadd.f32 %v2520_v18, %v1189_v25  ;;  %v1044_v46 = vadd.f32 %v1043_v44, %v2511_v59 }
 0x17e   :  { %v1190_v52 = vpop.f32.mrf.mxu2 }
 0x17f   :  { %v1278_v51 = vmax.f32 %v1262_v45, 0.0  ;;  %v1093_v54 = vadd.f32 %v1092_v48, %v1044_v46 }
 0x181   :  { %1294 = vst [vmem:[%s2605_s3 + $0x70] sm:$0xff] %v1278_v51  ;;  %v1142_v50 = vadd.f32 %v1141_v2, %v1093_v54 }
 0x183   :  { %v1191_v55 = vadd.f32 %v1190_v52, %v1142_v50 }
 0x185   :  { %v1263_v31 = vadd.f32 %v2520_v18, %v1191_v55 }
 0x187   :  { %v1279_v56 = vmax.f32 %v1263_v31, 0.0 }
 0x189   :  { %1295 = vst [vmem:[%s2605_s3 + $0x78] sm:$0xff] %v1279_v56 }

// kernel: cnn_forward.13
= control target key start
LH: loop header
LB: loop body
LE: loop exit
PB: predicated region body
PF: predicated region fallthrough
CT: control target
= control target key end

     0   :  { %s114_s0 = inlined_call_operand.vmem [shape: f32[8,2048], index: 0, kind: input, shape index: {}]   ;;  %s115_s1 = inlined_call_operand.vmem [shape: f32[8,512], index: 1, kind: output, shape index: {}]  }
   0x1   :  { %v8_v0 = vld [vmem:[%s114_s0] sm:$0xff]  ;;  %v9_v1 = vld [vmem:[%s114_s0 + $0x8] sm:$0xff]  ;;  %v10_v5 = vld [vmem:[%s114_s0 + $0x10] sm:$0xff] }
   0x2   :  { %v16_v2 = vld [vmem:[%s114_s0 + $0x40] sm:$0xff]  ;;  %v17_v3 = vld [vmem:[%s114_s0 + $0x48] sm:$0xff]  ;;  %v11_v6 = vld [vmem:[%s114_s0 + $0x18] sm:$0xff] }
   0x3   :  { %v24_v4 = vmax.f32 %v8_v0, %v16_v2  ;;  %v25_v7 = vmax.f32 %v9_v1, %v17_v3  ;;  %v18_v8 = vld [vmem:[%s114_s0 + $0x50] sm:$0xff]  ;;  %v19_v9 = vld [vmem:[%s114_s0 + $0x58] sm:$0xff]  ;;  %v12_v10 = vld [vmem:[%s114_s0 + $0x20] sm:$0xff] }
   0x4   :  { %v26_v11 = vmax.f32 %v10_v5, %v18_v8  ;;  %v27_v12 = vmax.f32 %v11_v6, %v19_v9  ;;  %v13_v13 = vld [vmem:[%s114_s0 + $0x28] sm:$0xff]  ;;  %v20_v14 = vld [vmem:[%s114_s0 + $0x60] sm:$0xff]  ;;  %v14_v19 = vld [vmem:[%s114_s0 + $0x30] sm:$0xff] }
   0x5   :  { %v21_v15 = vld [vmem:[%s114_s0 + $0x68] sm:$0xff]  ;;  %v32_v16 = vmax.f32 %v24_v4, %v25_v7  ;;  %v28_v17 = vmax.f32 %v12_v10, %v20_v14  ;;  %v15_v20 = vld [vmem:[%s114_s0 + $0x38] sm:$0xff]  ;;  %v22_v21 = vld [vmem:[%s114_s0 + $0x70] sm:$0xff] }
   0x6   :  { %v29_v18 = vmax.f32 %v13_v13, %v21_v15  ;;  %v34_v22 = vmax.f32 %v26_v11, %v27_v12  ;;  %v23_v23 = vld [vmem:[%s114_s0 + $0x78] sm:$0xff]  ;;  %v30_v24 = vmax.f32 %v14_v19, %v22_v21 }
   0x7   :  { %33 = vst [vmem:[%s115_s1] sm:$0xff] %v32_v16  ;;  %v31_v26 = vmax.f32 %v15_v20, %v23_v23 }
   0x8   :  { %v36_v25 = vmax.f32 %v28_v17, %v29_v18  ;;  %35 = vst [vmem:[%s115_s1 + $0x8] sm:$0xff] %v34_v22 }
   0x9   :  { %v38_v27 = vmax.f32 %v30_v24, %v31_v26 }
   0xa   :  { %37 = vst [vmem:[%s115_s1 + $0x10] sm:$0xff] %v36_v25 }
   0xb   :  { %39 = vst [vmem:[%s115_s1 + $0x18] sm:$0xff] %v38_v27 }

// kernel: cnn_forward.14
= control target key start
LH: loop header
LB: loop body
LE: loop exit
PB: predicated region body
PF: predicated region fallthrough
CT: control target
= control target key end

     0   :  { %s1014_s1 = inlined_call_operand.vmem [shape: bf16[640,128], index: 1, kind: input, shape index: {}]   ;;  %s1015_s0 = inlined_call_operand.vmem [shape: bf16[32,640], index: 0, kind: input, shape index: {}]   ;;  %s1016_s2 = inlined_call_operand.vmem [shape: f32[1,128], index: 2, kind: input, shape index: {}]   ;;  %s1017_s3 = inlined_call_operand.vmem [shape: f32[32,128], index: 3, kind: output, shape index: {}]  }
   0x1   :  { %v757_v0 = vld [vmem:[%s1014_s1 + $0x38] sm:$0xff]  ;;  %v756_v4 = vld [vmem:[%s1014_s1 + $0x30] sm:$0xff]  ;;  %v755_v8 = vld [vmem:[%s1014_s1 + $0x28] sm:$0xff] }
   0x2   :  { %v765_v1 = vld [vmem:[%s1014_s1 + $0x78] sm:$0xff]  ;;  %410 = vmatpush.bf16.msra.mxu0 %v757_v0  ;;  %v764_v5 = vld [vmem:[%s1014_s1 + $0x70] sm:$0xff]  ;;  %v763_v9 = vld [vmem:[%s1014_s1 + $0x68] sm:$0xff] }
   0x3   :  { %v773_v2 = vld [vmem:[%s1014_s1 + $0xb8] sm:$0xff]  ;;  %429 = vmatpush.bf16.msra.mxu1 %v765_v1  ;;  %v772_v6 = vld [vmem:[%s1014_s1 + $0xb0] sm:$0xff]  ;;  %v771_v10 = vld [vmem:[%s1014_s1 + $0xa8] sm:$0xff] }
   0x4   :  { %v781_v3 = vld [vmem:[%s1014_s1 + $0xf8] sm:$0xff]  ;;  %448 = vmatpush.bf16.msra.mxu2 %v773_v2  ;;  %v780_v7 = vld [vmem:[%s1014_s1 + $0xf0] sm:$0xff]  ;;  %v779_v11 = vld [vmem:[%s1014_s1 + $0xe8] sm:$0xff] }
   0x5   :  { %467 = vmatpush.bf16.msra.mxu3 %v781_v3  ;;  %v754_v12 = vld [vmem:[%s1014_s1 + $0x20] sm:$0xff]  ;;  %v753_v16 = vld [vmem:[%s1014_s1 + $0x18] sm:$0xff]  ;;  %v752_v20 = vld [vmem:[%s1014_s1 + $0x10] sm:$0xff] }
   0x6   :  { %411 = vmatpush.bf16.msra.mxu0 %v756_v4  ;;  %v762_v13 = vld [vmem:[%s1014_s1 + $0x60] sm:$0xff]  ;;  %v761_v17 = vld [vmem:[%s1014_s1 + $0x58] sm:$0xff]  ;;  %v760_v21 = vld [vmem:[%s1014_s1 + $0x50] sm:$0xff] }
   0x7   :  { %430 = vmatpush.bf16.msra.mxu1 %v764_v5  ;;  %v770_v14 = vld [vmem:[%s1014_s1 + $0xa0] sm:$0xff]  ;;  %v769_v18 = vld [vmem:[%s1014_s1 + $0x98] sm:$0xff]  ;;  %v768_v22 = vld [vmem:[%s1014_s1 + $0x90] sm:$0xff] }
   0x8   :  { %449 = vmatpush.bf16.msra.mxu2 %v772_v6  ;;  %v778_v15 = vld [vmem:[%s1014_s1 + $0xe0] sm:$0xff]  ;;  %v777_v19 = vld [vmem:[%s1014_s1 + $0xd8] sm:$0xff]  ;;  %v776_v23 = vld [vmem:[%s1014_s1 + $0xd0] sm:$0xff] }
   0x9   :  { %468 = vmatpush.bf16.msra.mxu3 %v780_v7  ;;  %v751_v24 = vld [vmem:[%s1014_s1 + $0x8] sm:$0xff]  ;;  %v750_v28 = vld [vmem:[%s1014_s1] sm:$0xff]  ;;  %v742_v33 = vld [vmem:[%s1015_s0 + $0x10] sm:$0xf0] }
   0xa   :  { %412 = vmatpush.bf16.msra.mxu0 %v755_v8  ;;  %v759_v25 = vld [vmem:[%s1014_s1 + $0x48] sm:$0xff]  ;;  %v758_v29 = vld [vmem:[%s1014_s1 + $0x40] sm:$0xff]  ;;  %v544_v35 = vld [vmem:[%s1015_s0 + $0x14] sm:$0xf0] }
   0xb   :  { %431 = vmatpush.bf16.msra.mxu1 %v763_v9  ;;  %v767_v26 = vld [vmem:[%s1014_s1 + $0x88] sm:$0xff]  ;;  %v766_v30 = vld [vmem:[%s1014_s1 + $0x80] sm:$0xff]  ;;  %v743_v37 = vld [vmem:[%s1015_s0 + $0x18] sm:$0xf0] }
   0xc   :  { %450 = vmatpush.bf16.msra.mxu2 %v771_v10  ;;  %v775_v27 = vld [vmem:[%s1014_s1 + $0xc8] sm:$0xff]  ;;  %v774_v31 = vld [vmem:[%s1014_s1 + $0xc0] sm:$0xff]  ;;  %v789_v40 = vld [vmem:[%s1014_s1 + $0x138] sm:$0xff] }
   0xd   :  { %469 = vmatpush.bf16.msra.mxu3 %v779_v11  ;;  %v542_v32 = vld [vmem:[%s1015_s0] sm:$0xf]  ;;  %v740_v34 = vld [vmem:[%s1015_s0 + $0x4] sm:$0xf]  ;;  %v550_v36 = vld [vmem:[%s1015_s0 + $0x8] sm:$0xf] }
   0xe   :  { %413 = vmatpush.bf16.msra.mxu0 %v754_v12  ;;  %v741_v38 = vld [vmem:[%s1015_s0 + $0xc] sm:$0xf]  ;;  %v552_v39 = vld [vmem:[%s1015_s0 + $0x1c] sm:$0xf0]  ;;  %v543_v41 = vor.u32 %v742_v33, %v542_v32  ;;  %v547_v42 = vor.u32 %v740_v34, %v544_v35  ;;  %v551_v43 = vor.u32 %v743_v37, %v550_v36  ;;  %v788_v45 = vld [vmem:[%s1014_s1 + $0x130] sm:$0xff] }
   0xf   :  { %432 = vmatpush.bf16.msra.mxu1 %v762_v13  ;;  %v555_v44 = vor.u32 %v741_v38, %v552_v39  ;;  %v787_v46 = vld [vmem:[%s1014_s1 + $0x128] sm:$0xff]  ;;  %v786_v47 = vld [vmem:[%s1014_s1 + $0x120] sm:$0xff]  ;;  %v747_v49 = vld [vmem:[%s1015_s0 + $0x38] sm:$0xf0] }
  0x10   :  { %451 = vmatpush.bf16.msra.mxu2 %v770_v14  ;;  %v562_v48 = vld [vmem:[%s1015_s0 + $0x28] sm:$0xf]  ;;  %v745_v50 = vld [vmem:[%s1015_s0 + $0x2c] sm:$0xf]  ;;  %v564_v51 = vld [vmem:[%s1015_s0 + $0x3c] sm:$0xf0] }
  0x11   :  { %470 = vmatpush.bf16.msra.mxu3 %v778_v15  ;;  %v570_v52 = vld [vmem:[%s1015_s0 + $0x30] sm:$0xf]  ;;  %v748_v53 = vld [vmem:[%s1015_s0 + $0x40] sm:$0xf0]  ;;  %v746_v54 = vld [vmem:[%s1015_s0 + $0x34] sm:$0xf]  ;;  %v563_v57 = vor.u32 %v747_v49, %v562_v48  ;;  %v567_v58 = vor.u32 %v745_v50, %v564_v51 }
  0x12   :  { %414 = vmatpush.bf16.msra.mxu0 %v753_v16  ;;  %v572_v55 = vld [vmem:[%s1015_s0 + $0x44] sm:$0xf0]  ;;  %v785_v56 = vld [vmem:[%s1014_s1 + $0x118] sm:$0xff]  ;;  %v571_v59 = vor.u32 %v748_v53, %v570_v52  ;;  %v784_v61 = vld [vmem:[%s1014_s1 + $0x110] sm:$0xff] }
  0x13   :  { %433 = vmatpush.bf16.msra.mxu1 %v761_v17  ;;  %v575_v60 = vor.u32 %v746_v54, %v572_v55  ;;  %v783_v62 = vld [vmem:[%s1014_s1 + $0x108] sm:$0xff]  ;;  %v782_v63 = vld [vmem:[%s1014_s1 + $0x100] sm:$0xff]  ;;  %v558_v0 = vld [vmem:[%s1015_s0 + $0x10] sm:$0xf] }
  0x14   :  { %452 = vmatpush.bf16.msra.mxu2 %v769_v18  ;;  %v744_v1 = vld [vmem:[%s1015_s0 + $0x20] sm:$0xf0]  ;;  %v578_v2 = vld [vmem:[%s1015_s0 + $0x38] sm:$0xf]  ;;  %v749_v3 = vld [vmem:[%s1015_s0 + $0x48] sm:$0xf0] }
  0x15   :  { %471 = vmatpush.bf16.msra.mxu3 %v777_v19  ;;  %v559_v4 = vor.u32 %v744_v1, %v558_v0  ;;  %v579_v5 = vor.u32 %v749_v3, %v578_v2 }
  0x16   :  { %415 = vmatpush.bf16.msra.mxu0 %v752_v20 }
  0x17   :  { %434 = vmatpush.bf16.msra.mxu1 %v760_v21 }
  0x18   :  { %453 = vmatpush.bf16.msra.mxu2 %v768_v22 }
  0x19   :  { %472 = vmatpush.bf16.msra.mxu3 %v776_v23 }
  0x1a   :  { %416 = vmatpush.bf16.msra.mxu0 %v751_v24 }
  0x1b   :  { %435 = vmatpush.bf16.msra.mxu1 %v759_v25 }
  0x1c   :  { %454 = vmatpush.bf16.msra.mxu2 %v767_v26 }
  0x1d   :  { %473 = vmatpush.bf16.msra.mxu3 %v775_v27  ;;  %v798_v27 = vld [vmem:[%s1016_s2] ss:$0 sm:$0xff] }
  0x1e   :  { %417 = vmatpush.bf16.msra.mxu0 %v750_v28 }
  0x1f   :  { %436 = vmatpush.bf16.msra.mxu1 %v758_v29 }
  0x20   :  { %455 = vmatpush.bf16.msra.mxu2 %v766_v30 }
  0x21   :  { %474 = vmatpush.bf16.msra.mxu3 %v774_v31  ;;  %418 = vmatmul.bf16.vlgmr.msra.gmra.mxu0 %v543_v41 }
  0x22   :  { %486 = vmatpush.bf16.msrb.mxu0 %v789_v40  ;;  %437 = vmatmul.bf16.vlgmr.msra.gmra.mxu1 %v547_v42 }
  0x23   :  { %790 = vmatpush.bf16.msrb.mxu1 %v789_v40  ;;  %456 = vmatmul.bf16.vlgmr.msra.gmra.mxu2 %v551_v43 }
  0x24   :  { %475 = vmatmul.bf16.vlgmr.msra.gmra.mxu3 %v555_v44 }
  0x26   :  { %487 = vmatpush.bf16.msrb.mxu0 %v788_v45 }
  0x27   :  { %791 = vmatpush.bf16.msrb.mxu1 %v788_v45 }
  0x2a   :  { %488 = vmatpush.bf16.msrb.mxu0 %v787_v46 }
  0x2b   :  { %792 = vmatpush.bf16.msrb.mxu1 %v787_v46 }
  0x2e   :  { %489 = vmatpush.bf16.msrb.mxu0 %v786_v47 }
  0x2f   :  { %793 = vmatpush.bf16.msrb.mxu1 %v786_v47 }
  0x31   :  { %423 = vmatmul.bf16.gmra.mxu0 %v563_v57 }
  0x32   :  { %490 = vmatpush.bf16.msrb.mxu0 %v785_v56  ;;  %442 = vmatmul.bf16.gmra.mxu1 %v567_v58 }
  0x33   :  { %794 = vmatpush.bf16.msrb.mxu1 %v785_v56  ;;  %461 = vmatmul.bf16.gmra.mxu2 %v571_v59 }
  0x34   :  { %480 = vmatmul.bf16.gmra.mxu3 %v575_v60 }
  0x36   :  { %491 = vmatpush.bf16.msrb.mxu0 %v784_v61 }
  0x37   :  { %795 = vmatpush.bf16.msrb.mxu1 %v784_v61 }
  0x3a   :  { %492 = vmatpush.bf16.msrb.mxu0 %v783_v62 }
  0x3b   :  { %796 = vmatpush.bf16.msrb.mxu1 %v783_v62 }
  0x3e   :  { %493 = vmatpush.bf16.msrb.mxu0 %v782_v63 }
  0x3f   :  { %797 = vmatpush.bf16.msrb.mxu1 %v782_v63 }
  0x41   :  { %494 = vmatmul.bf16.vlgmr.msrb.gmra.mxu0 %v559_v4 }
  0x42   :  { %499 = vmatmul.bf16.vlgmr.msrb.gmra.mxu1 %v579_v5 }
  0x9e   :  { %v419_v6 = vpop.f32.mrf.mxu0 }
  0x9f   :  { %v438_v7 = vpop.f32.mrf.mxu1 }
  0xa0   :  { %v439_v19 = vadd.f32 %v438_v7, %v419_v6 }
  0xa6   :  { %v457_v8 = vpop.f32.mrf.mxu2  ;;  %v421_v10 = vpop.f32.mrf.mxu0 }
  0xa7   :  { %v476_v9 = vpop.f32.mrf.mxu3  ;;  %v440_v11 = vpop.f32.mrf.mxu1  ;;  %v458_v21 = vadd.f32 %v457_v8, %v439_v19 }
  0xa8   :  { %v441_v30 = vadd.f32 %v440_v11, %v421_v10 }
  0xa9   :  { %v477_v24 = vadd.f32 %v476_v9, %v458_v21 }
  0xae   :  { %v459_v12 = vpop.f32.mrf.mxu2  ;;  %v424_v13 = vpop.f32.mrf.mxu0 }
  0xaf   :  { %v443_v14 = vpop.f32.mrf.mxu1  ;;  %v478_v15 = vpop.f32.mrf.mxu3  ;;  %v460_v34 = vadd.f32 %v459_v12, %v441_v30 }
  0xb0   :  { %v444_v20 = vadd.f32 %v443_v14, %v424_v13 }
  0xb1   :  { %v479_v41 = vadd.f32 %v478_v15, %v460_v34 }
  0xb6   :  { %v462_v16 = vpop.f32.mrf.mxu2  ;;  %v426_v17 = vpop.f32.mrf.mxu0 }
  0xb7   :  { %v445_v18 = vpop.f32.mrf.mxu1  ;;  %v463_v22 = vadd.f32 %v462_v16, %v444_v20  ;;  %v481_v23 = vpop.f32.mrf.mxu3 }
  0xb8   :  { %v446_v31 = vadd.f32 %v445_v18, %v426_v17 }
  0xb9   :  { %v482_v25 = vadd.f32 %v481_v23, %v463_v22 }
  0xbe   :  { %v464_v26 = vpop.f32.mrf.mxu2  ;;  %v495_v28 = vpop.f32.mrf.mxu0 }
  0xbf   :  { %v500_v29 = vpop.f32.mrf.mxu1  ;;  %v496_v32 = vadd.f32 %v495_v28, %v477_v24  ;;  %v465_v35 = vadd.f32 %v464_v26, %v446_v31  ;;  %v483_v40 = vpop.f32.mrf.mxu3 }
  0xc0   :  { %v501_v33 = vadd.f32 %v500_v29, %v482_v25 }
  0xc1   :  { %v524_v36 = vadd.f32 %v798_v27, %v496_v32  ;;  %v484_v42 = vadd.f32 %v483_v40, %v465_v35 }
  0xc2   :  { %v526_v37 = vadd.f32 %v798_v27, %v501_v33 }
  0xc3   :  { %v528_v38 = vmax.f32 %v524_v36, 0.0 }
  0xc4   :  { %v530_v39 = vmax.f32 %v526_v37, 0.0 }
  0xc5   :  { %532 = vst [vmem:[%s1017_s3] sm:$0xff] %v528_v38 }
  0xc6   :  { %534 = vst [vmem:[%s1017_s3 + $0x10] sm:$0xff] %v530_v39  ;;  %v497_v43 = vpop.f32.mrf.mxu0 }
  0xc7   :  { %v502_v44 = vpop.f32.mrf.mxu1  ;;  %v498_v45 = vadd.f32 %v497_v43, %v479_v41 }
  0xc8   :  { %v503_v46 = vadd.f32 %v502_v44, %v484_v42 }
  0xc9   :  { %v525_v47 = vadd.f32 %v798_v27, %v498_v45 }
  0xca   :  { %v527_v48 = vadd.f32 %v798_v27, %v503_v46 }
  0xcb   :  { %v529_v49 = vmax.f32 %v525_v47, 0.0 }
  0xcc   :  { %v531_v50 = vmax.f32 %v527_v48, 0.0 }
  0xcd   :  { %533 = vst [vmem:[%s1017_s3 + $0x8] sm:$0xff] %v529_v49 }
  0xce   :  { %535 = vst [vmem:[%s1017_s3 + $0x18] sm:$0xff] %v531_v50 }

// kernel: cnn_forward.16
= control target key start
LH: loop header
LB: loop body
LE: loop exit
PB: predicated region body
PF: predicated region fallthrough
CT: control target
= control target key end

     0   :  { %s56_s0 = inlined_call_operand.vmem [shape: f32[4,1024], index: 0, kind: input, shape index: {}]   ;;  %s57_s1 = inlined_call_operand.vmem [shape: f32[4,256], index: 1, kind: output, shape index: {}]  }
   0x1   :  { %v8_v0 = vld [vmem:[%s56_s0] sm:$0xff]  ;;  %v10_v1 = vld [vmem:[%s56_s0 + $0x10] sm:$0xff]  ;;  %v9_v2 = vld [vmem:[%s56_s0 + $0x8] sm:$0xff] }
   0x2   :  { %v12_v3 = vmax.f32 %v8_v0, %v10_v1  ;;  %v11_v4 = vld [vmem:[%s56_s0 + $0x18] sm:$0xff] }
   0x3   :  { %v13_v5 = vmax.f32 %v9_v2, %v11_v4 }
   0x4   :  { %v15_v6 = vrot.slane %v12_v3, 4 }
   0x5   :  { %v20_v7 = vrot.slane %v13_v5, 4 }
   0x6   :  { %v17_v8 = vmax.f32 %v12_v3, %v15_v6 }
   0x7   :  { %v22_v9 = vmax.f32 %v13_v5, %v20_v7 }
   0x8   :  { %18 = vst [vmem:[%s57_s1] sm:$0xf] %v17_v8 }
   0x9   :  { %23 = vst [vmem:[%s57_s1 + $0x4] sm:$0xf] %v22_v9 }

// kernel: cnn_forward.15
= control target key start
LH: loop header
LB: loop body
LE: loop exit
PB: predicated region body
PF: predicated region fallthrough
CT: control target
= control target key end

     0   :  { %s737_s12 = smov 0   ;;  %s739_s13 = smov 0   ;;  %s836_s0 = inlined_call_operand.vmem [shape: bf16[32,1152], index: 0, kind: input, shape index: {}]   ;;  %s837_s1 = inlined_call_operand.vmem [shape: bf16[1152,128], index: 1, kind: input, shape index: {}]   ;;  %s838_s2 = inlined_call_operand.vmem [shape: f32[1,128], index: 2, kind: input, shape index: {}]   ;;  %s839_s3 = inlined_call_operand.vmem [shape: f32[32,128], index: 3, kind: output, shape index: {}]  }
   0x1   :  { %s741_s14 = smov 0   ;;  %s743_s15 = smov 0  }
   0x2   :  { %s745_s16 = smov 0  }
   0x3 LB: > { %s25_s17 = sadd.s32 1, %s710_s15  ;;  %p48_p1 = scmp.ne.s32.totalorder %s702_s13, %s698_s12  ;;  %s714_s16 = sphi %s745_s16, %s13_s16   ;;  %s710_s15 = sphi %s743_s15, %s843_s15   ;;  %s706_s14 = sphi %s741_s14, %s842_s14   ;;  %s702_s13 = sphi %s739_s13, %s841_s13   ;;  %s698_s12 = sphi %s737_s12, %s840_s12  }
   0x4   : > { %p26_p0 = scmp.ge.s32.totalorder %s25_s17, 9  ;;  %p49_p2 = scmp.eq.s32.totalorder %s714_s16, 0 }
   0x5   : > { %s41_s19 = sadd.s32 1, %s702_s13  ;;  %p563_p5 = scmp.ge.s32.totalorder %s714_s16, 9 }
   0x6   : > { %s845_s17 = smov (%p26_p0, %s25_s17), 0  ;;  %p50_p3 = por %p49_p2, %p48_p1 }
   0x7   : > { %s37_s18 = ssub.s32 %s710_s15, %s845_s17  ;;  %162 = sbr.rel (%p563_p5) target bundleno = 20 (0x14), region = 20 }
   0x8   : > { %p39_p4 = scmp.eq.s32.totalorder %s37_s18, 0 }
   0xa   : > { %s772_s20 = scalar_select %p39_p4, %s702_s13, %s41_s19  }
   0xc   : > { %165 = sbr.rel (!%p50_p3) target bundleno = 20 (0x14), region = 24  ;;  %s167_s21 = sand.u32 (%p50_p3), 1, %s702_s13  }
   0xd   : > { %s565_s22 = sshll.u32 (%p50_p3), %s710_s15, 2  ;;  %s564_s23 = sshll.u32 (%p50_p3), %s167_s21, 4 }
   0xe   : > { %s174_s26 = scalar_lea.vmem (%p50_p3), %s836_s0, %s565_s22  ;;  %s169_s27 = scalar_lea.vmem (%p50_p3), [#allocation3], %s564_s23 }
   0xf   : > { %v191_v0 = vld [vmem:[%s174_s26] sm:$0xf] (%p50_p3)  ;;  %v193_v1 = vld [vmem:[%s174_s26 + $0x24] sm:$0xf] (%p50_p3)  ;;  %v195_v2 = vld [vmem:[%s174_s26 + $0x48] sm:$0xf] (%p50_p3) }
  0x10   : > { %192 = vst [vmem:[%s169_s27] sm:$0xf] (%p50_p3), %v191_v0  ;;  %v197_v3 = vld [vmem:[%s174_s26 + $0x6c] sm:$0xf] (%p50_p3) }
  0x11   : > { %194 = vst [vmem:[%s169_s27 + $0x4] sm:$0xf] %v193_v1 }
  0x12   : > { %196 = vst [vmem:[%s169_s27 + $0x8] sm:$0xf] %v195_v2 }
  0x13   : > { %198 = vst [vmem:[%s169_s27 + $0xc] sm:$0xf] %v197_v3 }
  0x14 PF: > { %p566_p6 = scmp.ge.s32.totalorder %s714_s16, 1  ;;  %p241_p7 = scmp.lt.s32.totalorder %s714_s16, 10 }
  0x16   : > { %p242_p8 = pnand %p566_p6, %p241_p7 }
  0x17   : > { %s248_s28 = sand.u32 (!%p242_p8), 1, %s698_s12   ;;  %s568_s29 = sshll.u32 (!%p242_p8), %s706_s14, 4 }
  0x18   : > { %245 = sbr.rel (%p242_p8) target bundleno = 221 (0xdd), region = 69  ;;  %s784_s30 = sshll.u32 (!%p242_p8), %s248_s28, 4 }
  0x19   : > { %p287_p9 = scmp.lt.s32.totalorder (!%p242_p8), %s568_s29, 143  ;;  %s250_s8 = scalar_lea.vmem (!%p242_p8), [#allocation3], %s784_s30 }
  0x1a   : > { %p570_p10 = scmp.ne.s32.totalorder (!%p242_p8), %s706_s14, 0 }
  0x1d   : > { %s847_s29 = smov (!%p287_p9, %s568_s29), 143  ;;  %310 = sbr.rel (%p570_p10) target bundleno = 39 (0x27), region = 77 }
  0x1e   : > { %s569_s4 = sshll.u32 %s847_s29, 2 }
  0x1f   : > { %s789_s7 = scalar_lea.vmem %s837_s1, %s569_s4 }
  0x22   : > { %v716_v4 = vmov 0.0  }
  0x23   : > { %311 = vst [vmem:[#allocation2 + $0x10] sm:$0xff] %v716_v4 }
  0x24   : > { %312 = vst [vmem:[#allocation2] sm:$0xff] %v716_v4 }
  0x25   : > { %313 = vst [vmem:[#allocation2 + $0x18] sm:$0xff] %v716_v4 }
  0x26   : > { %314 = vst [vmem:[#allocation2 + $0x8] sm:$0xff] %v716_v4 }
  0x27 PF: > { %v625_v5 = vld [vmem:[%s789_s7 + $0x38] sm:$0xff]  ;;  %v624_v6 = vld [vmem:[%s789_s7 + $0x30] sm:$0xff]  ;;  %v623_v7 = vld [vmem:[%s789_s7 + $0x28] sm:$0xff]  ;;  %p611_p11 = scmp.ne.s32.totalorder %s706_s14, 8 }
  0x28   : > { %399 = vmatpush.bf16.msra.mxu0 %v625_v5  ;;  %626 = vmatpush.bf16.msra.mxu1 %v625_v5  ;;  %v622_v8 = vld [vmem:[%s789_s7 + $0x20] sm:$0xff]  ;;  %v621_v9 = vld [vmem:[%s789_s7 + $0x18] sm:$0xff]  ;;  %v620_v10 = vld [vmem:[%s789_s7 + $0x10] sm:$0xff] }
  0x29   : > { %v619_v11 = vld [vmem:[%s789_s7 + $0x8] sm:$0xff]  ;;  %v618_v12 = vld [vmem:[%s789_s7] sm:$0xff] }
  0x2a   : > { %v616_v13 = vld [vmem:[%s250_s8] sm:$0xff]  ;;  %v617_v14 = vld [vmem:[%s250_s8 + $0x8] sm:$0xff] }
  0x2b   : > { %v315_v15 = vld [vmem:[#allocation2 + $0x10] sm:$0xff]  ;;  %v316_v21 = vld [vmem:[#allocation2] sm:$0xff] }
  0x2c   : > { %400 = vmatpush.bf16.msra.mxu0 %v624_v6  ;;  %627 = vmatpush.bf16.msra.mxu1 %v624_v6  ;;  %v317_v16 = vld [vmem:[#allocation2 + $0x18] sm:$0xff] }
  0x2d   : > { %v318_v22 = vld [vmem:[#allocation2 + $0x8] sm:$0xff] }
  0x30   : > { %401 = vmatpush.bf16.msra.mxu0 %v623_v7  ;;  %628 = vmatpush.bf16.msra.mxu1 %v623_v7 }
  0x34   : > { %402 = vmatpush.bf16.msra.mxu0 %v622_v8  ;;  %629 = vmatpush.bf16.msra.mxu1 %v622_v8 }
  0x38   : > { %403 = vmatpush.bf16.msra.mxu0 %v621_v9  ;;  %630 = vmatpush.bf16.msra.mxu1 %v621_v9 }
  0x3c   : > { %404 = vmatpush.bf16.msra.mxu0 %v620_v10  ;;  %631 = vmatpush.bf16.msra.mxu1 %v620_v10 }
  0x40   : > { %405 = vmatpush.bf16.msra.mxu0 %v619_v11  ;;  %632 = vmatpush.bf16.msra.mxu1 %v619_v11 }
  0x44   : > { %406 = vmatpush.bf16.msra.mxu0 %v618_v12  ;;  %633 = vmatpush.bf16.msra.mxu1 %v618_v12 }
  0x47   : > { %407 = vmatmul.bf16.vlgmr.msra.gmra.mxu0 %v616_v13  ;;  %412 = vmatmul.bf16.vlgmr.msra.gmra.mxu1 %v617_v14 }
  0xc4   : > { %v408_v17 = vpop.f32.mrf.mxu0  ;;  %v413_v18 = vpop.f32.mrf.mxu1 }
  0xc5   : > { %v418_v19 = vadd.f32 %v408_v17, %v315_v15  ;;  %v420_v20 = vadd.f32 %v413_v18, %v317_v16 }
  0xc7   : > { %422 = vst [vmem:[#allocation2 + $0x10] sm:$0xff] %v418_v19 }
  0xc8   : > { %424 = vst [vmem:[#allocation2 + $0x18] sm:$0xff] %v420_v20 }
  0xcc   : > { %v410_v23 = vpop.f32.mrf.mxu0  ;;  %v415_v24 = vpop.f32.mrf.mxu1  ;;  %429 = sbr.rel (%p611_p11) target bundleno = 221 (0xdd), region = 81 }
  0xcd   : > { %v419_v25 = vadd.f32 %v410_v23, %v316_v21  ;;  %v421_v26 = vadd.f32 %v415_v24, %v318_v22 }
  0xcf   : > { %423 = vst [vmem:[#allocation2] sm:$0xff] %v419_v25 }
  0xd0   : > { %425 = vst [vmem:[#allocation2 + $0x8] sm:$0xff] %v421_v26 }
  0xd1   : > { %v430_v27 = vld [vmem:[#allocation2 + $0x10] sm:$0xff]  ;;  %v675_v28 = vld [vmem:[%s838_s2] ss:$0 sm:$0xff]  ;;  %v432_v30 = vld [vmem:[#allocation2 + $0x18] sm:$0xff] }
  0xd2   : > { %v438_v32 = vadd.f32 %v675_v28, %v430_v27  ;;  %v440_v34 = vadd.f32 %v675_v28, %v432_v30 }
  0xd4   : > { %v442_v36 = vmax.f32 %v438_v32, 0.0  ;;  %v444_v38 = vmax.f32 %v440_v34, 0.0 }
  0xd6   : > { %v431_v29 = vld [vmem:[#allocation2] sm:$0xff]  ;;  %446 = vst [vmem:[%s839_s3] sm:$0xff] %v442_v36 }
  0xd7   : > { %v433_v31 = vld [vmem:[#allocation2 + $0x8] sm:$0xff]  ;;  %v439_v33 = vadd.f32 %v675_v28, %v431_v29  ;;  %448 = vst [vmem:[%s839_s3 + $0x10] sm:$0xff] %v444_v38 }
  0xd8   : > { %v441_v35 = vadd.f32 %v675_v28, %v433_v31 }
  0xd9   : > { %v443_v37 = vmax.f32 %v439_v33, 0.0 }
  0xda   : > { %v445_v39 = vmax.f32 %v441_v35, 0.0 }
  0xdb   : > { %447 = vst [vmem:[%s839_s3 + $0x8] sm:$0xff] %v443_v37 }
  0xdc   : > { %449 = vst [vmem:[%s839_s3 + $0x18] sm:$0xff] %v445_v39 }
  0xdd PF: > { %s13_s16 = sadd.s32 1, %s714_s16   ;;  %s840_s12 = smov %s702_s13 }
  0xde   : > { %p10_p12 = scmp.ge.s32.totalorder %s13_s16, 11   ;;  %s841_s13 = smov %s772_s20 }
  0xdf   : > { %s842_s14 = smov %s710_s15  ;;  %s843_s15 = smov %s845_s17 }
  0xe0   :  { %12 = sbr.rel (!%p10_p12) target bundleno = 3 (0x3), region = 122 }

// kernel: cnn_forward.18
= control target key start
LH: loop header
LB: loop body
LE: loop exit
PB: predicated region body
PF: predicated region fallthrough
CT: control target
= control target key end

     0   :  { %s650_s1 = inlined_call_operand.vmem [shape: bf16[512,128], index: 1, kind: input, shape index: {}]   ;;  %s651_s0 = inlined_call_operand.vmem [shape: bf16[8,512], index: 0, kind: input, shape index: {}]   ;;  %s652_s2 = inlined_call_operand.vmem [shape: f32[1,128], index: 2, kind: input, shape index: {}]   ;;  %s653_s3 = inlined_call_operand.vmem [shape: f32[8,128], index: 3, kind: output, shape index: {}]  }
   0x1   :  { %v496_v0 = vld [vmem:[%s650_s1 + $0x38] sm:$0xff]  ;;  %v495_v4 = vld [vmem:[%s650_s1 + $0x30] sm:$0xff]  ;;  %v494_v8 = vld [vmem:[%s650_s1 + $0x28] sm:$0xff] }
   0x2   :  { %v504_v1 = vld [vmem:[%s650_s1 + $0x78] sm:$0xff]  ;;  %292 = vmatpush.bf16.msra.mxu0 %v496_v0  ;;  %v503_v5 = vld [vmem:[%s650_s1 + $0x70] sm:$0xff]  ;;  %v502_v9 = vld [vmem:[%s650_s1 + $0x68] sm:$0xff] }
   0x3   :  { %v512_v2 = vld [vmem:[%s650_s1 + $0xb8] sm:$0xff]  ;;  %305 = vmatpush.bf16.msra.mxu1 %v504_v1  ;;  %v511_v6 = vld [vmem:[%s650_s1 + $0xb0] sm:$0xff]  ;;  %v510_v10 = vld [vmem:[%s650_s1 + $0xa8] sm:$0xff] }
   0x4   :  { %v520_v3 = vld [vmem:[%s650_s1 + $0xf8] sm:$0xff]  ;;  %318 = vmatpush.bf16.msra.mxu2 %v512_v2  ;;  %v519_v7 = vld [vmem:[%s650_s1 + $0xf0] sm:$0xff]  ;;  %v518_v11 = vld [vmem:[%s650_s1 + $0xe8] sm:$0xff] }
   0x5   :  { %331 = vmatpush.bf16.msra.mxu3 %v520_v3  ;;  %v493_v12 = vld [vmem:[%s650_s1 + $0x20] sm:$0xff]  ;;  %v492_v16 = vld [vmem:[%s650_s1 + $0x18] sm:$0xff]  ;;  %v491_v20 = vld [vmem:[%s650_s1 + $0x10] sm:$0xff] }
   0x6   :  { %293 = vmatpush.bf16.msra.mxu0 %v495_v4  ;;  %v501_v13 = vld [vmem:[%s650_s1 + $0x60] sm:$0xff]  ;;  %v500_v17 = vld [vmem:[%s650_s1 + $0x58] sm:$0xff]  ;;  %v499_v21 = vld [vmem:[%s650_s1 + $0x50] sm:$0xff] }
   0x7   :  { %306 = vmatpush.bf16.msra.mxu1 %v503_v5  ;;  %v509_v14 = vld [vmem:[%s650_s1 + $0xa0] sm:$0xff]  ;;  %v508_v18 = vld [vmem:[%s650_s1 + $0x98] sm:$0xff]  ;;  %v507_v22 = vld [vmem:[%s650_s1 + $0x90] sm:$0xff] }
   0x8   :  { %319 = vmatpush.bf16.msra.mxu2 %v511_v6  ;;  %v517_v15 = vld [vmem:[%s650_s1 + $0xe0] sm:$0xff]  ;;  %v516_v19 = vld [vmem:[%s650_s1 + $0xd8] sm:$0xff]  ;;  %v515_v23 = vld [vmem:[%s650_s1 + $0xd0] sm:$0xff] }
   0x9   :  { %332 = vmatpush.bf16.msra.mxu3 %v519_v7  ;;  %v490_v24 = vld [vmem:[%s650_s1 + $0x8] sm:$0xff]  ;;  %v20_v26 = vld [vmem:[%s651_s0] sm:$0xff] }
   0xa   :  { %294 = vmatpush.bf16.msra.mxu0 %v494_v8  ;;  %v498_v25 = vld [vmem:[%s650_s1 + $0x48] sm:$0xff]  ;;  %v88_v30 = vunpack.c.l.b16 %v20_v26  ;;  %v89_v31 = vunpack.c.h.b16 %v20_v26  ;;  %v489_v32 = vld [vmem:[%s650_s1] sm:$0xff] }
   0xb   :  { %307 = vmatpush.bf16.msra.mxu1 %v502_v9  ;;  %v506_v27 = vld [vmem:[%s650_s1 + $0x88] sm:$0xff]  ;;  %v497_v33 = vld [vmem:[%s650_s1 + $0x40] sm:$0xff] }
   0xc   :  { %320 = vmatpush.bf16.msra.mxu2 %v510_v10  ;;  %v514_v28 = vld [vmem:[%s650_s1 + $0xc8] sm:$0xff]  ;;  %v505_v36 = vld [vmem:[%s650_s1 + $0x80] sm:$0xff]  ;;  %v92_v38 = vpack.c.b16 %v88_v30, %v88_v30  ;;  %v93_v39 = vpack.c.b16 %v89_v31, %v89_v31 }
   0xd   :  { %333 = vmatpush.bf16.msra.mxu3 %v518_v11  ;;  %v21_v29 = vld [vmem:[%s651_s0 + $0x8] sm:$0xff]  ;;  %v513_v37 = vld [vmem:[%s650_s1 + $0xc0] sm:$0xff] }
   0xe   :  { %295 = vmatpush.bf16.msra.mxu0 %v493_v12  ;;  %v90_v34 = vunpack.c.l.b16 %v21_v29  ;;  %v91_v35 = vunpack.c.h.b16 %v21_v29  ;;  %v521_v48 = vld [vmem:[%s652_s2] ss:$0 sm:$0xff] }
   0xf   :  { %308 = vmatpush.bf16.msra.mxu1 %v501_v13 }
  0x10   :  { %321 = vmatpush.bf16.msra.mxu2 %v509_v14  ;;  %v94_v40 = vpack.c.b16 %v90_v34, %v90_v34  ;;  %v95_v41 = vpack.c.b16 %v91_v35, %v91_v35 }
  0x11   :  { %334 = vmatpush.bf16.msra.mxu3 %v517_v15 }
  0x12   :  { %296 = vmatpush.bf16.msra.mxu0 %v492_v16 }
  0x13   :  { %309 = vmatpush.bf16.msra.mxu1 %v500_v17 }
  0x14   :  { %322 = vmatpush.bf16.msra.mxu2 %v508_v18 }
  0x15   :  { %335 = vmatpush.bf16.msra.mxu3 %v516_v19 }
  0x16   :  { %297 = vmatpush.bf16.msra.mxu0 %v491_v20 }
  0x17   :  { %310 = vmatpush.bf16.msra.mxu1 %v499_v21 }
  0x18   :  { %323 = vmatpush.bf16.msra.mxu2 %v507_v22 }
  0x19   :  { %336 = vmatpush.bf16.msra.mxu3 %v515_v23 }
  0x1a   :  { %298 = vmatpush.bf16.msra.mxu0 %v490_v24 }
  0x1b   :  { %311 = vmatpush.bf16.msra.mxu1 %v498_v25 }
  0x1c   :  { %324 = vmatpush.bf16.msra.mxu2 %v506_v27 }
  0x1d   :  { %337 = vmatpush.bf16.msra.mxu3 %v514_v28 }
  0x1e   :  { %299 = vmatpush.bf16.msra.mxu0 %v489_v32 }
  0x1f   :  { %312 = vmatpush.bf16.msra.mxu1 %v497_v33 }
  0x20   :  { %325 = vmatpush.bf16.msra.mxu2 %v505_v36 }
  0x21   :  { %338 = vmatpush.bf16.msra.mxu3 %v513_v37  ;;  %300 = vmatmul.bf16.vlgmr.msra.gmra.mxu0 %v92_v38 }
  0x22   :  { %313 = vmatmul.bf16.vlgmr.msra.gmra.mxu1 %v93_v39 }
  0x23   :  { %326 = vmatmul.bf16.vlgmr.msra.gmra.mxu2 %v94_v40 }
  0x24   :  { %339 = vmatmul.bf16.vlgmr.msra.gmra.mxu3 %v95_v41 }
  0x9e   :  { %v301_v42 = vpop.f32.mrf.mxu0 }
  0x9f   :  { %v314_v43 = vpop.f32.mrf.mxu1 }
  0xa0   :  { %v315_v44 = vadd.f32 %v314_v43, %v301_v42 }
  0xa6   :  { %v327_v45 = vpop.f32.mrf.mxu2  ;;  %v303_v49 = vpop.f32.mrf.mxu0 }
  0xa7   :  { %v340_v46 = vpop.f32.mrf.mxu3  ;;  %v328_v47 = vadd.f32 %v327_v45, %v315_v44  ;;  %v316_v50 = vpop.f32.mrf.mxu1 }
  0xa9   :  { %v341_v51 = vadd.f32 %v340_v46, %v328_v47 }
  0xab   :  { %v354_v52 = vadd.f32 %v521_v48, %v341_v51 }
  0xad   :  { %v355_v53 = vmax.f32 %v354_v52, 0.0 }
  0xae   :  { %v329_v54 = vpop.f32.mrf.mxu2 }
  0xaf   :  { %v342_v55 = vpop.f32.mrf.mxu3  ;;  %356 = vst [vmem:[%s653_s3] sm:$0xff] %v355_v53 }

// kernel: cnn_forward.17
= control target key start
LH: loop header
LB: loop body
LE: loop exit
PB: predicated region body
PF: predicated region fallthrough
CT: control target
= control target key end

     0   :  { %s2532_s1 = inlined_call_operand.vmem [shape: bf16[512,512], index: 1, kind: input, shape index: {}]   ;;  %s2533_s0 = inlined_call_operand.vmem [shape: bf16[8,512], index: 0, kind: input, shape index: {}]   ;;  %s2534_s2 = inlined_call_operand.vmem [shape: f32[1,512], index: 2, kind: input, shape index: {}]   ;;  %s2535_s3 = inlined_call_operand.vmem [shape: f32[8,512], index: 3, kind: output, shape index: {}]  }
   0x1   :  { %v1173_v0 = vld [vmem:[%s2532_s1 + $0xe0] sm:$0xf]  ;;  %v1601_v1 = vld [vmem:[%s2532_s1 + $0xec] sm:$0xf0] }
   0x2   :  { %v1301_v2 = vld [vmem:[%s2532_s1 + $0x1e0] sm:$0xf]  ;;  %v1174_v3 = vor.u32 %v1601_v1, %v1173_v0  ;;  %v1633_v4 = vld [vmem:[%s2532_s1 + $0x1ec] sm:$0xf0] }
   0x3   :  { %v1429_v5 = vld [vmem:[%s2532_s1 + $0x2e0] sm:$0xf]  ;;  %v1665_v6 = vld [vmem:[%s2532_s1 + $0x2ec] sm:$0xf0]  ;;  %v1302_v7 = vor.u32 %v1633_v4, %v1301_v2 }
   0x4   :  { %v1430_v8 = vor.u32 %v1665_v6, %v1429_v5  ;;  %v1557_v9 = vld [vmem:[%s2532_s1 + $0x3e0] sm:$0xf]  ;;  %v1697_v10 = vld [vmem:[%s2532_s1 + $0x3ec] sm:$0xf0]  ;;  %810 = vmatpush.bf16.msra.mxu0 %v1174_v3 }
   0x5   :  { %v1157_v11 = vld [vmem:[%s2532_s1 + $0xc0] sm:$0xf]  ;;  %v1558_v12 = vor.u32 %v1697_v10, %v1557_v9  ;;  %v1597_v13 = vld [vmem:[%s2532_s1 + $0xcc] sm:$0xf0]  ;;  %823 = vmatpush.bf16.msra.mxu1 %v1302_v7 }
   0x6   :  { %v1285_v14 = vld [vmem:[%s2532_s1 + $0x1c0] sm:$0xf]  ;;  %v1629_v15 = vld [vmem:[%s2532_s1 + $0x1cc] sm:$0xf0]  ;;  %836 = vmatpush.bf16.msra.mxu2 %v1430_v8  ;;  %v1158_v16 = vor.u32 %v1597_v13, %v1157_v11 }
   0x7   :  { %v1286_v17 = vor.u32 %v1629_v15, %v1285_v14  ;;  %v1413_v18 = vld [vmem:[%s2532_s1 + $0x2c0] sm:$0xf]  ;;  %v1661_v19 = vld [vmem:[%s2532_s1 + $0x2cc] sm:$0xf0]  ;;  %849 = vmatpush.bf16.msra.mxu3 %v1558_v12 }
   0x8   :  { %v1541_v20 = vld [vmem:[%s2532_s1 + $0x3c0] sm:$0xf]  ;;  %v1414_v21 = vor.u32 %v1661_v19, %v1413_v18  ;;  %v1693_v22 = vld [vmem:[%s2532_s1 + $0x3cc] sm:$0xf0]  ;;  %811 = vmatpush.bf16.msra.mxu0 %v1158_v16 }
   0x9   :  { %v1141_v23 = vld [vmem:[%s2532_s1 + $0xa0] sm:$0xf]  ;;  %v1593_v24 = vld [vmem:[%s2532_s1 + $0xac] sm:$0xf0]  ;;  %v1542_v25 = vor.u32 %v1693_v22, %v1541_v20  ;;  %824 = vmatpush.bf16.msra.mxu1 %v1286_v17 }
   0xa   :  { %v1269_v26 = vld [vmem:[%s2532_s1 + $0x1a0] sm:$0xf]  ;;  %v1625_v27 = vld [vmem:[%s2532_s1 + $0x1ac] sm:$0xf0]  ;;  %v1142_v29 = vor.u32 %v1593_v24, %v1141_v23  ;;  %837 = vmatpush.bf16.msra.mxu2 %v1414_v21 }
   0xb   :  { %v1397_v28 = vld [vmem:[%s2532_s1 + $0x2a0] sm:$0xf]  ;;  %v1657_v30 = vld [vmem:[%s2532_s1 + $0x2ac] sm:$0xf0]  ;;  %v1270_v33 = vor.u32 %v1625_v27, %v1269_v26  ;;  %850 = vmatpush.bf16.msra.mxu3 %v1542_v25 }
   0xc   :  { %v1525_v31 = vld [vmem:[%s2532_s1 + $0x3a0] sm:$0xf]  ;;  %v1689_v32 = vld [vmem:[%s2532_s1 + $0x3ac] sm:$0xf0]  ;;  %v1398_v34 = vor.u32 %v1657_v30, %v1397_v28  ;;  %812 = vmatpush.bf16.msra.mxu0 %v1142_v29  ;;  %v1599_v28 = vld [vmem:[%s2532_s1 + $0xe4] sm:$0xf] }
   0xd   :  { %v1125_v35 = vld [vmem:[%s2532_s1 + $0x80] sm:$0xf]  ;;  %v1589_v36 = vld [vmem:[%s2532_s1 + $0x8c] sm:$0xf0]  ;;  %v1526_v38 = vor.u32 %v1689_v32, %v1525_v31  ;;  %825 = vmatpush.bf16.msra.mxu1 %v1270_v33  ;;  %v1175_v29 = vld [vmem:[%s2532_s1 + $0xf0] sm:$0xf0] }
   0xe   :  { %v1253_v37 = vld [vmem:[%s2532_s1 + $0x180] sm:$0xf]  ;;  %v1621_v39 = vld [vmem:[%s2532_s1 + $0x18c] sm:$0xf0]  ;;  %v1126_v44 = vor.u32 %v1589_v36, %v1125_v35  ;;  %838 = vmatpush.bf16.msra.mxu2 %v1398_v34  ;;  %v1631_v30 = vld [vmem:[%s2532_s1 + $0x1e4] sm:$0xf] }
   0xf   :  { %v1381_v40 = vld [vmem:[%s2532_s1 + $0x280] sm:$0xf]  ;;  %v1653_v41 = vld [vmem:[%s2532_s1 + $0x28c] sm:$0xf0]  ;;  %v1254_v45 = vor.u32 %v1621_v39, %v1253_v37  ;;  %851 = vmatpush.bf16.msra.mxu3 %v1526_v38  ;;  %v1303_v32 = vld [vmem:[%s2532_s1 + $0x1f0] sm:$0xf0] }
  0x10   :  { %v1509_v42 = vld [vmem:[%s2532_s1 + $0x380] sm:$0xf]  ;;  %v1685_v43 = vld [vmem:[%s2532_s1 + $0x38c] sm:$0xf0]  ;;  %v1382_v46 = vor.u32 %v1653_v41, %v1381_v40  ;;  %813 = vmatpush.bf16.msra.mxu0 %v1126_v44  ;;  %v1663_v33 = vld [vmem:[%s2532_s1 + $0x2e4] sm:$0xf]  ;;  %v1178_v40 = vor.u32 %v1599_v28, %v1175_v29  ;;  %v1306_v41 = vor.u32 %v1631_v30, %v1303_v32 }
  0x11   :  { %v1109_v47 = vld [vmem:[%s2532_s1 + $0x60] sm:$0xf]  ;;  %v1585_v48 = vld [vmem:[%s2532_s1 + $0x6c] sm:$0xf0]  ;;  %v1510_v50 = vor.u32 %v1685_v43, %v1509_v42  ;;  %826 = vmatpush.bf16.msra.mxu1 %v1254_v45  ;;  %v1431_v34 = vld [vmem:[%s2532_s1 + $0x2f0] sm:$0xf0] }
  0x12   :  { %v1237_v49 = vld [vmem:[%s2532_s1 + $0x160] sm:$0xf]  ;;  %v1617_v51 = vld [vmem:[%s2532_s1 + $0x16c] sm:$0xf0]  ;;  %v1110_v56 = vor.u32 %v1585_v48, %v1109_v47  ;;  %839 = vmatpush.bf16.msra.mxu2 %v1382_v46  ;;  %v1695_v37 = vld [vmem:[%s2532_s1 + $0x3e4] sm:$0xf]  ;;  %v1434_v42 = vor.u32 %v1663_v33, %v1431_v34 }
  0x13   :  { %v1365_v52 = vld [vmem:[%s2532_s1 + $0x260] sm:$0xf]  ;;  %v1649_v53 = vld [vmem:[%s2532_s1 + $0x26c] sm:$0xf0]  ;;  %v1238_v57 = vor.u32 %v1617_v51, %v1237_v49  ;;  %852 = vmatpush.bf16.msra.mxu3 %v1510_v50  ;;  %v1559_v38 = vld [vmem:[%s2532_s1 + $0x3f0] sm:$0xf0] }
  0x14   :  { %v1493_v54 = vld [vmem:[%s2532_s1 + $0x360] sm:$0xf]  ;;  %v1681_v55 = vld [vmem:[%s2532_s1 + $0x36c] sm:$0xf0]  ;;  %v1366_v58 = vor.u32 %v1649_v53, %v1365_v52  ;;  %814 = vmatpush.bf16.msra.mxu0 %v1110_v56  ;;  %v1595_v43 = vld [vmem:[%s2532_s1 + $0xc4] sm:$0xf]  ;;  %v1562_v46 = vor.u32 %v1695_v37, %v1559_v38 }
  0x15   :  { %v1093_v59 = vld [vmem:[%s2532_s1 + $0x40] sm:$0xf]  ;;  %v1581_v60 = vld [vmem:[%s2532_s1 + $0x4c] sm:$0xf0]  ;;  %v1494_v62 = vor.u32 %v1681_v55, %v1493_v54  ;;  %827 = vmatpush.bf16.msra.mxu1 %v1238_v57  ;;  %v1159_v44 = vld [vmem:[%s2532_s1 + $0xd0] sm:$0xf0] }
  0x16   :  { %v1221_v61 = vld [vmem:[%s2532_s1 + $0x140] sm:$0xf]  ;;  %v1613_v63 = vld [vmem:[%s2532_s1 + $0x14c] sm:$0xf0]  ;;  %v1094_v4 = vor.u32 %v1581_v60, %v1093_v59  ;;  %840 = vmatpush.bf16.msra.mxu2 %v1366_v58  ;;  %v1627_v45 = vld [vmem:[%s2532_s1 + $0x1c4] sm:$0xf]  ;;  %v1162_v52 = vor.u32 %v1595_v43, %v1159_v44 }
  0x17   :  { %v1349_v0 = vld [vmem:[%s2532_s1 + $0x240] sm:$0xf]  ;;  %v1645_v1 = vld [vmem:[%s2532_s1 + $0x24c] sm:$0xf0]  ;;  %v1222_v5 = vor.u32 %v1613_v63, %v1221_v61  ;;  %853 = vmatpush.bf16.msra.mxu3 %v1494_v62  ;;  %v1287_v47 = vld [vmem:[%s2532_s1 + $0x1d0] sm:$0xf0] }
  0x18   :  { %v1477_v2 = vld [vmem:[%s2532_s1 + $0x340] sm:$0xf]  ;;  %v1677_v3 = vld [vmem:[%s2532_s1 + $0x34c] sm:$0xf0]  ;;  %v1350_v6 = vor.u32 %v1645_v1, %v1349_v0  ;;  %815 = vmatpush.bf16.msra.mxu0 %v1094_v4  ;;  %v1659_v48 = vld [vmem:[%s2532_s1 + $0x2c4] sm:$0xf]  ;;  %v1290_v53 = vor.u32 %v1627_v45, %v1287_v47 }
  0x19   :  { %v1077_v7 = vld [vmem:[%s2532_s1 + $0x20] sm:$0xf]  ;;  %v1577_v8 = vld [vmem:[%s2532_s1 + $0x2c] sm:$0xf0]  ;;  %v1478_v10 = vor.u32 %v1677_v3, %v1477_v2  ;;  %828 = vmatpush.bf16.msra.mxu1 %v1222_v5  ;;  %v1415_v49 = vld [vmem:[%s2532_s1 + $0x2d0] sm:$0xf0] }
  0x1a   :  { %v1205_v9 = vld [vmem:[%s2532_s1 + $0x120] sm:$0xf]  ;;  %v1609_v11 = vld [vmem:[%s2532_s1 + $0x12c] sm:$0xf0]  ;;  %v1078_v16 = vor.u32 %v1577_v8, %v1077_v7  ;;  %841 = vmatpush.bf16.msra.mxu2 %v1350_v6  ;;  %v1691_v50 = vld [vmem:[%s2532_s1 + $0x3c4] sm:$0xf]  ;;  %v1418_v54 = vor.u32 %v1659_v48, %v1415_v49 }
  0x1b   :  { %v1333_v12 = vld [vmem:[%s2532_s1 + $0x220] sm:$0xf]  ;;  %v1641_v13 = vld [vmem:[%s2532_s1 + $0x22c] sm:$0xf0]  ;;  %v1206_v19 = vor.u32 %v1609_v11, %v1205_v9  ;;  %854 = vmatpush.bf16.msra.mxu3 %v1478_v10  ;;  %v1543_v51 = vld [vmem:[%s2532_s1 + $0x3d0] sm:$0xf0] }
  0x1c   :  { %v1461_v14 = vld [vmem:[%s2532_s1 + $0x320] sm:$0xf]  ;;  %v1673_v15 = vld [vmem:[%s2532_s1 + $0x32c] sm:$0xf0]  ;;  %v1334_v20 = vor.u32 %v1641_v13, %v1333_v12  ;;  %816 = vmatpush.bf16.msra.mxu0 %v1078_v16  ;;  %v1591_v55 = vld [vmem:[%s2532_s1 + $0xa4] sm:$0xf]  ;;  %v1546_v58 = vor.u32 %v1691_v50, %v1543_v51 }
  0x1d   :  { %v1061_v17 = vld [vmem:[%s2532_s1] sm:$0xf]  ;;  %v1573_v18 = vld [vmem:[%s2532_s1 + $0xc] sm:$0xf0]  ;;  %v1462_v24 = vor.u32 %v1673_v15, %v1461_v14  ;;  %829 = vmatpush.bf16.msra.mxu1 %v1206_v19  ;;  %v1143_v56 = vld [vmem:[%s2532_s1 + $0xb0] sm:$0xf0] }
  0x1e   :  { %v1189_v21 = vld [vmem:[%s2532_s1 + $0x100] sm:$0xf]  ;;  %v1605_v22 = vld [vmem:[%s2532_s1 + $0x10c] sm:$0xf0]  ;;  %v1062_v31 = vor.u32 %v1573_v18, %v1061_v17  ;;  %842 = vmatpush.bf16.msra.mxu2 %v1334_v20  ;;  %v1623_v57 = vld [vmem:[%s2532_s1 + $0x1a4] sm:$0xf]  ;;  %v1146_v0 = vor.u32 %v1591_v55, %v1143_v56 }
  0x1f   :  { %v1317_v23 = vld [vmem:[%s2532_s1 + $0x200] sm:$0xf]  ;;  %v1637_v25 = vld [vmem:[%s2532_s1 + $0x20c] sm:$0xf0]  ;;  %v1190_v35 = vor.u32 %v1605_v22, %v1189_v21  ;;  %855 = vmatpush.bf16.msra.mxu3 %v1462_v24  ;;  %v1271_v59 = vld [vmem:[%s2532_s1 + $0x1b0] sm:$0xf0] }
  0x20   :  { %v1445_v26 = vld [vmem:[%s2532_s1 + $0x300] sm:$0xf]  ;;  %v1669_v27 = vld [vmem:[%s2532_s1 + $0x30c] sm:$0xf0]  ;;  %v1318_v36 = vor.u32 %v1637_v25, %v1317_v23  ;;  %817 = vmatpush.bf16.msra.mxu0 %v1062_v31  ;;  %v1655_v60 = vld [vmem:[%s2532_s1 + $0x2a4] sm:$0xf]  ;;  %v1274_v2 = vor.u32 %v1623_v57, %v1271_v59 }
  0x21   :  { %v1446_v39 = vor.u32 %v1669_v27, %v1445_v26  ;;  %830 = vmatpush.bf16.msra.mxu1 %v1190_v35  ;;  %v1399_v61 = vld [vmem:[%s2532_s1 + $0x2b0] sm:$0xf0]  ;;  %v1687_v62 = vld [vmem:[%s2532_s1 + $0x3a4] sm:$0xf]  ;;  %v27_v1 = vld [vmem:[%s2533_s0 + $0x8] sm:$0xff] }
  0x22   :  { %843 = vmatpush.bf16.msra.mxu2 %v1318_v36  ;;  %v1527_v63 = vld [vmem:[%s2532_s1 + $0x3b0] sm:$0xf0]  ;;  %v1402_v3 = vor.u32 %v1655_v60, %v1399_v61  ;;  %v1587_v4 = vld [vmem:[%s2532_s1 + $0x84] sm:$0xf]  ;;  %v160_v7 = vunpack.c.l.b16 %v27_v1  ;;  %v161_v8 = vunpack.c.h.b16 %v27_v1 }
  0x23   :  { %856 = vmatpush.bf16.msra.mxu3 %v1446_v39  ;;  %v1127_v5 = vld [vmem:[%s2532_s1 + $0x90] sm:$0xf0]  ;;  %v1619_v6 = vld [vmem:[%s2532_s1 + $0x184] sm:$0xf]  ;;  %v1530_v9 = vor.u32 %v1687_v62, %v1527_v63 }
  0x24   :  { %862 = vmatpush.bf16.msrb.mxu0 %v1178_v40  ;;  %v1255_v10 = vld [vmem:[%s2532_s1 + $0x190] sm:$0xf0]  ;;  %v1651_v11 = vld [vmem:[%s2532_s1 + $0x284] sm:$0xf]  ;;  %v2010_v15 = vpack.c.b16 %v160_v7, %v160_v7  ;;  %v2012_v16 = vpack.c.b16 %v161_v8, %v161_v8  ;;  %v1130_v18 = vor.u32 %v1587_v4, %v1127_v5  ;;  %v1602_v7 = vld [vmem:[%s2532_s1 + $0xf4] sm:$0xf0] }
  0x25   :  { %875 = vmatpush.bf16.msrb.mxu1 %v1306_v41  ;;  %v1383_v12 = vld [vmem:[%s2532_s1 + $0x290] sm:$0xf0]  ;;  %v1683_v13 = vld [vmem:[%s2532_s1 + $0x384] sm:$0xf]  ;;  %v1258_v21 = vor.u32 %v1619_v6, %v1255_v10  ;;  %v1181_v6 = vld [vmem:[%s2532_s1 + $0xe8] sm:$0xf] }
  0x26   :  { %888 = vmatpush.bf16.msrb.mxu2 %v1434_v42  ;;  %v1511_v14 = vld [vmem:[%s2532_s1 + $0x390] sm:$0xf0]  ;;  %v26_v17 = vld [vmem:[%s2533_s0] sm:$0xff]  ;;  %v1386_v22 = vor.u32 %v1651_v11, %v1383_v12  ;;  %857 = vmatmul.bf16.vlgmr.msra.gmra.mxu3 %v2012_v16  ;;  %v1309_v8 = vld [vmem:[%s2532_s1 + $0x1e8] sm:$0xf] }
  0x27   :  { %901 = vmatpush.bf16.msrb.mxu3 %v1562_v46  ;;  %v158_v19 = vunpack.c.l.b16 %v26_v17  ;;  %v159_v20 = vunpack.c.h.b16 %v26_v17  ;;  %v1583_v23 = vld [vmem:[%s2532_s1 + $0x64] sm:$0xf]  ;;  %v1111_v24 = vld [vmem:[%s2532_s1 + $0x70] sm:$0xf0]  ;;  %v1514_v26 = vor.u32 %v1683_v13, %v1511_v14  ;;  %844 = vmatmul.bf16.vlgmr.msra.gmra.mxu2 %v2010_v15  ;;  %v1634_v10 = vld [vmem:[%s2532_s1 + $0x1f4] sm:$0xf0] }
  0x28   :  { %863 = vmatpush.bf16.msrb.mxu0 %v1162_v52  ;;  %v1615_v25 = vld [vmem:[%s2532_s1 + $0x164] sm:$0xf]  ;;  %v1239_v27 = vld [vmem:[%s2532_s1 + $0x170] sm:$0xf0]  ;;  %v1114_v34 = vor.u32 %v1583_v23, %v1111_v24  ;;  %v1437_v11 = vld [vmem:[%s2532_s1 + $0x2e8] sm:$0xf] }
  0x29   :  { %876 = vmatpush.bf16.msrb.mxu1 %v1290_v53  ;;  %v1647_v28 = vld [vmem:[%s2532_s1 + $0x264] sm:$0xf]  ;;  %v1367_v29 = vld [vmem:[%s2532_s1 + $0x270] sm:$0xf0]  ;;  %v2036_v30 = vpack.c.b16 %v158_v19, %v158_v19  ;;  %v2038_v31 = vpack.c.b16 %v159_v20, %v159_v20  ;;  %v1242_v35 = vor.u32 %v1615_v25, %v1239_v27  ;;  %v1666_v12 = vld [vmem:[%s2532_s1 + $0x2f4] sm:$0xf0]  ;;  %v1182_v20 = vor.u32 %v1602_v7, %v1181_v6 }
  0x2a   :  { %889 = vmatpush.bf16.msrb.mxu2 %v1418_v54  ;;  %v1679_v32 = vld [vmem:[%s2532_s1 + $0x364] sm:$0xf]  ;;  %v1495_v33 = vld [vmem:[%s2532_s1 + $0x370] sm:$0xf0]  ;;  %v1370_v36 = vor.u32 %v1647_v28, %v1367_v29  ;;  %v1565_v17 = vld [vmem:[%s2532_s1 + $0x3e8] sm:$0xf] }
  0x2b   :  { %902 = vmatpush.bf16.msrb.mxu3 %v1546_v58  ;;  %831 = vmatmul.bf16.vlgmr.msra.gmra.mxu1 %v2038_v31  ;;  %v1579_v37 = vld [vmem:[%s2532_s1 + $0x44] sm:$0xf]  ;;  %v1095_v38 = vld [vmem:[%s2532_s1 + $0x50] sm:$0xf0]  ;;  %v1498_v40 = vor.u32 %v1679_v32, %v1495_v33  ;;  %v1165_v23 = vld [vmem:[%s2532_s1 + $0xc8] sm:$0xf] }
  0x2c   :  { %864 = vmatpush.bf16.msrb.mxu0 %v1146_v0  ;;  %v1611_v39 = vld [vmem:[%s2532_s1 + $0x144] sm:$0xf]  ;;  %v1223_v41 = vld [vmem:[%s2532_s1 + $0x150] sm:$0xf0]  ;;  %v1098_v46 = vor.u32 %v1579_v37, %v1095_v38  ;;  %v1598_v24 = vld [vmem:[%s2532_s1 + $0xd4] sm:$0xf0] }
  0x2d   :  { %877 = vmatpush.bf16.msrb.mxu1 %v1274_v2  ;;  %v1643_v42 = vld [vmem:[%s2532_s1 + $0x244] sm:$0xf]  ;;  %v1351_v43 = vld [vmem:[%s2532_s1 + $0x250] sm:$0xf0]  ;;  %818 = vmatmul.bf16.vlgmr.msra.gmra.mxu0 %v2036_v30  ;;  %v1226_v47 = vor.u32 %v1611_v39, %v1223_v41  ;;  %v1293_v25 = vld [vmem:[%s2532_s1 + $0x1c8] sm:$0xf] }
  0x2e   :  { %890 = vmatpush.bf16.msrb.mxu2 %v1402_v3  ;;  %v1675_v44 = vld [vmem:[%s2532_s1 + $0x344] sm:$0xf]  ;;  %v1479_v45 = vld [vmem:[%s2532_s1 + $0x350] sm:$0xf0]  ;;  %v1354_v48 = vor.u32 %v1643_v42, %v1351_v43  ;;  %v1630_v27 = vld [vmem:[%s2532_s1 + $0x1d4] sm:$0xf0] }
  0x2f   :  { %903 = vmatpush.bf16.msrb.mxu3 %v1530_v9  ;;  %v1575_v49 = vld [vmem:[%s2532_s1 + $0x24] sm:$0xf]  ;;  %v1079_v50 = vld [vmem:[%s2532_s1 + $0x30] sm:$0xf0]  ;;  %v1482_v52 = vor.u32 %v1675_v44, %v1479_v45  ;;  %v1421_v28 = vld [vmem:[%s2532_s1 + $0x2c8] sm:$0xf] }
  0x30   :  { %865 = vmatpush.bf16.msrb.mxu0 %v1130_v18  ;;  %v1607_v51 = vld [vmem:[%s2532_s1 + $0x124] sm:$0xf]  ;;  %v1207_v53 = vld [vmem:[%s2532_s1 + $0x130] sm:$0xf0]  ;;  %v1082_v58 = vor.u32 %v1575_v49, %v1079_v50  ;;  %v1698_v18 = vld [vmem:[%s2532_s1 + $0x3f4] sm:$0xf0] }
  0x31   :  { %878 = vmatpush.bf16.msrb.mxu1 %v1258_v21  ;;  %v1639_v54 = vld [vmem:[%s2532_s1 + $0x224] sm:$0xf]  ;;  %v1335_v55 = vld [vmem:[%s2532_s1 + $0x230] sm:$0xf0]  ;;  %v1210_v61 = vor.u32 %v1607_v51, %v1207_v53  ;;  %v1310_v21 = vor.u32 %v1634_v10, %v1309_v8  ;;  %v1662_v29 = vld [vmem:[%s2532_s1 + $0x2d4] sm:$0xf0] }
  0x32   :  { %891 = vmatpush.bf16.msrb.mxu2 %v1386_v22  ;;  %v1671_v56 = vld [vmem:[%s2532_s1 + $0x324] sm:$0xf]  ;;  %v1463_v57 = vld [vmem:[%s2532_s1 + $0x330] sm:$0xf0]  ;;  %v1338_v62 = vor.u32 %v1639_v54, %v1335_v55  ;;  %v1438_v22 = vor.u32 %v1666_v12, %v1437_v11  ;;  %v1549_v32 = vld [vmem:[%s2532_s1 + $0x3c8] sm:$0xf] }
  0x33   :  { %904 = vmatpush.bf16.msrb.mxu3 %v1514_v26  ;;  %v1571_v59 = vld [vmem:[%s2532_s1 + $0x4] sm:$0xf]  ;;  %v1063_v60 = vld [vmem:[%s2532_s1 + $0x10] sm:$0xf0]  ;;  %v1466_v2 = vor.u32 %v1671_v56, %v1463_v57  ;;  %v1566_v26 = vor.u32 %v1698_v18, %v1565_v17  ;;  %v1694_v33 = vld [vmem:[%s2532_s1 + $0x3d4] sm:$0xf0] }
  0x34   :  { %866 = vmatpush.bf16.msrb.mxu0 %v1114_v34  ;;  %v1603_v63 = vld [vmem:[%s2532_s1 + $0x104] sm:$0xf]  ;;  %v1191_v0 = vld [vmem:[%s2532_s1 + $0x110] sm:$0xf0]  ;;  %v1066_v9 = vor.u32 %v1571_v59, %v1063_v60  ;;  %v1166_v34 = vor.u32 %v1598_v24, %v1165_v23  ;;  %v1149_v37 = vld [vmem:[%s2532_s1 + $0xa8] sm:$0xf] }
  0x35   :  { %879 = vmatpush.bf16.msrb.mxu1 %v1242_v35  ;;  %v1635_v1 = vld [vmem:[%s2532_s1 + $0x204] sm:$0xf]  ;;  %v1319_v3 = vld [vmem:[%s2532_s1 + $0x210] sm:$0xf0]  ;;  %v1194_v13 = vor.u32 %v1603_v63, %v1191_v0  ;;  %v1294_v35 = vor.u32 %v1630_v27, %v1293_v25  ;;  %v1594_v38 = vld [vmem:[%s2532_s1 + $0xb4] sm:$0xf0] }
  0x36   :  { %892 = vmatpush.bf16.msrb.mxu2 %v1370_v36  ;;  %v1667_v4 = vld [vmem:[%s2532_s1 + $0x304] sm:$0xf]  ;;  %v1447_v5 = vld [vmem:[%s2532_s1 + $0x310] sm:$0xf0]  ;;  %v1322_v14 = vor.u32 %v1635_v1, %v1319_v3  ;;  %v1422_v36 = vor.u32 %v1662_v29, %v1421_v28  ;;  %v1277_v39 = vld [vmem:[%s2532_s1 + $0x1a8] sm:$0xf] }
  0x37   :  { %905 = vmatpush.bf16.msrb.mxu3 %v1498_v40  ;;  %v1450_v19 = vor.u32 %v1667_v4, %v1447_v5  ;;  %v1550_v40 = vor.u32 %v1694_v33, %v1549_v32  ;;  %v1626_v41 = vld [vmem:[%s2532_s1 + $0x1b4] sm:$0xf0]  ;;  %v1405_v42 = vld [vmem:[%s2532_s1 + $0x2a8] sm:$0xf] }
  0x38   :  { %867 = vmatpush.bf16.msrb.mxu0 %v1098_v46  ;;  %v1658_v43 = vld [vmem:[%s2532_s1 + $0x2b4] sm:$0xf0]  ;;  %v1533_v44 = vld [vmem:[%s2532_s1 + $0x3a8] sm:$0xf]  ;;  %v1150_v46 = vor.u32 %v1594_v38, %v1149_v37 }
  0x39   :  { %880 = vmatpush.bf16.msrb.mxu1 %v1226_v47  ;;  %v1690_v45 = vld [vmem:[%s2532_s1 + $0x3b4] sm:$0xf0]  ;;  %v1278_v47 = vor.u32 %v1626_v41, %v1277_v39  ;;  %v1133_v49 = vld [vmem:[%s2532_s1 + $0x88] sm:$0xf] }
  0x3a   :  { %893 = vmatpush.bf16.msrb.mxu2 %v1354_v48  ;;  %v1406_v48 = vor.u32 %v1658_v43, %v1405_v42  ;;  %v1590_v50 = vld [vmem:[%s2532_s1 + $0x94] sm:$0xf0]  ;;  %v1261_v51 = vld [vmem:[%s2532_s1 + $0x188] sm:$0xf] }
  0x3b   :  { %906 = vmatpush.bf16.msrb.mxu3 %v1482_v52  ;;  %v1534_v52 = vor.u32 %v1690_v45, %v1533_v44  ;;  %v1622_v53 = vld [vmem:[%s2532_s1 + $0x194] sm:$0xf0]  ;;  %v1389_v54 = vld [vmem:[%s2532_s1 + $0x288] sm:$0xf] }
  0x3c   :  { %868 = vmatpush.bf16.msrb.mxu0 %v1082_v58  ;;  %v1654_v55 = vld [vmem:[%s2532_s1 + $0x294] sm:$0xf0]  ;;  %v1517_v56 = vld [vmem:[%s2532_s1 + $0x388] sm:$0xf]  ;;  %v1134_v58 = vor.u32 %v1590_v50, %v1133_v49  ;;  %v1262_v59 = vor.u32 %v1622_v53, %v1261_v51  ;;  %v1311_v50 = vld [vmem:[%s2532_s1 + $0x1f8] sm:$0xf0] }
  0x3d   :  { %881 = vmatpush.bf16.msrb.mxu1 %v1210_v61  ;;  %v1686_v57 = vld [vmem:[%s2532_s1 + $0x394] sm:$0xf0]  ;;  %v1390_v60 = vor.u32 %v1654_v55, %v1389_v54  ;;  %v1117_v61 = vld [vmem:[%s2532_s1 + $0x68] sm:$0xf]  ;;  %v1664_v51 = vld [vmem:[%s2532_s1 + $0x2ec] sm:$0xf] }
  0x3e   :  { %894 = vmatpush.bf16.msrb.mxu2 %v1338_v62  ;;  %v1586_v62 = vld [vmem:[%s2532_s1 + $0x74] sm:$0xf0]  ;;  %v1245_v63 = vld [vmem:[%s2532_s1 + $0x168] sm:$0xf]  ;;  %v1518_v0 = vor.u32 %v1686_v57, %v1517_v56  ;;  %v1696_v55 = vld [vmem:[%s2532_s1 + $0x3ec] sm:$0xf] }
  0x3f   :  { %907 = vmatpush.bf16.msrb.mxu3 %v1466_v2  ;;  %v1618_v1 = vld [vmem:[%s2532_s1 + $0x174] sm:$0xf0]  ;;  %v1373_v2 = vld [vmem:[%s2532_s1 + $0x268] sm:$0xf]  ;;  %v1118_v6 = vor.u32 %v1586_v62, %v1117_v61  ;;  %v1567_v56 = vld [vmem:[%s2532_s1 + $0x3f8] sm:$0xf0] }
  0x40   :  { %869 = vmatpush.bf16.msrb.mxu0 %v1066_v9  ;;  %v1650_v3 = vld [vmem:[%s2532_s1 + $0x274] sm:$0xf0]  ;;  %v1501_v4 = vld [vmem:[%s2532_s1 + $0x368] sm:$0xf]  ;;  %v1246_v7 = vor.u32 %v1618_v1, %v1245_v63  ;;  %v1596_v61 = vld [vmem:[%s2532_s1 + $0xcc] sm:$0xf] }
  0x41   :  { %882 = vmatpush.bf16.msrb.mxu1 %v1194_v13  ;;  %v1682_v5 = vld [vmem:[%s2532_s1 + $0x374] sm:$0xf0]  ;;  %v1374_v8 = vor.u32 %v1650_v3, %v1373_v2  ;;  %v1101_v9 = vld [vmem:[%s2532_s1 + $0x48] sm:$0xf]  ;;  %v1167_v62 = vld [vmem:[%s2532_s1 + $0xd8] sm:$0xf0] }
  0x42   :  { %895 = vmatpush.bf16.msrb.mxu2 %v1322_v14  ;;  %v1582_v10 = vld [vmem:[%s2532_s1 + $0x54] sm:$0xf0]  ;;  %v1229_v11 = vld [vmem:[%s2532_s1 + $0x148] sm:$0xf]  ;;  %v1502_v12 = vor.u32 %v1682_v5, %v1501_v4  ;;  %v1628_v63 = vld [vmem:[%s2532_s1 + $0x1cc] sm:$0xf] }
  0x43   :  { %908 = vmatpush.bf16.msrb.mxu3 %v1450_v19  ;;  %870 = vmatmul.bf16.vlgmr.msrb.gmra.mxu0 %v2036_v30  ;;  %v1614_v13 = vld [vmem:[%s2532_s1 + $0x154] sm:$0xf0]  ;;  %v1357_v14 = vld [vmem:[%s2532_s1 + $0x248] sm:$0xf]  ;;  %v1295_v1 = vld [vmem:[%s2532_s1 + $0x1d8] sm:$0xf0] }
  0x44   :  { %914 = vmatpush.bf16.msra.mxu0 %v1182_v20  ;;  %883 = vmatmul.bf16.vlgmr.msrb.gmra.mxu1 %v2038_v31  ;;  %v1646_v17 = vld [vmem:[%s2532_s1 + $0x254] sm:$0xf0]  ;;  %v1485_v18 = vld [vmem:[%s2532_s1 + $0x348] sm:$0xf]  ;;  %v1102_v20 = vor.u32 %v1582_v10, %v1101_v9  ;;  %v1660_v2 = vld [vmem:[%s2532_s1 + $0x2cc] sm:$0xf] }
  0x45   :  { %927 = vmatpush.bf16.msra.mxu1 %v1310_v21  ;;  %896 = vmatmul.bf16.vlgmr.msrb.gmra.mxu2 %v2010_v15  ;;  %v1678_v19 = vld [vmem:[%s2532_s1 + $0x354] sm:$0xf0]  ;;  %v1230_v21 = vor.u32 %v1614_v13, %v1229_v11  ;;  %v1085_v23 = vld [vmem:[%s2532_s1 + $0x28] sm:$0xf]  ;;  %v1423_v3 = vld [vmem:[%s2532_s1 + $0x2d8] sm:$0xf0] }
  0x46   :  { %940 = vmatpush.bf16.msra.mxu2 %v1438_v22  ;;  %909 = vmatmul.bf16.vlgmr.msrb.gmra.mxu3 %v2012_v16  ;;  %v1358_v22 = vor.u32 %v1646_v17, %v1357_v14  ;;  %v1578_v24 = vld [vmem:[%s2532_s1 + $0x34] sm:$0xf0]  ;;  %v1213_v25 = vld [vmem:[%s2532_s1 + $0x128] sm:$0xf]  ;;  %v1692_v4 = vld [vmem:[%s2532_s1 + $0x3cc] sm:$0xf] }
  0x47   :  { %953 = vmatpush.bf16.msra.mxu3 %v1566_v26  ;;  %v1486_v26 = vor.u32 %v1678_v19, %v1485_v18  ;;  %v1610_v27 = vld [vmem:[%s2532_s1 + $0x134] sm:$0xf0]  ;;  %v1341_v28 = vld [vmem:[%s2532_s1 + $0x228] sm:$0xf]  ;;  %v1551_v5 = vld [vmem:[%s2532_s1 + $0x3d8] sm:$0xf0] }
  0x48   :  { %915 = vmatpush.bf16.msra.mxu0 %v1166_v34  ;;  %v1642_v29 = vld [vmem:[%s2532_s1 + $0x234] sm:$0xf0]  ;;  %v1469_v32 = vld [vmem:[%s2532_s1 + $0x328] sm:$0xf]  ;;  %v1086_v34 = vor.u32 %v1578_v24, %v1085_v23  ;;  %v1214_v37 = vor.u32 %v1610_v27, %v1213_v25  ;;  %v1592_v9 = vld [vmem:[%s2532_s1 + $0xac] sm:$0xf] }
  0x49   :  { %928 = vmatpush.bf16.msra.mxu1 %v1294_v35  ;;  %v1674_v33 = vld [vmem:[%s2532_s1 + $0x334] sm:$0xf0]  ;;  %v1069_v35 = vld [vmem:[%s2532_s1 + $0x8] sm:$0xf]  ;;  %v1342_v38 = vor.u32 %v1642_v29, %v1341_v28  ;;  %v1151_v10 = vld [vmem:[%s2532_s1 + $0xb8] sm:$0xf0] }
  0x4a   :  { %941 = vmatpush.bf16.msra.mxu2 %v1422_v36  ;;  %v1574_v36 = vld [vmem:[%s2532_s1 + $0x14] sm:$0xf0]  ;;  %v1197_v39 = vld [vmem:[%s2532_s1 + $0x108] sm:$0xf]  ;;  %v1470_v42 = vor.u32 %v1674_v33, %v1469_v32  ;;  %v1624_v11 = vld [vmem:[%s2532_s1 + $0x1ac] sm:$0xf] }
  0x4b   :  { %954 = vmatpush.bf16.msra.mxu3 %v1550_v40  ;;  %v1606_v40 = vld [vmem:[%s2532_s1 + $0x114] sm:$0xf0]  ;;  %v1325_v41 = vld [vmem:[%s2532_s1 + $0x208] sm:$0xf]  ;;  %v1070_v49 = vor.u32 %v1574_v36, %v1069_v35  ;;  %v1279_v13 = vld [vmem:[%s2532_s1 + $0x1b8] sm:$0xf0] }
  0x4c   :  { %916 = vmatpush.bf16.msra.mxu0 %v1150_v46  ;;  %v1638_v43 = vld [vmem:[%s2532_s1 + $0x214] sm:$0xf0]  ;;  %v1453_v44 = vld [vmem:[%s2532_s1 + $0x308] sm:$0xf]  ;;  %v1600_v46 = vld [vmem:[%s2532_s1 + $0xec] sm:$0xf]  ;;  %v1198_v53 = vor.u32 %v1606_v40, %v1197_v39 }
  0x4d   :  { %929 = vmatpush.bf16.msra.mxu1 %v1278_v47  ;;  %v1670_v45 = vld [vmem:[%s2532_s1 + $0x314] sm:$0xf0]  ;;  %v1183_v47 = vld [vmem:[%s2532_s1 + $0xf8] sm:$0xf0]  ;;  %v1326_v54 = vor.u32 %v1638_v43, %v1325_v41  ;;  %v1656_v14 = vld [vmem:[%s2532_s1 + $0x2ac] sm:$0xf] }
  0x4e   :  { %942 = vmatpush.bf16.msra.mxu2 %v1406_v48  ;;  %v1632_v48 = vld [vmem:[%s2532_s1 + $0x1ec] sm:$0xf]  ;;  %v1454_v57 = vor.u32 %v1670_v45, %v1453_v44  ;;  %v1407_v17 = vld [vmem:[%s2532_s1 + $0x2b8] sm:$0xf0] }
  0x4f   :  { %955 = vmatpush.bf16.msra.mxu3 %v1534_v52  ;;  %v1439_v52 = vld [vmem:[%s2532_s1 + $0x2f8] sm:$0xf0]  ;;  %v1688_v18 = vld [vmem:[%s2532_s1 + $0x3ac] sm:$0xf] }
  0x50   :  { %917 = vmatpush.bf16.msra.mxu0 %v1134_v58  ;;  %v1186_v58 = vor.u32 %v1600_v46, %v1183_v47  ;;  %v1535_v19 = vld [vmem:[%s2532_s1 + $0x3b8] sm:$0xf0]  ;;  %v1588_v23 = vld [vmem:[%s2532_s1 + $0x8c] sm:$0xf] }
  0x51   :  { %930 = vmatpush.bf16.msra.mxu1 %v1262_v59  ;;  %v1314_v59 = vor.u32 %v1632_v48, %v1311_v50  ;;  %v1135_v24 = vld [vmem:[%s2532_s1 + $0x98] sm:$0xf0]  ;;  %v1620_v25 = vld [vmem:[%s2532_s1 + $0x18c] sm:$0xf] }
  0x52   :  { %943 = vmatpush.bf16.msra.mxu2 %v1390_v60  ;;  %v1442_v60 = vor.u32 %v1664_v51, %v1439_v52  ;;  %v1263_v27 = vld [vmem:[%s2532_s1 + $0x198] sm:$0xf0]  ;;  %v1652_v28 = vld [vmem:[%s2532_s1 + $0x28c] sm:$0xf] }
  0x53   :  { %956 = vmatpush.bf16.msra.mxu3 %v1518_v0  ;;  %v1570_v0 = vor.u32 %v1696_v55, %v1567_v56  ;;  %v1391_v29 = vld [vmem:[%s2532_s1 + $0x298] sm:$0xf0]  ;;  %v1684_v32 = vld [vmem:[%s2532_s1 + $0x38c] sm:$0xf]  ;;  %v1266_v35 = vor.u32 %v1620_v25, %v1263_v27 }
  0x54   :  { %918 = vmatpush.bf16.msra.mxu0 %v1118_v6  ;;  %v1170_v6 = vor.u32 %v1596_v61, %v1167_v62  ;;  %v1519_v33 = vld [vmem:[%s2532_s1 + $0x398] sm:$0xf0]  ;;  %v1394_v36 = vor.u32 %v1652_v28, %v1391_v29  ;;  %v1616_v39 = vld [vmem:[%s2532_s1 + $0x16c] sm:$0xf] }
  0x55   :  { %931 = vmatpush.bf16.msra.mxu1 %v1246_v7  ;;  %v1298_v7 = vor.u32 %v1628_v63, %v1295_v1  ;;  %v1522_v40 = vor.u32 %v1684_v32, %v1519_v33  ;;  %v1247_v41 = vld [vmem:[%s2532_s1 + $0x178] sm:$0xf0]  ;;  %v1680_v44 = vld [vmem:[%s2532_s1 + $0x36c] sm:$0xf] }
  0x56   :  { %944 = vmatpush.bf16.msra.mxu2 %v1374_v8  ;;  %v1426_v8 = vor.u32 %v1660_v2, %v1423_v3  ;;  %v1375_v43 = vld [vmem:[%s2532_s1 + $0x278] sm:$0xf0]  ;;  %v1250_v47 = vor.u32 %v1616_v39, %v1247_v41  ;;  %v1612_v51 = vld [vmem:[%s2532_s1 + $0x14c] sm:$0xf] }
  0x57   :  { %957 = vmatpush.bf16.msra.mxu3 %v1502_v12  ;;  %v1554_v12 = vor.u32 %v1692_v4, %v1551_v5  ;;  %v1503_v45 = vld [vmem:[%s2532_s1 + $0x378] sm:$0xf0]  ;;  %v1676_v56 = vld [vmem:[%s2532_s1 + $0x34c] sm:$0xf] }
  0x58   :  { %919 = vmatpush.bf16.msra.mxu0 %v1102_v20  ;;  %v1154_v20 = vor.u32 %v1592_v9, %v1151_v10  ;;  %v1103_v50 = vld [vmem:[%s2532_s1 + $0x58] sm:$0xf0]  ;;  %v1506_v52 = vor.u32 %v1680_v44, %v1503_v45  ;;  %v1576_v61 = vld [vmem:[%s2532_s1 + $0x2c] sm:$0xf] }
  0x59   :  { %932 = vmatpush.bf16.msra.mxu1 %v1230_v21  ;;  %v1282_v21 = vor.u32 %v1624_v11, %v1279_v13  ;;  %v1359_v55 = vld [vmem:[%s2532_s1 + $0x258] sm:$0xf0]  ;;  %v1608_v63 = vld [vmem:[%s2532_s1 + $0x12c] sm:$0xf] }
  0x5a   :  { %945 = vmatpush.bf16.msra.mxu2 %v1358_v22  ;;  %v1410_v22 = vor.u32 %v1656_v14, %v1407_v17  ;;  %v1087_v62 = vld [vmem:[%s2532_s1 + $0x38] sm:$0xf0]  ;;  %v1640_v2 = vld [vmem:[%s2532_s1 + $0x22c] sm:$0xf] }
  0x5b   :  { %958 = vmatpush.bf16.msra.mxu3 %v1486_v26  ;;  %v1538_v26 = vor.u32 %v1688_v18, %v1535_v19  ;;  %v1215_v1 = vld [vmem:[%s2532_s1 + $0x138] sm:$0xf0]  ;;  %v1672_v4 = vld [vmem:[%s2532_s1 + $0x32c] sm:$0xf] }
  0x5c   :  { %920 = vmatpush.bf16.msra.mxu0 %v1086_v34  ;;  %v1138_v34 = vor.u32 %v1588_v23, %v1135_v24  ;;  %v1343_v3 = vld [vmem:[%s2532_s1 + $0x238] sm:$0xf0]  ;;  %v1572_v9 = vld [vmem:[%s2532_s1 + $0xc] sm:$0xf] }
  0x5d   :  { %933 = vmatpush.bf16.msra.mxu1 %v1214_v37  ;;  %v1584_v37 = vld [vmem:[%s2532_s1 + $0x6c] sm:$0xf]  ;;  %v1471_v5 = vld [vmem:[%s2532_s1 + $0x338] sm:$0xf0] }
  0x5e   :  { %946 = vmatpush.bf16.msra.mxu2 %v1342_v38  ;;  %v1119_v38 = vld [vmem:[%s2532_s1 + $0x78] sm:$0xf0]  ;;  %v1604_v11 = vld [vmem:[%s2532_s1 + $0x10c] sm:$0xf] }
  0x5f   :  { %959 = vmatpush.bf16.msra.mxu3 %v1470_v42  ;;  %v1648_v42 = vld [vmem:[%s2532_s1 + $0x26c] sm:$0xf]  ;;  %v1122_v46 = vor.u32 %v1584_v37, %v1119_v38  ;;  %v1071_v10 = vld [vmem:[%s2532_s1 + $0x18] sm:$0xf0] }
  0x60   :  { %921 = vmatpush.bf16.msra.mxu0 %v1070_v49  ;;  %v1378_v48 = vor.u32 %v1648_v42, %v1375_v43  ;;  %v1580_v49 = vld [vmem:[%s2532_s1 + $0x4c] sm:$0xf]  ;;  %v1199_v13 = vld [vmem:[%s2532_s1 + $0x118] sm:$0xf0] }
  0x61   :  { %934 = vmatpush.bf16.msra.mxu1 %v1198_v53  ;;  %v1231_v53 = vld [vmem:[%s2532_s1 + $0x158] sm:$0xf0]  ;;  %v1636_v14 = vld [vmem:[%s2532_s1 + $0x20c] sm:$0xf] }
  0x62   :  { %947 = vmatpush.bf16.msra.mxu2 %v1326_v54  ;;  %v1644_v54 = vld [vmem:[%s2532_s1 + $0x24c] sm:$0xf]  ;;  %v1327_v17 = vld [vmem:[%s2532_s1 + $0x218] sm:$0xf0] }
  0x63   :  { %960 = vmatpush.bf16.msra.mxu3 %v1454_v57  ;;  %922 = vmatmul.bf16.vlgmr.msra.gmra.mxu0 %v2036_v30  ;;  %v1487_v57 = vld [vmem:[%s2532_s1 + $0x358] sm:$0xf0]  ;;  %v1668_v18 = vld [vmem:[%s2532_s1 + $0x30c] sm:$0xf] }
  0x64   :  { %966 = vmatpush.bf16.msrb.mxu0 %v1186_v58  ;;  %935 = vmatmul.bf16.vlgmr.msra.gmra.mxu1 %v2038_v31  ;;  %v1106_v58 = vor.u32 %v1580_v49, %v1103_v50  ;;  %v1455_v19 = vld [vmem:[%s2532_s1 + $0x318] sm:$0xf0] }
  0x65   :  { %979 = vmatpush.bf16.msrb.mxu1 %v1314_v59  ;;  %948 = vmatmul.bf16.vlgmr.msra.gmra.mxu2 %v2010_v15  ;;  %v1234_v59 = vor.u32 %v1612_v51, %v1231_v53  ;;  %v1458_v23 = vor.u32 %v1668_v18, %v1455_v19 }
  0x66   :  { %992 = vmatpush.bf16.msrb.mxu2 %v1442_v60  ;;  %961 = vmatmul.bf16.vlgmr.msra.gmra.mxu3 %v2012_v16  ;;  %v1362_v60 = vor.u32 %v1644_v54, %v1359_v55 }
  0x67   :  { %1005 = vmatpush.bf16.msrb.mxu3 %v1570_v0  ;;  %v1490_v0 = vor.u32 %v1676_v56, %v1487_v57 }
  0x68   :  { %967 = vmatpush.bf16.msrb.mxu0 %v1170_v6  ;;  %v1090_v6 = vor.u32 %v1576_v61, %v1087_v62 }
  0x69   :  { %980 = vmatpush.bf16.msrb.mxu1 %v1298_v7  ;;  %v1218_v7 = vor.u32 %v1608_v63, %v1215_v1 }
  0x6a   :  { %993 = vmatpush.bf16.msrb.mxu2 %v1426_v8  ;;  %v1346_v8 = vor.u32 %v1640_v2, %v1343_v3 }
  0x6b   :  { %1006 = vmatpush.bf16.msrb.mxu3 %v1554_v12  ;;  %v1474_v12 = vor.u32 %v1672_v4, %v1471_v5 }
  0x6c   :  { %968 = vmatpush.bf16.msrb.mxu0 %v1154_v20  ;;  %v1074_v20 = vor.u32 %v1572_v9, %v1071_v10 }
  0x6d   :  { %981 = vmatpush.bf16.msrb.mxu1 %v1282_v21  ;;  %v1202_v21 = vor.u32 %v1604_v11, %v1199_v13 }
  0x6e   :  { %994 = vmatpush.bf16.msrb.mxu2 %v1410_v22  ;;  %v1330_v22 = vor.u32 %v1636_v14, %v1327_v17 }
  0x6f   :  { %1007 = vmatpush.bf16.msrb.mxu3 %v1538_v26  ;;  %v1033_v26 = vld [vmem:[%s2534_s2] sm:$0xf] }
  0x70   :  { %969 = vmatpush.bf16.msrb.mxu0 %v1138_v34  ;;  %v1035_v33 = vperm.slane %v1033_v26, 0  ;;  %v1036_v43 = vperm.slane %v1033_v26, 1  ;;  %v1037_v57 = vperm.slane %v1033_v26, 2 }
  0x71   :  { %982 = vmatpush.bf16.msrb.mxu1 %v1266_v35 }
  0x72   :  { %995 = vmatpush.bf16.msrb.mxu2 %v1394_v36 }
  0x73   :  { %1008 = vmatpush.bf16.msrb.mxu3 %v1522_v40 }
  0x74   :  { %970 = vmatpush.bf16.msrb.mxu0 %v1122_v46 }
  0x75   :  { %983 = vmatpush.bf16.msrb.mxu1 %v1250_v47 }
  0x76   :  { %996 = vmatpush.bf16.msrb.mxu2 %v1378_v48 }
  0x77   :  { %1009 = vmatpush.bf16.msrb.mxu3 %v1506_v52 }
  0x78   :  { %971 = vmatpush.bf16.msrb.mxu0 %v1106_v58 }
  0x79   :  { %984 = vmatpush.bf16.msrb.mxu1 %v1234_v59 }
  0x7a   :  { %997 = vmatpush.bf16.msrb.mxu2 %v1362_v60 }
  0x7b   :  { %1010 = vmatpush.bf16.msrb.mxu3 %v1490_v0 }
  0x7c   :  { %972 = vmatpush.bf16.msrb.mxu0 %v1090_v6 }
  0x7d   :  { %985 = vmatpush.bf16.msrb.mxu1 %v1218_v7  ;;  %v1038_v7 = vperm.slane %v1033_v26, 3 }
  0x7e   :  { %998 = vmatpush.bf16.msrb.mxu2 %v1346_v8 }
  0x7f   :  { %1011 = vmatpush.bf16.msrb.mxu3 %v1474_v12 }
  0x80   :  { %973 = vmatpush.bf16.msrb.mxu0 %v1074_v20 }
  0x81   :  { %986 = vmatpush.bf16.msrb.mxu1 %v1202_v21 }
  0x82   :  { %999 = vmatpush.bf16.msrb.mxu2 %v1330_v22 }
  0x83   :  { %1012 = vmatpush.bf16.msrb.mxu3 %v1458_v23  ;;  %974 = vmatmul.bf16.vlgmr.msrb.gmra.mxu0 %v2036_v30 }
  0x84   :  { %987 = vmatmul.bf16.vlgmr.msrb.gmra.mxu1 %v2038_v31 }
  0x85   :  { %1000 = vmatmul.bf16.vlgmr.msrb.gmra.mxu2 %v2010_v15 }
  0x86   :  { %1013 = vmatmul.bf16.vlgmr.msrb.gmra.mxu3 %v2012_v16 }
  0xa8   :  { %v832_v24 = vpop.f32.mrf.mxu1 }
  0xa9   :  { %v858_v32 = vpop.f32.mrf.mxu3 }
  0xaa   :  { %v819_v25 = vpop.f32.mrf.mxu0  ;;  %v845_v28 = vpop.f32.mrf.mxu2 }
  0xab   :  { %v833_v27 = vadd.f32 %v832_v24, %v819_v25 }
  0xad   :  { %v846_v29 = vadd.f32 %v845_v28, %v833_v27 }
  0xaf   :  { %v859_v34 = vadd.f32 %v858_v32, %v846_v29 }
  0xb0   :  { %v834_v35 = vpop.f32.mrf.mxu1 }
  0xb1   :  { %v1043_v30 = vadd.f32 %v1035_v33, %v859_v34  ;;  %v860_v15 = vpop.f32.mrf.mxu3 }
  0xb2   :  { %v821_v36 = vpop.f32.mrf.mxu0  ;;  %v847_v37 = vpop.f32.mrf.mxu2 }
  0xb3   :  { %v1047_v31 = vmax.f32 %v1043_v30, 0.0 }
  0xb5   :  { %1051 = vst [vmem:[%s2535_s3] sm:$0xff] %v1047_v31 }
  0xc0   :  { %v871_v16 = vpop.f32.mrf.mxu0 }
  0xc1   :  { %v884_v38 = vpop.f32.mrf.mxu1 }
  0xc2   :  { %v885_v39 = vadd.f32 %v884_v38, %v871_v16 }
  0xc8   :  { %v897_v40 = vpop.f32.mrf.mxu2  ;;  %v873_v45 = vpop.f32.mrf.mxu0 }
  0xc9   :  { %v898_v41 = vadd.f32 %v897_v40, %v885_v39  ;;  %v910_v42 = vpop.f32.mrf.mxu3  ;;  %v886_v46 = vpop.f32.mrf.mxu1 }
  0xcb   :  { %v911_v44 = vadd.f32 %v910_v42, %v898_v41 }
  0xcd   :  { %v1044_v47 = vadd.f32 %v1036_v43, %v911_v44 }
  0xcf   :  { %v1048_v48 = vmax.f32 %v1044_v47, 0.0 }
  0xd0   :  { %v899_v49 = vpop.f32.mrf.mxu2 }
  0xd1   :  { %1052 = vst [vmem:[%s2535_s3 + $0x8] sm:$0xff] %v1048_v48  ;;  %v912_v50 = vpop.f32.mrf.mxu3 }
  0xe0   :  { %v923_v51 = vpop.f32.mrf.mxu0 }
  0xe1   :  { %v936_v52 = vpop.f32.mrf.mxu1 }
  0xe2   :  { %v937_v53 = vadd.f32 %v936_v52, %v923_v51 }
  0xe8   :  { %v949_v54 = vpop.f32.mrf.mxu2  ;;  %v925_v59 = vpop.f32.mrf.mxu0 }
  0xe9   :  { %v950_v55 = vadd.f32 %v949_v54, %v937_v53  ;;  %v962_v56 = vpop.f32.mrf.mxu3  ;;  %v938_v60 = vpop.f32.mrf.mxu1 }
  0xeb   :  { %v963_v58 = vadd.f32 %v962_v56, %v950_v55 }
  0xed   :  { %v1045_v61 = vadd.f32 %v1037_v57, %v963_v58 }
  0xef   :  { %v1049_v62 = vmax.f32 %v1045_v61, 0.0 }
  0xf0   :  { %v951_v63 = vpop.f32.mrf.mxu2 }
  0xf1   :  { %1053 = vst [vmem:[%s2535_s3 + $0x10] sm:$0xff] %v1049_v62  ;;  %v964_v0 = vpop.f32.mrf.mxu3 }
 0x100   :  { %v975_v1 = vpop.f32.mrf.mxu0 }
 0x101   :  { %v988_v2 = vpop.f32.mrf.mxu1 }
 0x102   :  { %v989_v3 = vadd.f32 %v988_v2, %v975_v1 }
 0x108   :  { %v1001_v4 = vpop.f32.mrf.mxu2  ;;  %v977_v8 = vpop.f32.mrf.mxu0 }
 0x109   :  { %v1002_v5 = vadd.f32 %v1001_v4, %v989_v3  ;;  %v1014_v6 = vpop.f32.mrf.mxu3  ;;  %v990_v9 = vpop.f32.mrf.mxu1 }
 0x10b   :  { %v1015_v10 = vadd.f32 %v1014_v6, %v1002_v5 }
 0x10d   :  { %v1046_v11 = vadd.f32 %v1038_v7, %v1015_v10 }
 0x10f   :  { %v1050_v12 = vmax.f32 %v1046_v11, 0.0 }
 0x110   :  { %v1003_v13 = vpop.f32.mrf.mxu2 }
 0x111   :  { %1054 = vst [vmem:[%s2535_s3 + $0x18] sm:$0xff] %v1050_v12  ;;  %v1016_v14 = vpop.f32.mrf.mxu3 }

// kernel: cnn_forward.19
= control target key start
LH: loop header
LB: loop body
LE: loop exit
PB: predicated region body
PF: predicated region fallthrough
CT: control target
= control target key end

     0   :  { %s208_s1 = inlined_call_operand.vmem [shape: bf16[128,128], index: 1, kind: input, shape index: {}]   ;;  %s209_s2 = inlined_call_operand.vmem [shape: f32[1,128], index: 2, kind: input, shape index: {}]   ;;  %s210_s0 = inlined_call_operand.vmem [shape: bf16[8,128], index: 0, kind: input, shape index: {}]   ;;  %s211_s3 = inlined_call_operand.vmem [shape: f32[8,128], index: 3, kind: output, shape index: {}]  }
   0x1   :  { %v153_v0 = vld [vmem:[%s208_s1 + $0x38] sm:$0xff]  ;;  %v152_v1 = vld [vmem:[%s208_s1 + $0x30] sm:$0xff]  ;;  %v151_v2 = vld [vmem:[%s208_s1 + $0x28] sm:$0xff] }
   0x2   :  { %85 = vmatpush.bf16.msra.mxu0 %v153_v0  ;;  %v150_v3 = vld [vmem:[%s208_s1 + $0x20] sm:$0xff]  ;;  %v149_v4 = vld [vmem:[%s208_s1 + $0x18] sm:$0xff]  ;;  %v148_v5 = vld [vmem:[%s208_s1 + $0x10] sm:$0xff] }
   0x3   :  { %v147_v6 = vld [vmem:[%s208_s1 + $0x8] sm:$0xff]  ;;  %v146_v7 = vld [vmem:[%s208_s1] sm:$0xff] }
   0x4   :  { %v20_v8 = vld [vmem:[%s210_s0] sm:$0xf] }
   0x5   :  { %v154_v9 = vld [vmem:[%s209_s2] ss:$0 sm:$0xff] }
   0x6   :  { %86 = vmatpush.bf16.msra.mxu0 %v152_v1 }
   0xa   :  { %87 = vmatpush.bf16.msra.mxu0 %v151_v2 }
   0xe   :  { %88 = vmatpush.bf16.msra.mxu0 %v150_v3 }
  0x12   :  { %89 = vmatpush.bf16.msra.mxu0 %v149_v4 }
  0x16   :  { %90 = vmatpush.bf16.msra.mxu0 %v148_v5 }
  0x1a   :  { %91 = vmatpush.bf16.msra.mxu0 %v147_v6 }
  0x1e   :  { %92 = vmatpush.bf16.msra.mxu0 %v146_v7 }
  0x21   :  { %93 = vmatmul.bf16.vlgmr.msra.gmra.mxu0 %v20_v8 }
  0x9e   :  { %v94_v10 = vpop.f32.mrf.mxu0 }
  0x9f   :  { %v108_v11 = vadd.f32 %v154_v9, %v94_v10 }
  0xa1   :  { %109 = vst [vmem:[%s211_s3] sm:$0xff] %v108_v11 }
  0xa6   :  { %v96_v12 = vpop.f32.mrf.mxu0 }

</bundles_post_ra>
